<compile_context>
chip_gen: v7x
topology: tpu7x:2x2x1
jax: 0.10.0
libtpu: 0.0.40
codegen_flags: <defaults>
</compile_context>

<pallas_src>
import functools
import math

import jax
import jax.numpy as jnp
from jax.experimental import pallas as pl
from jax.experimental.pallas import tpu as pltpu

_LN_EPS = 1e-12                       # HF ViT layer_norm_eps


# ------------------------- generation-aware knobs ---------------------------

@functools.lru_cache(maxsize=None)
def _is_v7():
    try:
        kind = jax.devices()[0].device_kind.lower()
    except Exception:
        return False
    return ("v7" in kind) or ("7x" in kind)


def _vmem_limit():
    # v7x has 64 MiB physical VMEM -> keep the scoped limit tight; v5e/v6e have 128 MiB.
    return (32 if _is_v7() else 64) * 1024 * 1024


def _row_tile():
    # Larger row tiles amortize per-step overhead on 128 MiB-VMEM chips.
    return 256 if _is_v7() else 512


def _compiler_params(n_axes=1):
    return pltpu.CompilerParams(
        dimension_semantics=("parallel",) * n_axes,
        vmem_limit_bytes=_vmem_limit(),
    )


def _tile_m(m, tm=None):
    """Row tile + grid size; force >= 2 grid steps so v7x's two TCs both get work."""
    tm = min(_row_tile() if tm is None else tm, m)
    if pl.cdiv(m, tm) < 2 and m >= 16:
        tm = (((m + 1) // 2) + 7) // 8 * 8     # ~half the rows, 8-aligned
    return tm, pl.cdiv(m, tm)


# ----------------------------- Pallas kernels ------------------------------

def _matmul_bias_kernel(x_ref, w_ref, b_ref, o_ref):
    # x: (tm, K) bf16, w: (K, N) bf16, b: (1, N) f32 -> f32 accumulate
    y = jnp.dot(x_ref[...], w_ref[...],
                preferred_element_type=jnp.float32) + b_ref[...]
    o_ref[...] = y.astype(o_ref.dtype)


def _matmul_res_kernel(x_ref, w_ref, b_ref, res_ref, o_ref):
    # matmul + bias + fused residual add; residual stored bf16, added in f32
    y = (jnp.dot(x_ref[...], w_ref[...], preferred_element_type=jnp.float32)
         + b_ref[...] + res_ref[...].astype(jnp.float32))
    o_ref[...] = y.astype(o_ref.dtype)


def _ln_matmul_kernel(x_ref, g_ref, bln_ref, w_ref, b_ref, o_ref, *,
                      eps, gelu, approx_gelu):
    # fused pre-LayerNorm (f32) -> bf16 cast -> matmul (+ optional GELU)
    x = x_ref[...].astype(jnp.float32)
    mu = jnp.mean(x, axis=-1, keepdims=True)
    var = jnp.mean(jnp.square(x - mu), axis=-1, keepdims=True)
    xn = (x - mu) * jax.lax.rsqrt(var + eps) * g_ref[...] + bln_ref[...]
    y = jnp.dot(xn.astype(w_ref.dtype), w_ref[...],
                preferred_element_type=jnp.float32) + b_ref[...]
    if gelu:
        # approximate=True (tanh) uses the EUP; exact erf GELU is a long VALU
        # polynomial and makes this kernel VALU-bound on v6e/v7x.
        y = jax.nn.gelu(y, approximate=approx_gelu)
    o_ref[...] = y.astype(o_ref.dtype)


def _attention_kernel(qkv_ref, o_ref, *, scale, heads_per_group, d_head, s_real):
    # One (batch, head-group) tile per grid step.  qkv block layout per head:
    # [q_h | k_h | v_h] contiguous 3*d_head column slabs (set up at init time).
    qkv = qkv_ref[0]                       # (S_pad, heads_per_group*3*d_head) bf16
    s_pad = qkv.shape[0]

    # Additive key bias row (0 for real keys, -1e30 for padded keys); replaces the
    # per-head (S,S) iota + where(-inf).
    key_idx = jax.lax.broadcasted_iota(jnp.int32, (1, s_pad), 1)
    key_bias = jnp.where(key_idx < s_real, 0.0, -1e30).astype(jnp.float32)

    outs = []
    for h in range(heads_per_group):
        base = h * 3 * d_head
        q = qkv[:, base:base + d_head]
        k = qkv[:, base + d_head:base + 2 * d_head]
        v = qkv[:, base + 2 * d_head:base + 3 * d_head]
        s = jax.lax.dot_general(q, k, (((1,), (1,)), ((), ())),
                                preferred_element_type=jnp.float32)
        s = s * scale + key_bias
        s = s - jnp.max(s, axis=-1, keepdims=True)
        p = jnp.exp(s)
        p = p * pl.reciprocal(jnp.sum(p, axis=-1, keepdims=True), approx=True)
        outs.append(jnp.dot(p.astype(v.dtype), v,
                            preferred_element_type=jnp.float32))
    # One lane-dense store per head group (128 lanes for ViT-Base head pairs).
    grp = outs[0] if len(outs) == 1 else jnp.concatenate(outs, axis=-1)
    o_ref[0] = grp.astype(o_ref.dtype)


# ------------------------------- wrappers ----------------------------------

def pallas_linear(x, w, b, res=None, *, out_dtype=jnp.bfloat16, tm=None):
    """y = x @ w + b (+ res).  bf16 MXU operands, f32 accumulate, bf16 out."""
    M, K = x.shape
    N = w.shape[1]
    tm, gm = _tile_m(M, tm)

    x = x.astype(jnp.bfloat16)
    w = w.astype(jnp.bfloat16)
    b = b.reshape(1, N).astype(jnp.float32)

    in_specs = [
        pl.BlockSpec((tm, K), lambda i: (i, 0)),
        pl.BlockSpec((K, N), lambda i: (0, 0)),     # weight stays resident
        pl.BlockSpec((1, N), lambda i: (0, 0)),
    ]
    args = [x, w, b]
    io_aliases = {}
    if res is None:
        kernel = _matmul_bias_kernel
    else:
        kernel = _matmul_res_kernel
        in_specs.append(pl.BlockSpec((tm, N), lambda i: (i, 0)))
        args.append(res.astype(out_dtype))
        io_aliases = {3: 0}                          # reuse residual HBM buffer

    return pl.pallas_call(
        kernel,
        out_shape=jax.ShapeDtypeStruct((M, N), out_dtype),
        grid=(gm,),
        in_specs=in_specs,
        out_specs=pl.BlockSpec((tm, N), lambda i: (i, 0)),
        input_output_aliases=io_aliases,
        compiler_params=_compiler_params(1),
    )(*args)


def pallas_ln_linear(x, g, bln, w, b, *, gelu=False, approx_gelu=True,
                     out_dtype=jnp.bfloat16, eps=_LN_EPS, tm=None):
    """y = (LayerNorm(x) * g + bln) @ w + b, optional GELU.  x is bf16, LN in f32."""
    M, K = x.shape
    N = w.shape[1]
    tm, gm = _tile_m(M, tm)

    return pl.pallas_call(
        functools.partial(_ln_matmul_kernel, eps=eps, gelu=gelu,
                          approx_gelu=approx_gelu),
        out_shape=jax.ShapeDtypeStruct((M, N), out_dtype),
        grid=(gm,),
        in_specs=[
            pl.BlockSpec((tm, K), lambda i: (i, 0)),
            pl.BlockSpec((1, K), lambda i: (0, 0)),
            pl.BlockSpec((1, K), lambda i: (0, 0)),
            pl.BlockSpec((K, N), lambda i: (0, 0)),
            pl.BlockSpec((1, N), lambda i: (0, 0)),
        ],
        out_specs=pl.BlockSpec((tm, N), lambda i: (i, 0)),
        compiler_params=_compiler_params(1),
    )(x.astype(jnp.bfloat16),
      g.reshape(1, K).astype(jnp.float32),
      bln.reshape(1, K).astype(jnp.float32),
      w.astype(jnp.bfloat16),
      b.reshape(1, N).astype(jnp.float32))


def _head_group_size(n_heads, d_head):
    """Smallest divisor of n_heads whose output width is 128-lane aligned."""
    for g in range(1, n_heads + 1):
        if n_heads % g == 0 and (g * d_head) % 128 == 0:
            return g
    return n_heads            # fall back: one group == full hidden dim (small models)


def pallas_attention(qkv, n_heads, d_head, s_real):
    """qkv: (B, S_pad, 3*D) bf16 (per-head [q|k|v] column layout) -> (B, S_pad, D) bf16."""
    B, S, threeD = qkv.shape
    D = n_heads * d_head
    hpg = _head_group_size(n_heads, d_head)
    n_groups = n_heads // hpg
    gcols_in = hpg * 3 * d_head
    gcols_out = hpg * d_head
    scale = 1.0 / math.sqrt(d_head)
    return pl.pallas_call(
        functools.partial(_attention_kernel, scale=scale, heads_per_group=hpg,
                          d_head=d_head, s_real=s_real),
        out_shape=jax.ShapeDtypeStruct((B, S, D), jnp.bfloat16),
        grid=(B, n_groups),
        in_specs=[pl.BlockSpec((1, S, gcols_in), lambda b, g: (b, 0, g))],
        out_specs=pl.BlockSpec((1, S, gcols_out), lambda b, g: (b, 0, g)),
        compiler_params=_compiler_params(2),
    )(qkv.astype(jnp.bfloat16))


# ------------------------------ model forward -------------------------------

def vit_pose_forward(x, params, cfg):
    B, C, H, W = x.shape
    P, D, nH = cfg["patch"], cfg["hidden"], cfg["heads"]
    Dh = D // nH
    nh, nw = H // P, W // P
    N = nh * nw
    S = N + 1
    S_pad = ((S + 15) // 16) * 16    # bf16 packs (16,128) per vreg -> pad to 16
    approx_gelu = cfg.get("approx_gelu", True)

    # Patch embedding: Conv2d(C, D, kernel=P, stride=P) == unfold + linear.
    patches = (x.reshape(B, C, nh, P, nw, P)
                 .transpose(0, 2, 4, 1, 3, 5)
                 .reshape(B * N, C * P * P))
    tok = pallas_linear(patches, params["patch_w"], params["patch_b"]).reshape(B, N, D)

    cls = jnp.broadcast_to(params["cls"], (B, 1, D)).astype(jnp.bfloat16)
    h = jnp.concatenate([cls, tok], axis=1) + params["pos"].astype(jnp.bfloat16)
    if S_pad != S:
        h = jnp.pad(h, ((0, 0), (0, S_pad - S), (0, 0)))
    h = h.reshape(B * S_pad, D)      # bf16 residual stream in HBM

    for layer in params["layers"]:
        # --- self-attention block (pre-LN fused into the QKV projection) ---
        qkv = pallas_ln_linear(h, layer["ln1_g"], layer["ln1_b"],
                               layer["qkv_w"], layer["qkv_b"])        # (M, 3D) bf16
        ctx = pallas_attention(qkv.reshape(B, S_pad, 3 * D), nH, Dh, S)
        h = pallas_linear(ctx.reshape(B * S_pad, D),
                          layer["o_w"], layer["o_b"], res=h)          # + residual

        # --- MLP block (pre-LN fused into fc1, residual fused into fc2) ---
        mid = pallas_ln_linear(h, layer["ln2_g"], layer["ln2_b"],
                               layer["fc1_w"], layer["fc1_b"],
                               gelu=True, approx_gelu=approx_gelu)
        h = pallas_linear(mid, layer["fc2_w"], layer["fc2_b"], res=h)

    # Final LN + keypoint head on the CLS token only (only row the head reads).
    # Tiny (B, D) x (D, 2K) GEMV -> plain JAX (pure launch overhead as a pallas_call).
    cls_tok = h.reshape(B, S_pad, D)[:, 0, :].astype(jnp.float32)
    mu = jnp.mean(cls_tok, axis=-1, keepdims=True)
    var = jnp.mean(jnp.square(cls_tok - mu), axis=-1, keepdims=True)
    cls_n = ((cls_tok - mu) * jax.lax.rsqrt(var + _LN_EPS)
             * params["lnf_g"] + params["lnf_b"])
    return cls_n @ params["fc_w"] + params["fc_b"]


# ------------------------------- params init --------------------------------

def _interleave_qkv_columns(w_qkv, b_qkv, n_heads, d_head):
    """[Q | K | V] column layout -> per-head [q_h | k_h | v_h] slabs."""
    K = w_qkv.shape[0]
    D = n_heads * d_head
    w = w_qkv.reshape(K, 3, n_heads, d_head).transpose(0, 2, 1, 3).reshape(K, 3 * D)
    b = b_qkv.reshape(3, n_heads, d_head).transpose(1, 0, 2).reshape(3 * D)
    return w, b


def init_params(key, cfg):
    C, P, D, Dm = cfg["channels"], cfg["patch"], cfg["hidden"], cfg["mlp"]
    nH = cfg["heads"]
    Dh = D // nH
    N = (cfg["image"] // P) ** 2
    nk2 = cfg["num_keypoints"] * 2
    keys = iter(jax.random.split(key, 4 + cfg["layers"] * 4))
    f32, bf16 = jnp.float32, jnp.bfloat16

    def w(shape, dtype=bf16, scale=0.02):
        return (scale * jax.random.normal(next(keys), shape, f32)).astype(dtype)

    params = {
        "patch_w": w((C * P * P, D)),                 # bf16 MXU weight
        "patch_b": jnp.zeros((D,), f32),
        "cls": w((1, 1, D), f32),
        "pos": w((1, N + 1, D), f32),
        "lnf_g": jnp.ones((D,), f32),
        "lnf_b": jnp.zeros((D,), f32),
        "fc_w": w((D, nk2), f32),                     # tiny head stays f32 / JAX
        "fc_b": jnp.zeros((nk2,), f32),
        "layers": [],
    }
    for _ in range(cfg["layers"]):
        qkv_w, qkv_b = _interleave_qkv_columns(
            w((D, 3 * D)), jnp.zeros((3 * D,), f32), nH, Dh)
        params["layers"].append({
            "ln1_g": jnp.ones((D,), f32), "ln1_b": jnp.zeros((D,), f32),
            "qkv_w": qkv_w, "qkv_b": qkv_b,           # per-head [q|k|v] column slabs
            "o_w": w((D, D)), "o_b": jnp.zeros((D,), f32),
            "ln2_g": jnp.ones((D,), f32), "ln2_b": jnp.zeros((D,), f32),
            "fc1_w": w((D, Dm)), "fc1_b": jnp.zeros((Dm,), f32),
            "fc2_w": w((Dm, D)), "fc2_b": jnp.zeros((D,), f32),
        })
    return params


# ---------------------------------- main -------------------------------------

if __name__ == "__main__":
    # Small-shape stand-in for google/vit-base-patch16-224 (224->16 image,
    # hidden 768->32, 12 heads->4, 12 layers->2, mlp 3072->64).
    cfg = dict(batch=2, channels=4, image=16, patch=8, hidden=32, heads=4,
               layers=2, mlp=64, num_keypoints=8,
               approx_gelu=True)   # True = tanh GELU (EUP); False = HF exact erf GELU

    key = jax.random.PRNGKey(0)
    kp, kx = jax.random.split(key)
    params = init_params(kp, cfg)
    x = jax.random.normal(
        kx, (cfg["batch"], cfg["channels"], cfg["image"], cfg["image"]), jnp.float32)

    fwd = jax.jit(functools.partial(vit_pose_forward, cfg=cfg))
    out = jax.block_until_ready(fwd(x, params))
    assert out.shape == (cfg["batch"], cfg["num_keypoints"] * 2), out.shape
    assert out.dtype == jnp.float32
    print("KERNEL_OK")
</pallas_src>

<mosaic_0001>
module attributes {stable_mosaic.version = 11 : i64} {
  func.func @_matmul_bias_kernel(%arg0: i32, %arg1: memref<8x256xbf16, #tpu.memory_space<vmem>>, %arg2: memref<256x32xbf16, #tpu.memory_space<vmem>>, %arg3: memref<1x32xf32, #tpu.memory_space<vmem>>, %arg4: memref<8x32xbf16, #tpu.memory_space<vmem>>) attributes {dimension_semantics = [#tpu.dimension_semantics<parallel>], iteration_bounds = array<i64: 1>, scalar_prefetch = 0 : i64, scratch_operands = 0 : i64, tpu.core_type = #tpu.core_type<tc>, window_params = [{transform_indices = @transform_0, window_bounds = array<i64: 8, 256>}, {pipeline_mode = #tpu.pipeline_mode<synchronous>, transform_indices = @transform_1, window_bounds = array<i64: 256, 32>}, {pipeline_mode = #tpu.pipeline_mode<synchronous>, transform_indices = @transform_2, window_bounds = array<i64: 1, 32>}, {transform_indices = @transform_3, window_bounds = array<i64: 8, 32>}]} {
    %c0 = arith.constant 0 : index
    %c0_0 = arith.constant 0 : index
    %0 = vector.load %arg1[%c0, %c0_0] : memref<8x256xbf16, #tpu.memory_space<vmem>>, vector<8x256xbf16>
    %c0_1 = arith.constant 0 : index
    %c0_2 = arith.constant 0 : index
    %1 = vector.load %arg2[%c0_1, %c0_2] : memref<256x32xbf16, #tpu.memory_space<vmem>>, vector<256x32xbf16>
    %cst = arith.constant dense<0.000000e+00> : vector<8x32xf32>
    %2 = tpu.matmul %0, %1, %cst {dimension_numbers = #tpu.dot_dimension_numbers<[1], [0], [0], [1], [0, 0, 1, 1], [], []>} : vector<8x256xbf16>, vector<256x32xbf16>, vector<8x32xf32> -> vector<8x32xf32>
    %c0_3 = arith.constant 0 : index
    %c0_4 = arith.constant 0 : index
    %3 = vector.load %arg3[%c0_3, %c0_4] : memref<1x32xf32, #tpu.memory_space<vmem>>, vector<1x32xf32>
    %4 = vector.broadcast %3 : vector<1x32xf32> to vector<8x32xf32>
    %5 = arith.addf %2, %4 : vector<8x32xf32>
    %6 = arith.truncf %5 : vector<8x32xf32> to vector<8x32xbf16>
    %c0_5 = arith.constant 0 : index
    %c0_6 = arith.constant 0 : index
    %7 = vector.load %arg4[%c0_5, %c0_6] : memref<8x32xbf16, #tpu.memory_space<vmem>>, vector<8x32xbf16>
    tpu.vector_store %arg4[%c0_5, %c0_6], %6 {strides = array<i32>} : memref<8x32xbf16, #tpu.memory_space<vmem>>, vector<8x32xbf16>,
    return
  }
  func.func @transform_0(%arg0: i32) -> (i32, i32) {
    %c0_i32 = arith.constant 0 : i32
    %c0_i32_0 = arith.constant 0 : i32
    return %arg0, %c0_i32 : i32, i32
  }
  func.func @transform_1(%arg0: i32) -> (i32, i32) {
    %c0_i32 = arith.constant 0 : i32
    %c0_i32_0 = arith.constant 0 : i32
    %c0_i32_1 = arith.constant 0 : i32
    return %c0_i32, %c0_i32_0 : i32, i32
  }
  func.func @transform_2(%arg0: i32) -> (i32, i32) {
    %c0_i32 = arith.constant 0 : i32
    %c0_i32_0 = arith.constant 0 : i32
    %c0_i32_1 = arith.constant 0 : i32
    return %c0_i32, %c0_i32_0 : i32, i32
  }
  func.func @transform_3(%arg0: i32) -> (i32, i32) {
    %c0_i32 = arith.constant 0 : i32
    %c0_i32_0 = arith.constant 0 : i32
    return %arg0, %c0_i32 : i32, i32
  }
}

module attributes {stable_mosaic.version = 11 : i64} {
  func.func @_ln_matmul_kernel(%arg0: i32, %arg1: memref<16x32xbf16, #tpu.memory_space<vmem>>, %arg2: memref<1x32xf32, #tpu.memory_space<vmem>>, %arg3: memref<1x32xf32, #tpu.memory_space<vmem>>, %arg4: memref<32x96xbf16, #tpu.memory_space<vmem>>, %arg5: memref<1x96xf32, #tpu.memory_space<vmem>>, %arg6: memref<16x96xbf16, #tpu.memory_space<vmem>>) attributes {dimension_semantics = [#tpu.dimension_semantics<parallel>], iteration_bounds = array<i64: 2>, scalar_prefetch = 0 : i64, scratch_operands = 0 : i64, tpu.core_type = #tpu.core_type<tc>, window_params = [{transform_indices = @transform_0, window_bounds = array<i64: 16, 32>}, {pipeline_mode = #tpu.pipeline_mode<synchronous>, transform_indices = @transform_1, window_bounds = array<i64: 1, 32>}, {pipeline_mode = #tpu.pipeline_mode<synchronous>, transform_indices = @transform_2, window_bounds = array<i64: 1, 32>}, {pipeline_mode = #tpu.pipeline_mode<synchronous>, transform_indices = @transform_3, window_bounds = array<i64: 32, 96>}, {pipeline_mode = #tpu.pipeline_mode<synchronous>, transform_indices = @transform_4, window_bounds = array<i64: 1, 96>}, {transform_indices = @transform_5, window_bounds = array<i64: 16, 96>}]} {
    %c0 = arith.constant 0 : index
    %c0_0 = arith.constant 0 : index
    %0 = vector.load %arg1[%c0, %c0_0] : memref<16x32xbf16, #tpu.memory_space<vmem>>, vector<16x32xbf16>
    %1 = arith.extf %0 : vector<16x32xbf16> to vector<16x32xf32>
    %cst = arith.constant dense<0.000000e+00> : vector<16xf32>
    %2 = vector.multi_reduction <add>, %1, %cst [1] : vector<16x32xf32> to vector<16xf32>
    %3 = vector.shape_cast %2 : vector<16xf32> to vector<16x1xf32>
    %cst_1 = arith.constant 3.200000e+01 : f32
    %4 = vector.broadcast %cst_1 : f32 to vector<16x1xf32>
    %5 = arith.divf %3, %4 : vector<16x1xf32>
    %6 = vector.broadcast %5 : vector<16x1xf32> to vector<16x32xf32>
    %7 = arith.subf %1, %6 : vector<16x32xf32>
    %8 = arith.mulf %7, %7 : vector<16x32xf32>
    %cst_2 = arith.constant dense<0.000000e+00> : vector<16xf32>
    %9 = vector.multi_reduction <add>, %8, %cst_2 [1] : vector<16x32xf32> to vector<16xf32>
    %10 = vector.shape_cast %9 : vector<16xf32> to vector<16x1xf32>
    %cst_3 = arith.constant 3.200000e+01 : f32
    %11 = vector.broadcast %cst_3 : f32 to vector<16x1xf32>
    %12 = arith.divf %10, %11 : vector<16x1xf32>
    %13 = vector.broadcast %5 : vector<16x1xf32> to vector<16x32xf32>
    %14 = arith.subf %1, %13 : vector<16x32xf32>
    %cst_4 = arith.constant 9.99999996E-13 : f32
    %15 = vector.broadcast %cst_4 : f32 to vector<16x1xf32>
    %16 = arith.addf %12, %15 : vector<16x1xf32>
    %17 = math.rsqrt %16 : vector<16x1xf32>
    %18 = vector.broadcast %17 : vector<16x1xf32> to vector<16x32xf32>
    %19 = arith.mulf %14, %18 : vector<16x32xf32>
    %c0_5 = arith.constant 0 : index
    %c0_6 = arith.constant 0 : index
    %20 = vector.load %arg2[%c0_5, %c0_6] : memref<1x32xf32, #tpu.memory_space<vmem>>, vector<1x32xf32>
    %21 = vector.broadcast %20 : vector<1x32xf32> to vector<16x32xf32>
    %22 = arith.mulf %19, %21 : vector<16x32xf32>
    %c0_7 = arith.constant 0 : index
    %c0_8 = arith.constant 0 : index
    %23 = vector.load %arg3[%c0_7, %c0_8] : memref<1x32xf32, #tpu.memory_space<vmem>>, vector<1x32xf32>
    %24 = vector.broadcast %23 : vector<1x32xf32> to vector<16x32xf32>
    %25 = arith.addf %22, %24 : vector<16x32xf32>
    %26 = arith.truncf %25 : vector<16x32xf32> to vector<16x32xbf16>
    %c0_9 = arith.constant 0 : index
    %c0_10 = arith.constant 0 : index
    %27 = vector.load %arg4[%c0_9, %c0_10] : memref<32x96xbf16, #tpu.memory_space<vmem>>, vector<32x96xbf16>
    %cst_11 = arith.constant dense<0.000000e+00> : vector<16x96xf32>
    %28 = tpu.matmul %26, %27, %cst_11 {dimension_numbers = #tpu.dot_dimension_numbers<[1], [0], [0], [1], [0, 0, 1, 1], [], []>} : vector<16x32xbf16>, vector<32x96xbf16>, vector<16x96xf32> -> vector<16x96xf32>
    %c0_12 = arith.constant 0 : index
    %c0_13 = arith.constant 0 : index
    %29 = vector.load %arg5[%c0_12, %c0_13] : memref<1x96xf32, #tpu.memory_space<vmem>>, vector<1x96xf32>
    %30 = vector.broadcast %29 : vector<1x96xf32> to vector<16x96xf32>
    %31 = arith.addf %28, %30 : vector<16x96xf32>
    %32 = arith.truncf %31 : vector<16x96xf32> to vector<16x96xbf16>
    %c0_14 = arith.constant 0 : index
    %c0_15 = arith.constant 0 : index
    %33 = vector.load %arg6[%c0_14, %c0_15] : memref<16x96xbf16, #tpu.memory_space<vmem>>, vector<16x96xbf16>
    tpu.vector_store %arg6[%c0_14, %c0_15], %32 {strides = array<i32>} : memref<16x96xbf16, #tpu.memory_space<vmem>>, vector<16x96xbf16>,
    return
  }
  func.func @transform_0(%arg0: i32) -> (i32, i32) {
    %c0_i32 = arith.constant 0 : i32
    %c0_i32_0 = arith.constant 0 : i32
    return %arg0, %c0_i32 : i32, i32
  }
  func.func @transform_1(%arg0: i32) -> (i32, i32) {
    %c0_i32 = arith.constant 0 : i32
    %c0_i32_0 = arith.constant 0 : i32
    %c0_i32_1 = arith.constant 0 : i32
    return %c0_i32, %c0_i32_0 : i32, i32
  }
  func.func @transform_2(%arg0: i32) -> (i32, i32) {
    %c0_i32 = arith.constant 0 : i32
    %c0_i32_0 = arith.constant 0 : i32
    %c0_i32_1 = arith.constant 0 : i32
    return %c0_i32, %c0_i32_0 : i32, i32
  }
  func.func @transform_3(%arg0: i32) -> (i32, i32) {
    %c0_i32 = arith.constant 0 : i32
    %c0_i32_0 = arith.constant 0 : i32
    %c0_i32_1 = arith.constant 0 : i32
    return %c0_i32, %c0_i32_0 : i32, i32
  }
  func.func @transform_4(%arg0: i32) -> (i32, i32) {
    %c0_i32 = arith.constant 0 : i32
    %c0_i32_0 = arith.constant 0 : i32
    %c0_i32_1 = arith.constant 0 : i32
    return %c0_i32, %c0_i32_0 : i32, i32
  }
  func.func @transform_5(%arg0: i32) -> (i32, i32) {
    %c0_i32 = arith.constant 0 : i32
    %c0_i32_0 = arith.constant 0 : i32
    return %arg0, %c0_i32 : i32, i32
  }
}

module attributes {stable_mosaic.version = 11 : i64} {
  func.func @_attention_kernel(%arg0: i32, %arg1: i32, %arg2: memref<1x16x96xbf16, #tpu.memory_space<vmem>>, %arg3: memref<1x16x32xbf16, #tpu.memory_space<vmem>>) attributes {dimension_semantics = [#tpu.dimension_semantics<parallel>, #tpu.dimension_semantics<parallel>], iteration_bounds = array<i64: 2, 1>, scalar_prefetch = 0 : i64, scratch_operands = 0 : i64, tpu.core_type = #tpu.core_type<tc>, window_params = [{transform_indices = @transform_0, window_bounds = array<i64: 1, 16, 96>}, {transform_indices = @transform_1, window_bounds = array<i64: 1, 16, 32>}]} {
    %c0 = arith.constant 0 : index
    %c0_0 = arith.constant 0 : index
    %c0_1 = arith.constant 0 : index
    %0 = vector.load %arg2[%c0, %c0_0, %c0_1] : memref<1x16x96xbf16, #tpu.memory_space<vmem>>, vector<1x16x96xbf16>
    %1 = vector.shape_cast %0 : vector<1x16x96xbf16> to vector<16x96xbf16>
    %2 = tpu.iota {dimensions = array<i32: 1>} : vector<1x16xi32>
    %c5_i32 = arith.constant 5 : i32
    %3 = vector.broadcast %c5_i32 : i32 to vector<1x16xi32>
    %4 = arith.cmpi slt, %2, %3 : vector<1x16xi32>
    %cst = arith.constant 0.000000e+00 : f32
    %cst_2 = arith.constant -1.000000e+30 : f32
    %5 = vector.broadcast %cst : f32 to vector<1x16xf32>
    %6 = vector.broadcast %cst_2 : f32 to vector<1x16xf32>
    %7 = arith.select %4, %5, %6 : vector<1x16xi1>, vector<1x16xf32>
    %8 = vector.extract_strided_slice %1 {offsets = [0, 0], sizes = [16, 8], strides = [1, 1]} : vector<16x96xbf16> to vector<16x8xbf16>
    %9 = vector.extract_strided_slice %1 {offsets = [0, 8], sizes = [16, 8], strides = [1, 1]} : vector<16x96xbf16> to vector<16x8xbf16>
    %10 = vector.extract_strided_slice %1 {offsets = [0, 16], sizes = [16, 8], strides = [1, 1]} : vector<16x96xbf16> to vector<16x8xbf16>
    %cst_3 = arith.constant dense<0.000000e+00> : vector<16x16xf32>
    %11 = tpu.matmul %8, %9, %cst_3 {dimension_numbers = #tpu.dot_dimension_numbers<[1], [1], [0], [0], [0, 0, 1, 0], [], []>} : vector<16x8xbf16>, vector<16x8xbf16>, vector<16x16xf32> -> vector<16x16xf32>
    %cst_4 = arith.constant 0.353553385 : f32
    %12 = vector.broadcast %cst_4 : f32 to vector<16x16xf32>
    %13 = arith.mulf %11, %12 : vector<16x16xf32>
    %14 = vector.broadcast %7 : vector<1x16xf32> to vector<16x16xf32>
    %15 = arith.addf %13, %14 : vector<16x16xf32>
    %cst_5 = arith.constant dense<0xFF800000> : vector<16xf32>
    %16 = vector.multi_reduction <maximumf>, %15, %cst_5 [1] : vector<16x16xf32> to vector<16xf32>
    %17 = vector.shape_cast %16 : vector<16xf32> to vector<16x1xf32>
    %18 = vector.broadcast %17 : vector<16x1xf32> to vector<16x16xf32>
    %19 = arith.subf %15, %18 : vector<16x16xf32>
    %20 = math.exp %19 : vector<16x16xf32>
    %cst_6 = arith.constant dense<0.000000e+00> : vector<16xf32>
    %21 = vector.multi_reduction <add>, %20, %cst_6 [1] : vector<16x16xf32> to vector<16xf32>
    %22 = vector.shape_cast %21 : vector<16xf32> to vector<16x1xf32>
    %23 = tpu.reciprocal %22 {approx = true} : vector<16x1xf32> -> vector<16x1xf32>
    %24 = vector.broadcast %23 : vector<16x1xf32> to vector<16x16xf32>
    %25 = arith.mulf %20, %24 : vector<16x16xf32>
    %26 = arith.truncf %25 : vector<16x16xf32> to vector<16x16xbf16>
    %cst_7 = arith.constant dense<0.000000e+00> : vector<16x8xf32>
    %27 = tpu.matmul %26, %10, %cst_7 {dimension_numbers = #tpu.dot_dimension_numbers<[1], [0], [0], [1], [0, 0, 1, 1], [], []>} : vector<16x16xbf16>, vector<16x8xbf16>, vector<16x8xf32> -> vector<16x8xf32>
    %28 = vector.extract_strided_slice %1 {offsets = [0, 24], sizes = [16, 8], strides = [1, 1]} : vector<16x96xbf16> to vector<16x8xbf16>
    %29 = vector.extract_strided_slice %1 {offsets = [0, 32], sizes = [16, 8], strides = [1, 1]} : vector<16x96xbf16> to vector<16x8xbf16>
    %30 = vector.extract_strided_slice %1 {offsets = [0, 40], sizes = [16, 8], strides = [1, 1]} : vector<16x96xbf16> to vector<16x8xbf16>
    %cst_8 = arith.constant dense<0.000000e+00> : vector<16x16xf32>
    %31 = tpu.matmul %28, %29, %cst_8 {dimension_numbers = #tpu.dot_dimension_numbers<[1], [1], [0], [0], [0, 0, 1, 0], [], []>} : vector<16x8xbf16>, vector<16x8xbf16>, vector<16x16xf32> -> vector<16x16xf32>
    %cst_9 = arith.constant 0.353553385 : f32
    %32 = vector.broadcast %cst_9 : f32 to vector<16x16xf32>
    %33 = arith.mulf %31, %32 : vector<16x16xf32>
    %34 = vector.broadcast %7 : vector<1x16xf32> to vector<16x16xf32>
    %35 = arith.addf %33, %34 : vector<16x16xf32>
    %cst_10 = arith.constant dense<0xFF800000> : vector<16xf32>
    %36 = vector.multi_reduction <maximumf>, %35, %cst_10 [1] : vector<16x16xf32> to vector<16xf32>
    %37 = vector.shape_cast %36 : vector<16xf32> to vector<16x1xf32>
    %38 = vector.broadcast %37 : vector<16x1xf32> to vector<16x16xf32>
    %39 = arith.subf %35, %38 : vector<16x16xf32>
    %40 = math.exp %39 : vector<16x16xf32>
    %cst_11 = arith.constant dense<0.000000e+00> : vector<16xf32>
    %41 = vector.multi_reduction <add>, %40, %cst_11 [1] : vector<16x16xf32> to vector<16xf32>
    %42 = vector.shape_cast %41 : vector<16xf32> to vector<16x1xf32>
    %43 = tpu.reciprocal %42 {approx = true} : vector<16x1xf32> -> vector<16x1xf32>
    %44 = vector.broadcast %43 : vector<16x1xf32> to vector<16x16xf32>
    %45 = arith.mulf %40, %44 : vector<16x16xf32>
    %46 = arith.truncf %45 : vector<16x16xf32> to vector<16x16xbf16>
    %cst_12 = arith.constant dense<0.000000e+00> : vector<16x8xf32>
    %47 = tpu.matmul %46, %30, %cst_12 {dimension_numbers = #tpu.dot_dimension_numbers<[1], [0], [0], [1], [0, 0, 1, 1], [], []>} : vector<16x16xbf16>, vector<16x8xbf16>, vector<16x8xf32> -> vector<16x8xf32>
    %48 = vector.extract_strided_slice %1 {offsets = [0, 48], sizes = [16, 8], strides = [1, 1]} : vector<16x96xbf16> to vector<16x8xbf16>
    %49 = vector.extract_strided_slice %1 {offsets = [0, 56], sizes = [16, 8], strides = [1, 1]} : vector<16x96xbf16> to vector<16x8xbf16>
    %50 = vector.extract_strided_slice %1 {offsets = [0, 64], sizes = [16, 8], strides = [1, 1]} : vector<16x96xbf16> to vector<16x8xbf16>
    %cst_13 = arith.constant dense<0.000000e+00> : vector<16x16xf32>
    %51 = tpu.matmul %48, %49, %cst_13 {dimension_numbers = #tpu.dot_dimension_numbers<[1], [1], [0], [0], [0, 0, 1, 0], [], []>} : vector<16x8xbf16>, vector<16x8xbf16>, vector<16x16xf32> -> vector<16x16xf32>
    %cst_14 = arith.constant 0.353553385 : f32
    %52 = vector.broadcast %cst_14 : f32 to vector<16x16xf32>
    %53 = arith.mulf %51, %52 : vector<16x16xf32>
    %54 = vector.broadcast %7 : vector<1x16xf32> to vector<16x16xf32>
    %55 = arith.addf %53, %54 : vector<16x16xf32>
    %cst_15 = arith.constant dense<0xFF800000> : vector<16xf32>
    %56 = vector.multi_reduction <maximumf>, %55, %cst_15 [1] : vector<16x16xf32> to vector<16xf32>
    %57 = vector.shape_cast %56 : vector<16xf32> to vector<16x1xf32>
    %58 = vector.broadcast %57 : vector<16x1xf32> to vector<16x16xf32>
    %59 = arith.subf %55, %58 : vector<16x16xf32>
    %60 = math.exp %59 : vector<16x16xf32>
    %cst_16 = arith.constant dense<0.000000e+00> : vector<16xf32>
    %61 = vector.multi_reduction <add>, %60, %cst_16 [1] : vector<16x16xf32> to vector<16xf32>
    %62 = vector.shape_cast %61 : vector<16xf32> to vector<16x1xf32>
    %63 = tpu.reciprocal %62 {approx = true} : vector<16x1xf32> -> vector<16x1xf32>
    %64 = vector.broadcast %63 : vector<16x1xf32> to vector<16x16xf32>
    %65 = arith.mulf %60, %64 : vector<16x16xf32>
    %66 = arith.truncf %65 : vector<16x16xf32> to vector<16x16xbf16>
    %cst_17 = arith.constant dense<0.000000e+00> : vector<16x8xf32>
    %67 = tpu.matmul %66, %50, %cst_17 {dimension_numbers = #tpu.dot_dimension_numbers<[1], [0], [0], [1], [0, 0, 1, 1], [], []>} : vector<16x16xbf16>, vector<16x8xbf16>, vector<16x8xf32> -> vector<16x8xf32>
    %68 = vector.extract_strided_slice %1 {offsets = [0, 72], sizes = [16, 8], strides = [1, 1]} : vector<16x96xbf16> to vector<16x8xbf16>
    %69 = vector.extract_strided_slice %1 {offsets = [0, 80], sizes = [16, 8], strides = [1, 1]} : vector<16x96xbf16> to vector<16x8xbf16>
    %70 = vector.extract_strided_slice %1 {offsets = [0, 88], sizes = [16, 8], strides = [1, 1]} : vector<16x96xbf16> to vector<16x8xbf16>
    %cst_18 = arith.constant dense<0.000000e+00> : vector<16x16xf32>
    %71 = tpu.matmul %68, %69, %cst_18 {dimension_numbers = #tpu.dot_dimension_numbers<[1], [1], [0], [0], [0, 0, 1, 0], [], []>} : vector<16x8xbf16>, vector<16x8xbf16>, vector<16x16xf32> -> vector<16x16xf32>
    %cst_19 = arith.constant 0.353553385 : f32
    %72 = vector.broadcast %cst_19 : f32 to vector<16x16xf32>
    %73 = arith.mulf %71, %72 : vector<16x16xf32>
    %74 = vector.broadcast %7 : vector<1x16xf32> to vector<16x16xf32>
    %75 = arith.addf %73, %74 : vector<16x16xf32>
    %cst_20 = arith.constant dense<0xFF800000> : vector<16xf32>
    %76 = vector.multi_reduction <maximumf>, %75, %cst_20 [1] : vector<16x16xf32> to vector<16xf32>
    %77 = vector.shape_cast %76 : vector<16xf32> to vector<16x1xf32>
    %78 = vector.broadcast %77 : vector<16x1xf32> to vector<16x16xf32>
    %79 = arith.subf %75, %78 : vector<16x16xf32>
    %80 = math.exp %79 : vector<16x16xf32>
    %cst_21 = arith.constant dense<0.000000e+00> : vector<16xf32>
    %81 = vector.multi_reduction <add>, %80, %cst_21 [1] : vector<16x16xf32> to vector<16xf32>
    %82 = vector.shape_cast %81 : vector<16xf32> to vector<16x1xf32>
    %83 = tpu.reciprocal %82 {approx = true} : vector<16x1xf32> -> vector<16x1xf32>
    %84 = vector.broadcast %83 : vector<16x1xf32> to vector<16x16xf32>
    %85 = arith.mulf %80, %84 : vector<16x16xf32>
    %86 = arith.truncf %85 : vector<16x16xf32> to vector<16x16xbf16>
    %cst_22 = arith.constant dense<0.000000e+00> : vector<16x8xf32>
    %87 = tpu.matmul %86, %70, %cst_22 {dimension_numbers = #tpu.dot_dimension_numbers<[1], [0], [0], [1], [0, 0, 1, 1], [], []>} : vector<16x16xbf16>, vector<16x8xbf16>, vector<16x8xf32> -> vector<16x8xf32>
    %88 = tpu.concatenate %27, %47, %67, %87 in 1 : vector<16x8xf32>, vector<16x8xf32>, vector<16x8xf32>, vector<16x8xf32> -> vector<16x32xf32>
    %89 = arith.truncf %88 : vector<16x32xf32> to vector<16x32xbf16>
    %c0_23 = arith.constant 0 : index
    %c0_24 = arith.constant 0 : index
    %c0_25 = arith.constant 0 : index
    %90 = vector.load %arg3[%c0_23, %c0_24, %c0_25] : memref<1x16x32xbf16, #tpu.memory_space<vmem>>, vector<1x16x32xbf16>
    %91 = vector.shape_cast %90 : vector<1x16x32xbf16> to vector<16x32xbf16>
    %92 = vector.shape_cast %89 : vector<16x32xbf16> to vector<1x16x32xbf16>
    tpu.vector_store %arg3[%c0_23, %c0_24, %c0_25], %92 {strides = array<i32>} : memref<1x16x32xbf16, #tpu.memory_space<vmem>>, vector<1x16x32xbf16>,
    return
  }
  func.func @transform_0(%arg0: i32, %arg1: i32) -> (i32, i32, i32) {
    %c0_i32 = arith.constant 0 : i32
    %c0_i32_0 = arith.constant 0 : i32
    return %arg0, %c0_i32, %arg1 : i32, i32, i32
  }
  func.func @transform_1(%arg0: i32, %arg1: i32) -> (i32, i32, i32) {
    %c0_i32 = arith.constant 0 : i32
    %c0_i32_0 = arith.constant 0 : i32
    return %arg0, %c0_i32, %arg1 : i32, i32, i32
  }
}

module attributes {stable_mosaic.version = 11 : i64} {
  func.func @_matmul_res_kernel(%arg0: i32, %arg1: memref<16x32xbf16, #tpu.memory_space<vmem>>, %arg2: memref<32x32xbf16, #tpu.memory_space<vmem>>, %arg3: memref<1x32xf32, #tpu.memory_space<vmem>>, %arg4: memref<16x32xbf16, #tpu.memory_space<vmem>>, %arg5: memref<16x32xbf16, #tpu.memory_space<vmem>>) attributes {dimension_semantics = [#tpu.dimension_semantics<parallel>], iteration_bounds = array<i64: 2>, scalar_prefetch = 0 : i64, scratch_operands = 0 : i64, tpu.core_type = #tpu.core_type<tc>, window_params = [{transform_indices = @transform_0, window_bounds = array<i64: 16, 32>}, {pipeline_mode = #tpu.pipeline_mode<synchronous>, transform_indices = @transform_1, window_bounds = array<i64: 32, 32>}, {pipeline_mode = #tpu.pipeline_mode<synchronous>, transform_indices = @transform_2, window_bounds = array<i64: 1, 32>}, {transform_indices = @transform_3, window_bounds = array<i64: 16, 32>}, {transform_indices = @transform_4, window_bounds = array<i64: 16, 32>}]} {
    %c0 = arith.constant 0 : index
    %c0_0 = arith.constant 0 : index
    %0 = vector.load %arg1[%c0, %c0_0] : memref<16x32xbf16, #tpu.memory_space<vmem>>, vector<16x32xbf16>
    %c0_1 = arith.constant 0 : index
    %c0_2 = arith.constant 0 : index
    %1 = vector.load %arg2[%c0_1, %c0_2] : memref<32x32xbf16, #tpu.memory_space<vmem>>, vector<32x32xbf16>
    %cst = arith.constant dense<0.000000e+00> : vector<16x32xf32>
    %2 = tpu.matmul %0, %1, %cst {dimension_numbers = #tpu.dot_dimension_numbers<[1], [0], [0], [1], [0, 0, 1, 1], [], []>} : vector<16x32xbf16>, vector<32x32xbf16>, vector<16x32xf32> -> vector<16x32xf32>
    %c0_3 = arith.constant 0 : index
    %c0_4 = arith.constant 0 : index
    %3 = vector.load %arg3[%c0_3, %c0_4] : memref<1x32xf32, #tpu.memory_space<vmem>>, vector<1x32xf32>
    %4 = vector.broadcast %3 : vector<1x32xf32> to vector<16x32xf32>
    %5 = arith.addf %2, %4 : vector<16x32xf32>
    %c0_5 = arith.constant 0 : index
    %c0_6 = arith.constant 0 : index
    %6 = vector.load %arg4[%c0_5, %c0_6] : memref<16x32xbf16, #tpu.memory_space<vmem>>, vector<16x32xbf16>
    %7 = arith.extf %6 : vector<16x32xbf16> to vector<16x32xf32>
    %8 = arith.addf %5, %7 : vector<16x32xf32>
    %9 = arith.truncf %8 : vector<16x32xf32> to vector<16x32xbf16>
    %c0_7 = arith.constant 0 : index
    %c0_8 = arith.constant 0 : index
    %10 = vector.load %arg5[%c0_7, %c0_8] : memref<16x32xbf16, #tpu.memory_space<vmem>>, vector<16x32xbf16>
    tpu.vector_store %arg5[%c0_7, %c0_8], %9 {strides = array<i32>} : memref<16x32xbf16, #tpu.memory_space<vmem>>, vector<16x32xbf16>,
    return
  }
  func.func @transform_0(%arg0: i32) -> (i32, i32) {
    %c0_i32 = arith.constant 0 : i32
    %c0_i32_0 = arith.constant 0 : i32
    return %arg0, %c0_i32 : i32, i32
  }
  func.func @transform_1(%arg0: i32) -> (i32, i32) {
    %c0_i32 = arith.constant 0 : i32
    %c0_i32_0 = arith.constant 0 : i32
    %c0_i32_1 = arith.constant 0 : i32
    return %c0_i32, %c0_i32_0 : i32, i32
  }
  func.func @transform_2(%arg0: i32) -> (i32, i32) {
    %c0_i32 = arith.constant 0 : i32
    %c0_i32_0 = arith.constant 0 : i32
    %c0_i32_1 = arith.constant 0 : i32
    return %c0_i32, %c0_i32_0 : i32, i32
  }
  func.func @transform_3(%arg0: i32) -> (i32, i32) {
    %c0_i32 = arith.constant 0 : i32
    %c0_i32_0 = arith.constant 0 : i32
    return %arg0, %c0_i32 : i32, i32
  }
  func.func @transform_4(%arg0: i32) -> (i32, i32) {
    %c0_i32 = arith.constant 0 : i32
    %c0_i32_0 = arith.constant 0 : i32
    return %arg0, %c0_i32 : i32, i32
  }
}

module attributes {stable_mosaic.version = 11 : i64} {
  func.func @_ln_matmul_kernel(%arg0: i32, %arg1: memref<16x32xbf16, #tpu.memory_space<vmem>>, %arg2: memref<1x32xf32, #tpu.memory_space<vmem>>, %arg3: memref<1x32xf32, #tpu.memory_space<vmem>>, %arg4: memref<32x64xbf16, #tpu.memory_space<vmem>>, %arg5: memref<1x64xf32, #tpu.memory_space<vmem>>, %arg6: memref<16x64xbf16, #tpu.memory_space<vmem>>) attributes {dimension_semantics = [#tpu.dimension_semantics<parallel>], iteration_bounds = array<i64: 2>, scalar_prefetch = 0 : i64, scratch_operands = 0 : i64, tpu.core_type = #tpu.core_type<tc>, window_params = [{transform_indices = @transform_0, window_bounds = array<i64: 16, 32>}, {pipeline_mode = #tpu.pipeline_mode<synchronous>, transform_indices = @transform_1, window_bounds = array<i64: 1, 32>}, {pipeline_mode = #tpu.pipeline_mode<synchronous>, transform_indices = @transform_2, window_bounds = array<i64: 1, 32>}, {pipeline_mode = #tpu.pipeline_mode<synchronous>, transform_indices = @transform_3, window_bounds = array<i64: 32, 64>}, {pipeline_mode = #tpu.pipeline_mode<synchronous>, transform_indices = @transform_4, window_bounds = array<i64: 1, 64>}, {transform_indices = @transform_5, window_bounds = array<i64: 16, 64>}]} {
    %c0 = arith.constant 0 : index
    %c0_0 = arith.constant 0 : index
    %0 = vector.load %arg1[%c0, %c0_0] : memref<16x32xbf16, #tpu.memory_space<vmem>>, vector<16x32xbf16>
    %1 = arith.extf %0 : vector<16x32xbf16> to vector<16x32xf32>
    %cst = arith.constant dense<0.000000e+00> : vector<16xf32>
    %2 = vector.multi_reduction <add>, %1, %cst [1] : vector<16x32xf32> to vector<16xf32>
    %3 = vector.shape_cast %2 : vector<16xf32> to vector<16x1xf32>
    %cst_1 = arith.constant 3.200000e+01 : f32
    %4 = vector.broadcast %cst_1 : f32 to vector<16x1xf32>
    %5 = arith.divf %3, %4 : vector<16x1xf32>
    %6 = vector.broadcast %5 : vector<16x1xf32> to vector<16x32xf32>
    %7 = arith.subf %1, %6 : vector<16x32xf32>
    %8 = arith.mulf %7, %7 : vector<16x32xf32>
    %cst_2 = arith.constant dense<0.000000e+00> : vector<16xf32>
    %9 = vector.multi_reduction <add>, %8, %cst_2 [1] : vector<16x32xf32> to vector<16xf32>
    %10 = vector.shape_cast %9 : vector<16xf32> to vector<16x1xf32>
    %cst_3 = arith.constant 3.200000e+01 : f32
    %11 = vector.broadcast %cst_3 : f32 to vector<16x1xf32>
    %12 = arith.divf %10, %11 : vector<16x1xf32>
    %13 = vector.broadcast %5 : vector<16x1xf32> to vector<16x32xf32>
    %14 = arith.subf %1, %13 : vector<16x32xf32>
    %cst_4 = arith.constant 9.99999996E-13 : f32
    %15 = vector.broadcast %cst_4 : f32 to vector<16x1xf32>
    %16 = arith.addf %12, %15 : vector<16x1xf32>
    %17 = math.rsqrt %16 : vector<16x1xf32>
    %18 = vector.broadcast %17 : vector<16x1xf32> to vector<16x32xf32>
    %19 = arith.mulf %14, %18 : vector<16x32xf32>
    %c0_5 = arith.constant 0 : index
    %c0_6 = arith.constant 0 : index
    %20 = vector.load %arg2[%c0_5, %c0_6] : memref<1x32xf32, #tpu.memory_space<vmem>>, vector<1x32xf32>
    %21 = vector.broadcast %20 : vector<1x32xf32> to vector<16x32xf32>
    %22 = arith.mulf %19, %21 : vector<16x32xf32>
    %c0_7 = arith.constant 0 : index
    %c0_8 = arith.constant 0 : index
    %23 = vector.load %arg3[%c0_7, %c0_8] : memref<1x32xf32, #tpu.memory_space<vmem>>, vector<1x32xf32>
    %24 = vector.broadcast %23 : vector<1x32xf32> to vector<16x32xf32>
    %25 = arith.addf %22, %24 : vector<16x32xf32>
    %26 = arith.truncf %25 : vector<16x32xf32> to vector<16x32xbf16>
    %c0_9 = arith.constant 0 : index
    %c0_10 = arith.constant 0 : index
    %27 = vector.load %arg4[%c0_9, %c0_10] : memref<32x64xbf16, #tpu.memory_space<vmem>>, vector<32x64xbf16>
    %cst_11 = arith.constant dense<0.000000e+00> : vector<16x64xf32>
    %28 = tpu.matmul %26, %27, %cst_11 {dimension_numbers = #tpu.dot_dimension_numbers<[1], [0], [0], [1], [0, 0, 1, 1], [], []>} : vector<16x32xbf16>, vector<32x64xbf16>, vector<16x64xf32> -> vector<16x64xf32>
    %c0_12 = arith.constant 0 : index
    %c0_13 = arith.constant 0 : index
    %29 = vector.load %arg5[%c0_12, %c0_13] : memref<1x64xf32, #tpu.memory_space<vmem>>, vector<1x64xf32>
    %30 = vector.broadcast %29 : vector<1x64xf32> to vector<16x64xf32>
    %31 = arith.addf %28, %30 : vector<16x64xf32>
    %32 = arith.mulf %31, %31 : vector<16x64xf32>
    %33 = arith.mulf %31, %32 : vector<16x64xf32>
    %cst_14 = arith.constant 4.471500e-02 : f32
    %34 = vector.broadcast %cst_14 : f32 to vector<16x64xf32>
    %35 = arith.mulf %34, %33 : vector<16x64xf32>
    %36 = arith.addf %31, %35 : vector<16x64xf32>
    %cst_15 = arith.constant 0.797884583 : f32
    %37 = vector.broadcast %cst_15 : f32 to vector<16x64xf32>
    %38 = arith.mulf %37, %36 : vector<16x64xf32>
    %39 = math.tanh %38 : vector<16x64xf32>
    %cst_16 = arith.constant 1.000000e+00 : f32
    %40 = vector.broadcast %cst_16 : f32 to vector<16x64xf32>
    %41 = arith.addf %40, %39 : vector<16x64xf32>
    %cst_17 = arith.constant 5.000000e-01 : f32
    %42 = vector.broadcast %cst_17 : f32 to vector<16x64xf32>
    %43 = arith.mulf %42, %41 : vector<16x64xf32>
    %44 = arith.mulf %31, %43 : vector<16x64xf32>
    %45 = arith.truncf %44 : vector<16x64xf32> to vector<16x64xbf16>
    %c0_18 = arith.constant 0 : index
    %c0_19 = arith.constant 0 : index
    %46 = vector.load %arg6[%c0_18, %c0_19] : memref<16x64xbf16, #tpu.memory_space<vmem>>, vector<16x64xbf16>
    tpu.vector_store %arg6[%c0_18, %c0_19], %45 {strides = array<i32>} : memref<16x64xbf16, #tpu.memory_space<vmem>>, vector<16x64xbf16>,
    return
  }
  func.func @transform_0(%arg0: i32) -> (i32, i32) {
    %c0_i32 = arith.constant 0 : i32
    %c0_i32_0 = arith.constant 0 : i32
    return %arg0, %c0_i32 : i32, i32
  }
  func.func @transform_1(%arg0: i32) -> (i32, i32) {
    %c0_i32 = arith.constant 0 : i32
    %c0_i32_0 = arith.constant 0 : i32
    %c0_i32_1 = arith.constant 0 : i32
    return %c0_i32, %c0_i32_0 : i32, i32
  }
  func.func @transform_2(%arg0: i32) -> (i32, i32) {
    %c0_i32 = arith.constant 0 : i32
    %c0_i32_0 = arith.constant 0 : i32
    %c0_i32_1 = arith.constant 0 : i32
    return %c0_i32, %c0_i32_0 : i32, i32
  }
  func.func @transform_3(%arg0: i32) -> (i32, i32) {
    %c0_i32 = arith.constant 0 : i32
    %c0_i32_0 = arith.constant 0 : i32
    %c0_i32_1 = arith.constant 0 : i32
    return %c0_i32, %c0_i32_0 : i32, i32
  }
  func.func @transform_4(%arg0: i32) -> (i32, i32) {
    %c0_i32 = arith.constant 0 : i32
    %c0_i32_0 = arith.constant 0 : i32
    %c0_i32_1 = arith.constant 0 : i32
    return %c0_i32, %c0_i32_0 : i32, i32
  }
  func.func @transform_5(%arg0: i32) -> (i32, i32) {
    %c0_i32 = arith.constant 0 : i32
    %c0_i32_0 = arith.constant 0 : i32
    return %arg0, %c0_i32 : i32, i32
  }
}

module attributes {stable_mosaic.version = 11 : i64} {
  func.func @_matmul_res_kernel(%arg0: i32, %arg1: memref<16x64xbf16, #tpu.memory_space<vmem>>, %arg2: memref<64x32xbf16, #tpu.memory_space<vmem>>, %arg3: memref<1x32xf32, #tpu.memory_space<vmem>>, %arg4: memref<16x32xbf16, #tpu.memory_space<vmem>>, %arg5: memref<16x32xbf16, #tpu.memory_space<vmem>>) attributes {dimension_semantics = [#tpu.dimension_semantics<parallel>], iteration_bounds = array<i64: 2>, scalar_prefetch = 0 : i64, scratch_operands = 0 : i64, tpu.core_type = #tpu.core_type<tc>, window_params = [{transform_indices = @transform_0, window_bounds = array<i64: 16, 64>}, {pipeline_mode = #tpu.pipeline_mode<synchronous>, transform_indices = @transform_1, window_bounds = array<i64: 64, 32>}, {pipeline_mode = #tpu.pipeline_mode<synchronous>, transform_indices = @transform_2, window_bounds = array<i64: 1, 32>}, {transform_indices = @transform_3, window_bounds = array<i64: 16, 32>}, {transform_indices = @transform_4, window_bounds = array<i64: 16, 32>}]} {
    %c0 = arith.constant 0 : index
    %c0_0 = arith.constant 0 : index
    %0 = vector.load %arg1[%c0, %c0_0] : memref<16x64xbf16, #tpu.memory_space<vmem>>, vector<16x64xbf16>
    %c0_1 = arith.constant 0 : index
    %c0_2 = arith.constant 0 : index
    %1 = vector.load %arg2[%c0_1, %c0_2] : memref<64x32xbf16, #tpu.memory_space<vmem>>, vector<64x32xbf16>
    %cst = arith.constant dense<0.000000e+00> : vector<16x32xf32>
    %2 = tpu.matmul %0, %1, %cst {dimension_numbers = #tpu.dot_dimension_numbers<[1], [0], [0], [1], [0, 0, 1, 1], [], []>} : vector<16x64xbf16>, vector<64x32xbf16>, vector<16x32xf32> -> vector<16x32xf32>
    %c0_3 = arith.constant 0 : index
    %c0_4 = arith.constant 0 : index
    %3 = vector.load %arg3[%c0_3, %c0_4] : memref<1x32xf32, #tpu.memory_space<vmem>>, vector<1x32xf32>
    %4 = vector.broadcast %3 : vector<1x32xf32> to vector<16x32xf32>
    %5 = arith.addf %2, %4 : vector<16x32xf32>
    %c0_5 = arith.constant 0 : index
    %c0_6 = arith.constant 0 : index
    %6 = vector.load %arg4[%c0_5, %c0_6] : memref<16x32xbf16, #tpu.memory_space<vmem>>, vector<16x32xbf16>
    %7 = arith.extf %6 : vector<16x32xbf16> to vector<16x32xf32>
    %8 = arith.addf %5, %7 : vector<16x32xf32>
    %9 = arith.truncf %8 : vector<16x32xf32> to vector<16x32xbf16>
    %c0_7 = arith.constant 0 : index
    %c0_8 = arith.constant 0 : index
    %10 = vector.load %arg5[%c0_7, %c0_8] : memref<16x32xbf16, #tpu.memory_space<vmem>>, vector<16x32xbf16>
    tpu.vector_store %arg5[%c0_7, %c0_8], %9 {strides = array<i32>} : memref<16x32xbf16, #tpu.memory_space<vmem>>, vector<16x32xbf16>,
    return
  }
  func.func @transform_0(%arg0: i32) -> (i32, i32) {
    %c0_i32 = arith.constant 0 : i32
    %c0_i32_0 = arith.constant 0 : i32
    return %arg0, %c0_i32 : i32, i32
  }
  func.func @transform_1(%arg0: i32) -> (i32, i32) {
    %c0_i32 = arith.constant 0 : i32
    %c0_i32_0 = arith.constant 0 : i32
    %c0_i32_1 = arith.constant 0 : i32
    return %c0_i32, %c0_i32_0 : i32, i32
  }
  func.func @transform_2(%arg0: i32) -> (i32, i32) {
    %c0_i32 = arith.constant 0 : i32
    %c0_i32_0 = arith.constant 0 : i32
    %c0_i32_1 = arith.constant 0 : i32
    return %c0_i32, %c0_i32_0 : i32, i32
  }
  func.func @transform_3(%arg0: i32) -> (i32, i32) {
    %c0_i32 = arith.constant 0 : i32
    %c0_i32_0 = arith.constant 0 : i32
    return %arg0, %c0_i32 : i32, i32
  }
  func.func @transform_4(%arg0: i32) -> (i32, i32) {
    %c0_i32 = arith.constant 0 : i32
    %c0_i32_0 = arith.constant 0 : i32
    return %arg0, %c0_i32 : i32, i32
  }
}

</mosaic_0001>

<bundles_post_ra>
// kernel: vit_pose_forward.11
= control target key start
LH: loop header
LB: loop body
LE: loop exit
PB: predicated region body
PF: predicated region fallthrough
CT: control target
= control target key end

     0   :  { %8 = vsyncpa [#allocation3], 0  ;;  %s488_s0 = inlined_call_operand.hbm [shape: bf16[8,256], index: 0, kind: input, shape index: {}]   ;;  %s489_s1 = inlined_call_operand.hbm [shape: bf16[256,32], index: 1, kind: input, shape index: {}]   ;;  %s490_s2 = inlined_call_operand.hbm [shape: f32[1,32], index: 2, kind: input, shape index: {}]   ;;  %s491_s3 = inlined_call_operand.hbm [shape: bf16[8,32], index: 3, kind: output, shape index: {}]  }
   0x1   :  { %9 = vsyncpa [#allocation6], 0 }
   0x2   :  { %10 = vsyncpa [#allocation4], 0  ;;  %s414_s12 = smov [#allocation5]   ;;  %s320_s16 = scalar_lea.hbm %s489_s1, 2048 }
   0x3   :  { %s26_s13 = sshll.u32 %s414_s12, 4  ;;  %p321_p0 = scmp.ne.s32.totalorder %s489_s1, %s320_s16  ;;  %s27_s13 = int_to_ptr.vmem [resolvable:$true] %s26_s13 }
   0x4   :  { %p324_p1 = scmp.lt.u32.totalorder %s320_s16, %s489_s1 }
   0x6   :  { %p326_p2 = pnand %p324_p1, %p321_p0 }
   0x8   :  { %329 = shalt.err (!%p326_p2)
}
   0x9   :  { %s330_s21 = scalar_lea.vmem %s27_s13, 2048  ;;  %p335_p4 = scmp.lt.s32.totalorder %s27_s13, %s27_s13 }
   0xa   :  { %p331_p3 = scmp.ne.s32.totalorder %s27_s13, %s330_s21  ;;  %p336_p5 = scmp.lt.s32.totalorder %s330_s21, %s330_s21 }
   0xc   :  { %p337_p6 = por %p336_p5, %p335_p4 }
   0xe   :  { %p338_p7 = pnand %p337_p6, %p331_p3 }
  0x10   :  { %341 = shalt.err (!%p338_p7)
}
  0x11   :  { %s415_s22 = smov 64   ;;  %s416_s23 = smov 4  }
  0x12   :  { %32 = dma.hbm_to_vmem [thread:$0]  %s489_s1, 2048, %s27_s13, [#allocation6], %s415_s22, %s415_s22, %s416_s23  }
  0x13   :  { %s417_s26 = smov [#allocation2]   ;;  %s418_s28 = smov [#allocation7]  }
  0x14   :  { %s17_s27 = sshll.u32 %s417_s26, 4  ;;  %s39_s29 = sshll.u32 %s418_s28, 4  ;;  %s18_s27 = int_to_ptr.vmem [resolvable:$true] %s17_s27  ;;  %s40_s29 = int_to_ptr.vmem [resolvable:$true] %s39_s29 }
  0x15   :  { %s342_s5 = scalar_lea.hbm %s488_s0, 128 }
  0x16   :  { %p343_p8 = scmp.ne.s32.totalorder %s488_s0, %s342_s5  ;;  %p346_p9 = scmp.lt.u32.totalorder %s342_s5, %s488_s0 }
  0x18   :  { %p348_p10 = pnand %p346_p9, %p343_p8 }
  0x1a   :  { %351 = shalt.err (!%p348_p10)
}
  0x1b   :  { %s352_s1 = scalar_lea.vmem %s18_s27, 128  ;;  %p357_p12 = scmp.lt.s32.totalorder %s18_s27, %s18_s27 }
  0x1c   :  { %p353_p11 = scmp.ne.s32.totalorder %s18_s27, %s352_s1  ;;  %p358_p13 = scmp.lt.s32.totalorder %s352_s1, %s352_s1 }
  0x1e   :  { %p359_p0 = por %p358_p13, %p357_p12 }
  0x20   :  { %p360_p1 = pnand %p359_p0, %p353_p11 }
  0x22   :  { %363 = shalt.err (!%p360_p1)
}
  0x23   :  { %20 = dma.hbm_to_vmem [thread:$0]  %s488_s0, 128, %s18_s27, [#allocation3]  }
  0x24   :  { %s364_s14 = scalar_lea.hbm %s490_s2, 16 }
  0x25   :  { %p365_p2 = scmp.ne.s32.totalorder %s490_s2, %s364_s14  ;;  %p368_p3 = scmp.lt.u32.totalorder %s364_s14, %s490_s2 }
  0x27   :  { %p370_p4 = pnand %p368_p3, %p365_p2 }
  0x29   :  { %373 = shalt.err (!%p370_p4)
}
  0x2a   :  { %s374_s19 = scalar_lea.vmem %s40_s29, 16  ;;  %s378_s20 = scalar_lea.vmem %s40_s29, 32 }
  0x2b   :  { %p375_p5 = scmp.ne.s32.totalorder %s40_s29, %s374_s19  ;;  %p379_p6 = scmp.lt.s32.totalorder %s40_s29, %s40_s29 }
  0x2c   :  { %p380_p7 = scmp.lt.s32.totalorder %s378_s20, %s374_s19 }
  0x2e   :  { %p381_p8 = por %p380_p7, %p379_p6 }
  0x30   :  { %p382_p9 = pnand %p381_p8, %p375_p5 }
  0x32   :  { %385 = shalt.err (!%p382_p9)
}
  0x33   :  { %42 = dma.hbm_to_vmem [thread:$0]  %s490_s2, 16, %s40_s29, [#allocation6]  }
  0x34   :  { %408 = dma.done.wait [#allocation3], 128  }
  0x35   :  { %409 = vsyncadd [#allocation3], 4294967168 }
  0x36   :  { %410 = dma.done.wait [#allocation6], 2064  }
  0x37   :  { %411 = vsyncadd [#allocation6], 4294965232  ;;  %v302_v0 = vld [vmem:[#allocation5 + $0x40] sm:$0xff]   ;;  %v304_v2 = vld [vmem:[#allocation5 + $0x48] sm:$0xff]   ;;  %s419_s2 = smov [#allocation8]   ;;  %vm237_vm0 = vcmask 257024  }
  0x38   :  { %v303_v1 = vld [vmem:[#allocation5] sm:$0xff]   ;;  %274 = vmatprep.subr.bf16.mxu0 %v302_v0  ;;  %v305_v3 = vld [vmem:[#allocation5 + $0x8] sm:$0xff]   ;;  %v306_v4 = vld [vmem:[#allocation5 + $0x50] sm:$0xff]   ;;  %s245_s22 = sshll.u32 %s419_s2, 4  ;;  %s246_s22 = int_to_ptr.vmem [resolvable:$true] %s245_s22 }
  0x39   :  { %275 = vmatpush3.bf16.msra.mxu0 %v303_v1  ;;  %v307_v5 = vld [vmem:[#allocation5 + $0x10] sm:$0xff]   ;;  %v308_v6 = vld [vmem:[#allocation5 + $0x58] sm:$0xff]   ;;  %v310_v8 = vld [vmem:[#allocation5 + $0x60] sm:$0xff]   ;;  %s386_s23 = scalar_lea.vmem %s246_s22, 64  ;;  %p391_p11 = scmp.lt.s32.totalorder %s246_s22, %s246_s22 }
  0x3a   :  { %276 = vmatprep.subr.bf16.mxu0 %v304_v2  ;;  %v309_v7 = vld [vmem:[#allocation5 + $0x18] sm:$0xff]   ;;  %v311_v9 = vld [vmem:[#allocation5 + $0x20] sm:$0xff]   ;;  %v312_v10 = vld [vmem:[#allocation5 + $0x68] sm:$0xff]   ;;  %p387_p10 = scmp.ne.s32.totalorder %s246_s22, %s386_s23  ;;  %p392_p12 = scmp.lt.s32.totalorder %s386_s23, %s386_s23 }
  0x3b   :  { %v53_v11 = vld [vmem:[#allocation2] sm:$0xff]  ;;  %v313_v13 = vld [vmem:[#allocation5 + $0x28] sm:$0xff]   ;;  %v314_v14 = vld [vmem:[#allocation5 + $0x70] sm:$0xff]  }
  0x3c   :  { %v257_v12 = vcombine.high %v53_v11, %v53_v11  ;;  %v315_v15 = vld [vmem:[#allocation5 + $0x30] sm:$0xff]   ;;  %v316_v16 = vld [vmem:[#allocation5 + $0x78] sm:$0xff]   ;;  %v256_v18 = vcombine.low %v53_v11, %v53_v11  ;;  %v255_v20 = vld [vmem:[#allocation7] ss:$0 sm:$0xff]  ;;  %p393_p13 = por %p392_p12, %p391_p11 }
  0x3d   :  { %277 = vmatpush3.bf16.msra.mxu0 %v305_v3  ;;  %v317_v17 = vld [vmem:[#allocation5 + $0x38] sm:$0xff]  }
  0x3e   :  { %278 = vmatprep.subr.bf16.mxu0 %v306_v4  ;;  %228 = vmatprep.mubr.bf16.mxu0 %v257_v12  ;;  %p394_p0 = pnand %p393_p13, %p387_p10 }
  0x41   :  { %279 = vmatpush3.bf16.msra.mxu0 %v307_v5 }
  0x42   :  { %280 = vmatprep.subr.bf16.mxu0 %v308_v6 }
  0x45   :  { %281 = vmatpush3.bf16.msra.mxu0 %v309_v7 }
  0x46   :  { %282 = vmatprep.subr.bf16.mxu0 %v310_v8 }
  0x49   :  { %283 = vmatpush3.bf16.msra.mxu0 %v311_v9 }
  0x4a   :  { %284 = vmatprep.subr.bf16.mxu0 %v312_v10 }
  0x4d   :  { %285 = vmatpush3.bf16.msra.mxu0 %v313_v13 }
  0x4e   :  { %286 = vmatprep.subr.bf16.mxu0 %v314_v14 }
  0x51   :  { %287 = vmatpush3.bf16.msra.mxu0 %v315_v15 }
  0x52   :  { %288 = vmatprep.subr.bf16.mxu0 %v316_v16 }
  0x55   :  { %289 = vmatpush3.bf16.msra.mxu0 %v317_v17 }
  0x58   :  { %229 = vmatmul.mubr.bf16.vlgmr.msra.gmra.mrb[0].mxu0 %v256_v18 }
 0x12b   :  { %v290_v19 = vpop.f32.mrb[0].mxu0 }
 0x12c   :  { %v291_v21 = vpop.f32.mrb[1].mxu0 }
 0x12d   :  { %v292_v22 = vadd.f32 %v291_v21, %v290_v19  ;;  %v293_v23 = vpop.f32.mrb[2].mxu0 }
 0x12e   :  { %v294_v24 = vpop.f32.mrb[3].mxu0 }
 0x12f   :  { %v231_v25 = vadd.f32 %v292_v22, %v255_v20 }
 0x131   :  { %v236_v26 = vpack.c.bf16 %v231_v25, %v231_v25 }
 0x133   :  { %238 = vst.msk [vmem:[#allocation8] sm:$0xf] %vm237_vm0, %v236_v26 }
 0x134   :  { %397 = shalt.err (!%p394_p0)
}
 0x135   :  { %s398_s26 = scalar_lea.hbm %s491_s3, 64 }
 0x136   :  { %p399_p1 = scmp.ne.s32.totalorder %s491_s3, %s398_s26  ;;  %p402_p2 = scmp.lt.u32.totalorder %s398_s26, %s491_s3 }
 0x138   :  { %p404_p3 = pnand %p402_p2, %p399_p1 }
 0x13a   :  { %407 = shalt.err (!%p404_p3)
}
 0x13b   :  { %248 = dma.vmem_to_hbm [thread:$0]  %s246_s22, 64, %s491_s3, [#allocation4]  }
 0x13c   :  { %412 = dma.done.wait [#allocation4], 64  }
 0x13d   :  { %413 = vsyncadd [#allocation4], 4294967232 }
 0x13e   :  { %252 = vsyncpa [#allocation3], 1 }
 0x13f   :  { %253 = vsyncpa [#allocation6], 1 }
 0x140   :  { %254 = vsyncpa [#allocation4], 1 }

// kernel: vit_pose_forward.12
= control target key start
LH: loop header
LB: loop body
LE: loop exit
PB: predicated region body
PF: predicated region fallthrough
CT: control target
= control target key end

     0   :  { %10 = vsyncpa [#allocation3], 0  ;;  %s1245_s0 = inlined_call_operand.hbm [shape: bf16[32,32], index: 0, kind: input, shape index: {}]   ;;  %s1246_s1 = inlined_call_operand.hbm [shape: f32[1,32], index: 1, kind: input, shape index: {}]   ;;  %s1247_s2 = inlined_call_operand.hbm [shape: f32[1,32], index: 2, kind: input, shape index: {}]   ;;  %s1248_s3 = inlined_call_operand.hbm [shape: bf16[32,96], index: 3, kind: input, shape index: {}]   ;;  %s1249_s4 = inlined_call_operand.hbm [shape: f32[1,96], index: 4, kind: input, shape index: {}]   ;;  %s1250_s5 = inlined_call_operand.hbm [shape: bf16[32,96], index: 5, kind: output, shape index: {}]  }
   0x1   :  { %12 = vsyncpa [#allocation3 + $0x1], 0 }
   0x2   :  { %13 = vsyncpa [#allocation6], 0 }
   0x3   :  { %14 = vsyncpa [#allocation9], 0 }
   0x4   :  { %15 = vsyncpa [#allocation4], 0 }
   0x5   :  { %17 = vsyncpa [#allocation4 + $0x1], 0  ;;  %s960_s18 = smov 0   ;;  %s962_s19 = smov 0  }
   0x6   :  { %s964_s20 = smov 0   ;;  %s966_s21 = smov 0  }
   0x7 LB: > { %s981_s22 = sadd.s32 4294967295, %s916_s21   ;;  %s552_s23 = sadd.s32 4294967294, %s916_s21   ;;  %s916_s21 = sphi %s966_s21, %s1273_s21   ;;  %s912_s20 = sphi %s964_s20, %s1272_s20   ;;  %s908_s19 = sphi %s962_s19, %s1271_s19   ;;  %s904_s18 = sphi %s960_s18, %s1270_s18  }
   0x8   : > { %p43_p0 = scmp.ne.s32.totalorder %s908_s19, %s904_s18  ;;  %p1251_p1 = scmp.eq.s32.totalorder %s981_s22, 0 }
   0x9   : > { %p157_p3 = scmp.eq.s32.totalorder %s552_s23, 1  ;;  %p553_p5 = scmp.ge.s32.totalorder %s916_s21, 1 }
   0xa   : > { %p990_p4 = por %p1251_p1, %p43_p0  ;;  %p164_p7 = scmp.lt.s32.totalorder %s916_s21, 3 }
   0xb   : > { %p995_p6 = por %p157_p3, %p43_p0  ;;  %s918_s27 = smov [#allocation5]  }
   0xc   : > { %s1254_s24 = scalar_select %p990_p4, 1, 0 }
   0xd   : > { %s1255_s25 = scalar_select %p995_p6, 1, 0 }
   0xe   : > { %p1000_p8 = pnand %p553_p5, %p164_p7  ;;  %s177_s28 = sshll.u32 %s918_s27, 4  ;;  %s178_s28 = int_to_ptr.vmem [resolvable:$true] %s177_s28 }
   0xf   : > { %s919_s29 = smov [#allocation8]   ;;  %s920_s7 = smov [#allocation7]  }
  0x10   : > { %s1256_s26 = scalar_select %p1000_p8, 1, 0 }
  0x11   : > { %p621_p10 = pneg %p1000_p8  ;;  %s198_s30 = sshll.u32 %s919_s29, 4  ;;  %s1013_s30 = int_to_ptr.vmem [resolvable:$true] %s198_s30 }
  0x12   : > { %s1015_s8 = sshll.u32 %s920_s7, 4  ;;  %s700_s11 = scalar_lea.hbm %s1246_s1, 16  ;;  %s189_s8 = int_to_ptr.vmem [resolvable:$true] %s1015_s8 }
  0x13   : > { %p1009_p11 = pnand %p621_p10, %p1251_p1  ;;  %p701_p12 = scmp.ne.s32.totalorder %s1246_s1, %s700_s11 }
  0x14   : > { %p707_p5 = scmp.lt.u32.totalorder %s700_s11, %s1246_s1 }
  0x15   : > { %p1025_p13 = pneg %p1009_p11 }
  0x17   : > { %p703_p0 = pnand %p1025_p13, %p701_p12 }
  0x19   : > { %p704_p3 = pneg %p703_p0 }
  0x1b   : > { %p709_p7 = pnand %p707_p5, %p704_p3 }
  0x1d   : > { %712 = shalt.err (!%p709_p7)
}
  0x1e   : > { %s713_s17 = scalar_lea.vmem %s178_s28, 16  ;;  %s720_s23 = scalar_lea.vmem %s178_s28, 32 }
  0x1f   : > { %p714_p10 = scmp.ne.s32.totalorder %s178_s28, %s713_s17  ;;  %p721_p2 = scmp.lt.s32.totalorder %s178_s28, %s178_s28 }
  0x20   : > { %p722_p6 = scmp.lt.s32.totalorder %s720_s23, %s713_s17 }
  0x21   : > { %p716_p9 = pnand %p714_p10, %p1025_p13 }
  0x22   : > { %p723_p4 = por %p722_p6, %p721_p2 }
  0x23   : > { %p717_p1 = pneg %p716_p9 }
  0x25   : > { %p724_p8 = pnand %p723_p4, %p717_p1 }
  0x27   : > { %727 = shalt.err (!%p724_p8)
}
  0x28   : > { %624 = dma.hbm_to_vmem [thread:$0]  (!%p1009_p11), %s1246_s1, 16, %s178_s28, [#allocation6]  }
  0x29   : > { %s728_s10 = scalar_lea.hbm %s1248_s3, 256 }
  0x2a   : > { %p729_p9 = scmp.ne.s32.totalorder %s1248_s3, %s728_s10  ;;  %p735_p1 = scmp.lt.u32.totalorder %s728_s10, %s1248_s3 }
  0x2c   : > { %p731_p12 = pnand %p729_p9, %p1025_p13 }
  0x2e   : > { %p732_p2 = pneg %p731_p12 }
  0x30   : > { %p737_p4 = pnand %p735_p1, %p732_p2 }
  0x32   : > { %740 = shalt.err (!%p737_p4)
}
  0x33   : > { %s741_s28 = scalar_lea.vmem %s1013_s30, 256  ;;  %p749_p3 = scmp.lt.s32.totalorder %s1013_s30, %s1013_s30 }
  0x34   : > { %p742_p6 = scmp.ne.s32.totalorder %s1013_s30, %s741_s28  ;;  %p750_p5 = scmp.lt.s32.totalorder %s741_s28, %s741_s28 }
  0x36   : > { %p744_p8 = pnand %p742_p6, %p1025_p13  ;;  %p751_p7 = por %p750_p5, %p749_p3 }
  0x38   : > { %p745_p0 = pneg %p744_p8 }
  0x3a   : > { %p752_p10 = pnand %p751_p7, %p745_p0 }
  0x3c   : > { %755 = shalt.err (!%p752_p10)
}
  0x3d   : > { %s921_s16 = smov 64   ;;  %s922_s17 = smov 4  }
  0x3e   : > { %630 = dma.hbm_to_vmem [thread:$0]  (!%p1009_p11), %s1248_s3, 256, %s1013_s30, [#allocation9], %s921_s16, %s921_s16, %s922_s17  }
  0x3f   : > { %s756_s9 = scalar_lea.hbm %s1247_s2, 16 }
  0x40   : > { %p757_p9 = scmp.ne.s32.totalorder %s1247_s2, %s756_s9  ;;  %p763_p1 = scmp.lt.u32.totalorder %s756_s9, %s1247_s2 }
  0x42   : > { %p759_p12 = pnand %p757_p9, %p1025_p13 }
  0x44   : > { %p760_p2 = pneg %p759_p12 }
  0x46   : > { %p765_p4 = pnand %p763_p1, %p760_p2 }
  0x48   : > { %768 = shalt.err (!%p765_p4)
}
  0x49   : > { %s769_s15 = scalar_lea.vmem %s189_s8, 16  ;;  %s776_s30 = scalar_lea.vmem %s189_s8, 32 }
  0x4a   : > { %p770_p6 = scmp.ne.s32.totalorder %s189_s8, %s769_s15  ;;  %p777_p3 = scmp.lt.s32.totalorder %s189_s8, %s189_s8 }
  0x4b   : > { %p778_p5 = scmp.lt.s32.totalorder %s776_s30, %s769_s15 }
  0x4c   : > { %p772_p8 = pnand %p770_p6, %p1025_p13 }
  0x4d   : > { %p779_p7 = por %p778_p5, %p777_p3 }
  0x4e   : > { %p773_p0 = pneg %p772_p8 }
  0x50   : > { %p780_p10 = pnand %p779_p7, %p773_p0 }
  0x52   : > { %783 = shalt.err (!%p780_p10)
}
  0x53   : > { %627 = dma.hbm_to_vmem [thread:$0]  (!%p1009_p11), %s1247_s2, 16, %s189_s8, [#allocation6]  }
  0x54   : > { %s923_s27 = smov [#allocation10]   ;;  %s784_s10 = scalar_lea.hbm %s1249_s4, 16 }
  0x55   : > { %s212_s29 = sshll.u32 %s923_s27, 4  ;;  %p785_p9 = scmp.ne.s32.totalorder %s1249_s4, %s784_s10  ;;  %s213_s29 = int_to_ptr.vmem [resolvable:$true] %s212_s29 }
  0x56   : > { %p791_p1 = scmp.lt.u32.totalorder %s784_s10, %s1249_s4 }
  0x57   : > { %p787_p12 = pnand %p785_p9, %p1025_p13 }
  0x59   : > { %p788_p2 = pneg %p787_p12 }
  0x5b   : > { %p793_p4 = pnand %p791_p1, %p788_p2 }
  0x5d   : > { %796 = shalt.err (!%p793_p4)
}
  0x5e   : > { %s797_s8 = scalar_lea.vmem %s213_s29, 16  ;;  %s804_s30 = scalar_lea.vmem %s213_s29, 32 }
  0x5f   : > { %p798_p6 = scmp.ne.s32.totalorder %s213_s29, %s797_s8  ;;  %p805_p3 = scmp.lt.s32.totalorder %s213_s29, %s213_s29 }
  0x60   : > { %p806_p5 = scmp.lt.s32.totalorder %s804_s30, %s797_s8 }
  0x61   : > { %p800_p8 = pnand %p798_p6, %p1025_p13 }
  0x62   : > { %p807_p7 = por %p806_p5, %p805_p3 }
  0x63   : > { %p801_p0 = pneg %p800_p8 }
  0x65   : > { %p808_p10 = pnand %p807_p7, %p801_p0 }
  0x67   : > { %811 = shalt.err (!%p808_p10)
}
  0x68   : > { %633 = dma.hbm_to_vmem [thread:$0]  (!%p1009_p11), %s1249_s4, 16, %s213_s29, [#allocation9]  }
  0x69   : > { %s1105_s14 = sadd.s32 1, %s916_s21   ;;  %s30_s27 = sadd.s32 1, %s912_s20 }
  0x6a   : > { %s27_s6 = ssub.s32 %s916_s21, %s1105_s14  ;;  %p37_p13 = scmp.ne.s32.totalorder %s912_s20, %s908_s19 }
  0x6b   : > { %p28_p9 = scmp.eq.s32.totalorder %s27_s6, 0  ;;  %p38_p12 = scmp.eq.s32.totalorder %s916_s21, 0 }
  0x6c   : > { %p1259_p2 = scmp.eq.s32.totalorder %s981_s22, 1  ;;  %p646_p4 = scmp.lt.s32.totalorder %s916_s21, 2 }
  0x6d   : > { %s1121_s9 = scalar_select %p28_p9, %s912_s20, %s30_s27  }
  0x6e   : > { %p1115_p1 = por %p1259_p2, %p37_p13  ;;  %p39_p6 = por %p38_p12, %p37_p13 }
  0x6f   : > { %s223_s10 = sand.u32 1, %s912_s20   ;;  %s582_s29 = sshll.u32 %s916_s21, 7 }
  0x70   : > { %s559_s11 = sshll.u32 %s223_s10, 3  ;;  %s1128_s15 = scalar_lea.hbm %s1245_s0, %s582_s29 }
  0x71   : > { %s227_s8 = scalar_lea.vmem [#allocation2], %s559_s11  ;;  %p1132_p11 = pnand %p646_p4, %p39_p6 }
  0x72   : > { %s234_s30 = sshll.u32 %s227_s8, 4  ;;  %s1136_s23 = scalar_lea.sflag [#allocation3], %s223_s10  ;;  %s1130_s30 = int_to_ptr.vmem [resolvable:$true] %s234_s30 }
  0x73   : > { %s812_s27 = scalar_lea.hbm %s1128_s15, 128  ;;  %p814_p0 = pneg %p1132_p11 }
  0x74   : > { %p813_p8 = scmp.ne.s32.totalorder %s1128_s15, %s812_s27  ;;  %s817_s29 = scalar_lea.hbm %s1245_s0, 256 }
  0x75   : > { %p818_p7 = scmp.lt.u32.totalorder %s1128_s15, %s1245_s0  ;;  %p819_p10 = scmp.lt.u32.totalorder %s817_s29, %s812_s27 }
  0x76   : > { %p815_p3 = pnand %p814_p0, %p813_p8  ;;  %p821_p9 = scmp.lt.u32.totalorder %s812_s27, %s1128_s15 }
  0x77   : > { %p820_p13 = por %p819_p10, %p818_p7 }
  0x78   : > { %p816_p5 = pneg %p815_p3 }
  0x79   : > { %p822_p12 = por %p821_p9, %p820_p13 }
  0x7b   : > { %p823_p2 = pnand %p822_p12, %p816_p5 }
  0x7d   : > { %826 = shalt.err (!%p823_p2)
}
  0x7e   : > { %s827_s10 = scalar_lea.vmem %s1130_s30, 128  ;;  %s924_s8 = smov [#allocation2]  }
  0x7f   : > { %p828_p4 = scmp.ne.s32.totalorder %s1130_s30, %s827_s10  ;;  %s832_s6 = sshll.u32 %s924_s8, 4  ;;  %s833_s6 = int_to_ptr.vmem [resolvable:$false] %s832_s6 }
  0x80   : > { %s834_s11 = scalar_lea.vmem %s833_s6, 256  ;;  %p835_p3 = scmp.lt.s32.totalorder %s1130_s30, %s833_s6 }
  0x81   : > { %p830_p6 = pnand %p828_p4, %p814_p0  ;;  %p836_p7 = scmp.lt.s32.totalorder %s834_s11, %s827_s10 }
  0x83   : > { %p831_p8 = pneg %p830_p6  ;;  %p837_p10 = por %p836_p7, %p835_p3 }
  0x85   : > { %p838_p13 = pnand %p837_p10, %p831_p8 }
  0x87   : > { %841 = shalt.err (!%p838_p13)
}
  0x88   : > { %637 = dma.hbm_to_vmem [thread:$0]  (!%p1132_p11), %s1128_s15, 128, %s1130_s30, %s1136_s23, %s921_s16, %s921_s16, %s922_s17  }
  0x89   : > { %p1262_p0 = scmp.ne.s32.totalorder %s1256_s26, 0 }
  0x8a   : > { %s1170_s27 = sand.u32 (!%p1262_p0), 1, %s908_s19   ;;  %p1263_p5 = scmp.ne.s32.totalorder (!%p1262_p0), %s1254_s24, 0 }
  0x8b   : > { %246 = sbr.rel (%p1262_p0) target bundleno = 709 (0x2c5), region = 40  ;;  %s563_s29 = sshll.u32 (!%p1262_p0), %s1170_s27, 3 }
  0x8c   : > { %s249_s12 = scalar_lea.sflag (!%p1262_p0), [#allocation3], %s1170_s27  ;;  %s252_s28 = scalar_lea.vmem (!%p1262_p0), [#allocation2], %s563_s29 }
  0x92   : > { %887 = dma.done.wait (%p1263_p5), %s249_s12, 128  }
  0x93   : > { %889 = vsyncadd (%p1263_p5), %s249_s12, 4294967168  ;;  %p1264_p11 = scmp.eq.s32.totalorder %s981_s22, 0 }
  0x95   : > { %891 = dma.done.wait (%p1264_p11), [#allocation6], 32   ;;  %p1265_p9 = pmov %p1264_p11 }
  0x97   : > { %893 = vsyncadd (%p1265_p9), [#allocation6], 4294967264  ;;  %p1266_p12 = pmov %p1265_p9 }
  0x98   : > { %p1267_p2 = pmov %p1265_p9 }
  0x99   : > { %895 = dma.done.wait (%p1266_p12), [#allocation9], 272  }
  0x9a   : > { %897 = vsyncadd (%p1267_p2), [#allocation9], 4294967024  ;;  %v587_v0 = vld [vmem:[%s252_s28] sm:$0xff]   ;;  %vm302_vm0 = vcmask 261120   ;;  %v694_v15 = vld [vmem:[#allocation8] sm:$0xff]   ;;  %v925_v16 = vmov 0.0  }
  0x9b   : > { %v588_v1 = vunpack.c.l.bf16 %v587_v0  ;;  %v589_v2 = vunpack.c.h.bf16 %v587_v0  ;;  %593 = vmatprep.subr.bf16.mxu0 %v925_v16  ;;  %v695_v17 = vld [vmem:[#allocation8 + $0x8] sm:$0xff]   ;;  %vm926_vm1 = vmmov 0   ;;  %v569_v26 = vld [vmem:[#allocation5] ss:$0 sm:$0xff]  ;;  %v570_v30 = vld [vmem:[#allocation7] ss:$0 sm:$0xff] }
  0x9c   : > { %594 = vmatpush3.bf16.msra.mxu0 %v694_v15  ;;  %597 = vmatprep.mubr.msk.bf16.mxu0 %vm926_vm1, %v925_v16  ;;  %v571_v35 = vld [vmem:[#allocation10] ss:$0 sm:$0xff]  ;;  %s294_s24 = scalar_lea.vmem [#allocation11], %s563_s29  ;;  %s585_s16 = sshll.u32 %s981_s22, 7  ;;  %vm424_vm2 = vcmask 781312  }
  0x9d   : > { %v303_v3 = vsel %vm302_vm0, %v588_v1, 0.0  ;;  %v306_v4 = vsel %vm302_vm0, %v589_v2, 0.0  ;;  %595 = vmatprep.subr.bf16.mxu0 %v925_v16  ;;  %s441_s26 = sshll.u32 %s294_s24, 4  ;;  %s1199_s30 = scalar_lea.hbm %s1250_s5, %s585_s16  ;;  %s1201_s26 = int_to_ptr.vmem [resolvable:$true] %s441_s26 }
  0x9e   : > { %304 = vadd.xlane.f32.xlu0 %v303_v3  ;;  %s428_s23 = scalar_lea.sflag [#allocation4], %s1170_s27  ;;  %s842_s22 = scalar_lea.vmem %s1201_s26, 128 }
  0x9f   : > { %p843_p4 = scmp.ne.s32.totalorder %s1201_s26, %s842_s22  ;;  %s927_s13 = smov [#allocation11]  }
  0xa0   : > { %596 = vmatpush3.bf16.msra.mxu0 %v695_v17  ;;  %s846_s10 = sshll.u32 %s927_s13, 4  ;;  %s847_s10 = int_to_ptr.vmem [resolvable:$false] %s846_s10 }
  0xa1   : > { %p844_p6 = pnand %p843_p4, %p1115_p1  ;;  %s848_s8 = scalar_lea.vmem %s847_s10, 256 }
  0xa2   : > { %307 = vadd.xlane.f32.xlu0 %v306_v4  ;;  %p849_p3 = scmp.lt.s32.totalorder %s1201_s26, %s847_s10  ;;  %p850_p7 = scmp.lt.s32.totalorder %s848_s8, %s842_s22 }
  0xa3   : > { %p845_p8 = pneg %p844_p6 }
  0xa4   : > { %p851_p10 = por %p850_p7, %p849_p3 }
  0xa6   : > { %p852_p13 = pnand %p851_p10, %p845_p8 }
 0x12b   : > { %v305_v5 = vpop.xlane.xlu0 %304 }
 0x12c   : > { %v310_v6 = vmul.f32 0.03125, %v305_v5 }
 0x12e   : > { %v312_v7 = vsub.f32 %v588_v1, %v310_v6 }
 0x12f   : > { %v308_v8 = vpop.xlane.xlu0 %307 }
 0x130   : > { %v311_v9 = vmul.f32 0.03125, %v308_v8  ;;  %v314_v10 = vmul.f32 %v312_v7, %v312_v7 }
 0x132   : > { %v313_v11 = vsub.f32 %v589_v2, %v311_v9  ;;  %v316_v12 = vsel %vm302_vm0, %v314_v10, 0.0 }
 0x133   : > { %317 = vadd.xlane.f32.xlu1 %v316_v12 }
 0x134   : > { %v315_v13 = vmul.f32 %v313_v11, %v313_v11 }
 0x136   : > { %v319_v14 = vsel %vm302_vm0, %v315_v13, 0.0 }
 0x137   : > { %320 = vadd.xlane.f32.xlu1 %v319_v14 }
 0x1c0   : > { %v318_v18 = vpop.xlane.xlu1 %317 }
 0x1c1   : > { %v322_v19 = vmul.f32 0.03125, %v318_v18 }
 0x1c3   : > { %v324_v20 = vadd.f32 1e-12, %v322_v19 }
 0x1c4   : > { %v321_v21 = vpop.xlane.xlu1 %320 }
 0x1c5   : > { %696 = vrsqrt.f32 %v324_v20  ;;  %v323_v22 = vmul.f32 0.03125, %v321_v21 }
 0x1c7   : > { %v325_v23 = vadd.f32 1e-12, %v323_v22 }
 0x1c9   : > { %698 = vrsqrt.f32 %v325_v23 }
 0x1cf   : > { %v697_v24 = vpop.eup %696 }
 0x1d0   : > { %v328_v25 = vmul.f32 %v697_v24, %v312_v7 }
 0x1d2   : > { %v337_v29 = vmul.f32 %v569_v26, %v328_v25 }
 0x1d3   : > { %v699_v27 = vpop.eup %698 }
 0x1d4   : > { %v329_v28 = vmul.f32 %v699_v27, %v313_v11  ;;  %v346_v32 = vadd.f32 %v570_v30, %v337_v29 }
 0x1d6   : > { %v338_v31 = vmul.f32 %v569_v26, %v329_v28 }
 0x1d8   : > { %v347_v33 = vadd.f32 %v570_v30, %v338_v31 }
 0x1da   : > { %v348_v34 = vpack.c.bf16 %v347_v33, %v346_v32 }
 0x1dc   : > { %598 = vmatmul.mubr.msk.bf16.vlgmr.msra.gmra.mrb[0].mxu0 %vm302_vm0, %v348_v34 }
 0x2af   : > { %v409_v36 = vpop.f32.mrb[0].mxu0 }
 0x2b0   : > { %v410_v37 = vadd.f32 %v571_v35, %v409_v36  ;;  %v599_v38 = vpop.f32.mrb[1].mxu0 }
 0x2b1   : > { %v412_v39 = vpop.f32.mrb[2].mxu0 }
 0x2b2   : > { %v583_v40 = vpack.c.bf16 %v410_v37, %v410_v37  ;;  %v413_v41 = vadd.f32 %v571_v35, %v412_v39  ;;  %v600_v42 = vpop.f32.mrb[3].mxu0 }
 0x2b4   : > { %425 = vst.msk [vmem:[%s294_s24] sm:$0xf] %vm424_vm2, %v583_v40  ;;  %v584_v43 = vpack.c.bf16 %v413_v41, %v413_v41 }
 0x2b6   : > { %426 = vst.msk [vmem:[%s294_s24 + $0x4] sm:$0xf] %vm424_vm2, %v584_v43 }
 0x2b7   : > { %855 = shalt.err (!%p852_p13)
}
 0x2b8   : > { %s856_s6 = scalar_lea.hbm %s1199_s30, 128  ;;  %s860_s12 = scalar_lea.hbm %s1250_s5, 256 }
 0x2b9   : > { %p857_p0 = scmp.ne.s32.totalorder %s1199_s30, %s856_s6  ;;  %p861_p9 = scmp.lt.u32.totalorder %s1199_s30, %s1250_s5 }
 0x2ba   : > { %p862_p12 = scmp.lt.u32.totalorder %s860_s12, %s856_s6  ;;  %p864_p4 = scmp.lt.u32.totalorder %s856_s6, %s1199_s30 }
 0x2bb   : > { %p858_p5 = pnand %p857_p0, %p1115_p1 }
 0x2bc   : > { %p863_p2 = por %p862_p12, %p861_p9 }
 0x2bd   : > { %p859_p11 = pneg %p858_p5 }
 0x2be   : > { %p865_p6 = por %p864_p4, %p863_p2 }
 0x2c0   : > { %p866_p8 = pnand %p865_p6, %p859_p11 }
 0x2c2   : > { %869 = shalt.err (!%p866_p8)
}
 0x2c3   : > { %s928_s16 = smov 64   ;;  %s929_s17 = smov 4  }
 0x2c4   : > { %619 = dma.vmem_to_hbm [thread:$0]  (%p1115_p1), %s1201_s26, 128, %s1199_s30, %s428_s23, %s928_s16, %s928_s16, %s929_s17  }
 0x2c5 PF: > { %s456_s15 = sand.u32 1, %s904_s18   ;;  %p1268_p3 = scmp.ne.s32.totalorder %s1255_s25, 0 }
 0x2c6   : > { %p1269_p7 = scmp.ge.s32.totalorder %s916_s21, 2  ;;  %s457_s22 = scalar_lea.sflag [#allocation4], %s456_s15 }
 0x2c8   : > { %p639_p10 = pnand %p1269_p7, %p1268_p3 }
 0x2ca   : > { %899 = dma.done.wait (!%p639_p10), %s457_s22, 128  }
 0x2cb   : > { %901 = vsyncadd (!%p639_p10), %s457_s22, 4294967168  ;;  %p20_p13 = scmp.ge.s32.totalorder %s1105_s14, 4   ;;  %s1270_s18 = smov %s908_s19 }
 0x2cc   : > { %s1271_s19 = smov %s912_s20  ;;  %s1272_s20 = smov %s1121_s9 }
 0x2cd   : > { %s1273_s21 = smov %s1105_s14  ;;  %22 = sbr.rel (!%p20_p13) target bundleno = 7 (0x7), region = 101 }
 0x2d4   :  { %462 = vsyncpa [#allocation3], 1 }
 0x2d5   :  { %464 = vsyncpa [#allocation3 + $0x1], 1 }
 0x2d6   :  { %465 = vsyncpa [#allocation6], 1 }
 0x2d7   :  { %466 = vsyncpa [#allocation9], 1 }
 0x2d8   :  { %467 = vsyncpa [#allocation4], 1 }
 0x2d9   :  { %469 = vsyncpa [#allocation4 + $0x1], 1 }

// kernel: vit_pose_forward.14
= control target key start
LH: loop header
LB: loop body
LE: loop exit
PB: predicated region body
PF: predicated region fallthrough
CT: control target
= control target key end

     0   :  { %s1160_s0 = inlined_call_operand.hbm [shape: bf16[32,32], index: 0, kind: input, shape index: {}]   ;;  %s1161_s1 = inlined_call_operand.hbm [shape: bf16[32,32], index: 1, kind: input, shape index: {}]   ;;  %s1162_s2 = inlined_call_operand.hbm [shape: f32[1,32], index: 2, kind: input, shape index: {}]   ;;  %s1163_s3 = inlined_call_operand.hbm [shape: bf16[32,32], index: 3, kind: input, shape index: {}, may-alias: {3,4}]   ;;  %s1164_s4 = inlined_call_operand.hbm [shape: bf16[32,32], index: 4, kind: output, shape index: {}, may-alias: {3,4}]  }
   0x1   :  { %1173 = sst [smem:[#allocation15_spill]] %s1160_s0 }
   0x2   :  { %1174 = sst [smem:[#allocation16_spill]] %s1161_s1 }
   0x3   :  { %1175 = sst [smem:[#allocation17_spill]] %s1162_s2 }
   0x4   :  { %9 = vsyncpa [#allocation3], 0 }
   0x5   :  { %11 = vsyncpa [#allocation3 + $0x1], 0 }
   0x6   :  { %12 = vsyncpa [#allocation6], 0 }
   0x7   :  { %13 = vsyncpa [#allocation9], 0 }
   0x8   :  { %15 = vsyncpa [#allocation9 + $0x1], 0 }
   0x9   :  { %16 = vsyncpa [#allocation4], 0 }
   0xa   :  { %18 = vsyncpa [#allocation4 + $0x1], 0  ;;  %s866_s15 = smov 0   ;;  %s868_s16 = smov 0  }
   0xb   :  { %s870_s17 = smov 0   ;;  %s872_s18 = smov 0  }
   0xc LB: > { %s887_s19 = sadd.s32 4294967295, %s828_s18   ;;  %s508_s20 = sadd.s32 4294967294, %s828_s18   ;;  %s828_s18 = sphi %s872_s18, %s1198_s18   ;;  %s824_s17 = sphi %s870_s17, %s1197_s17   ;;  %s820_s16 = sphi %s868_s16, %s1196_s16   ;;  %s816_s15 = sphi %s866_s15, %s1195_s15  }
   0xd   : > { %p44_p0 = scmp.ne.s32.totalorder %s820_s16, %s816_s15  ;;  %p1165_p1 = scmp.eq.s32.totalorder %s887_s19, 0 }
   0xe   : > { %p142_p3 = scmp.eq.s32.totalorder %s508_s20, 1  ;;  %p509_p5 = scmp.ge.s32.totalorder %s828_s18, 1 }
   0xf   : > { %p896_p4 = por %p1165_p1, %p44_p0  ;;  %p149_p7 = scmp.lt.s32.totalorder %s828_s18, 3 }
  0x10   : > { %p901_p6 = por %p142_p3, %p44_p0  ;;  %s830_s24 = smov [#allocation5]  }
  0x11   : > { %s1176_s21 = scalar_select %p896_p4, 1, 0 }
  0x12   : > { %s1177_s22 = scalar_select %p901_p6, 1, 0 }
  0x13   : > { %p906_p8 = pnand %p509_p5, %p149_p7  ;;  %s161_s25 = sshll.u32 %s830_s24, 4  ;;  %s910_s25 = int_to_ptr.vmem [resolvable:$true] %s161_s25 }
  0x14   : > { %s831_s27 = smov [#allocation7]   ;;  %s1180_s1 = sld [smem:[#allocation16_spill]] }
  0x15   : > { %p571_p9 = pneg %p906_p8  ;;  %s175_s28 = sshll.u32 %s831_s27, 4  ;;  %s921_s28 = int_to_ptr.vmem [resolvable:$true] %s175_s28 }
  0x17   : > { %p917_p11 = pnand %p571_p9, %p1165_p1 }
  0x19   : > { %p640_p13 = pneg %p917_p11 }
  0x1a   : > { %s638_s5 = scalar_lea.hbm %s1180_s1, 256 }
  0x1b   : > { %p639_p12 = scmp.ne.s32.totalorder %s1180_s1, %s638_s5  ;;  %p645_p5 = scmp.lt.u32.totalorder %s638_s5, %s1180_s1 }
  0x1d   : > { %p641_p0 = pnand %p640_p13, %p639_p12 }
  0x1f   : > { %p642_p3 = pneg %p641_p0 }
  0x21   : > { %p647_p7 = pnand %p645_p5, %p642_p3 }
  0x23   : > { %650 = shalt.err (!%p647_p7)
}
  0x24   : > { %s651_s10 = scalar_lea.vmem %s910_s25, 256  ;;  %p659_p2 = scmp.lt.s32.totalorder %s910_s25, %s910_s25 }
  0x25   : > { %p652_p9 = scmp.ne.s32.totalorder %s910_s25, %s651_s10  ;;  %p660_p12 = scmp.lt.s32.totalorder %s651_s10, %s651_s10 }
  0x27   : > { %p654_p10 = pnand %p652_p9, %p640_p13  ;;  %p661_p0 = por %p660_p12, %p659_p2 }
  0x29   : > { %p655_p1 = pneg %p654_p10 }
  0x2b   : > { %p662_p6 = pnand %p661_p0, %p655_p1 }
  0x2d   : > { %665 = shalt.err (!%p662_p6)
}
  0x2e   : > { %s1167_s11 = smov 64   ;;  %s1169_s12 = smov 4  }
  0x2f   : > { %574 = dma.hbm_to_vmem [thread:$0]  (!%p917_p11), %s1180_s1, 256, %s910_s25, [#allocation6], %s1167_s11, %s1167_s11, %s1169_s12  }
  0x30   : > { %s1181_s2 = sld [smem:[#allocation17_spill]] }
  0x36   : > { %s666_s27 = scalar_lea.hbm %s1181_s2, 16 }
  0x37   : > { %p667_p1 = scmp.ne.s32.totalorder %s1181_s2, %s666_s27  ;;  %p673_p10 = scmp.lt.u32.totalorder %s666_s27, %s1181_s2 }
  0x39   : > { %p669_p2 = pnand %p667_p1, %p640_p13 }
  0x3b   : > { %p670_p6 = pneg %p669_p2 }
  0x3d   : > { %p675_p3 = pnand %p673_p10, %p670_p6 }
  0x3f   : > { %678 = shalt.err (!%p675_p3)
}
  0x40   : > { %s679_s25 = scalar_lea.vmem %s921_s28, 16  ;;  %s686_s7 = scalar_lea.vmem %s921_s28, 32 }
  0x41   : > { %p680_p5 = scmp.ne.s32.totalorder %s921_s28, %s679_s25  ;;  %p687_p12 = scmp.lt.s32.totalorder %s921_s28, %s921_s28 }
  0x42   : > { %p688_p0 = scmp.lt.s32.totalorder %s686_s7, %s679_s25 }
  0x43   : > { %p682_p7 = pnand %p680_p5, %p640_p13 }
  0x44   : > { %p689_p1 = por %p688_p0, %p687_p12 }
  0x45   : > { %p683_p9 = pneg %p682_p7 }
  0x47   : > { %p690_p2 = pnand %p689_p1, %p683_p9 }
  0x49   : > { %693 = shalt.err (!%p690_p2)
}
  0x4a   : > { %577 = dma.hbm_to_vmem [thread:$0]  (!%p917_p11), %s1181_s2, 16, %s921_s28, [#allocation6]  }
  0x4b   : > { %s980_s10 = sadd.s32 1, %s828_s18   ;;  %s31_s26 = sadd.s32 1, %s824_s17 }
  0x4c   : > { %s28_s13 = ssub.s32 %s828_s18, %s980_s10  ;;  %p38_p13 = scmp.ne.s32.totalorder %s824_s17, %s820_s16 }
  0x4d   : > { %p29_p6 = scmp.eq.s32.totalorder %s28_s13, 0  ;;  %p39_p10 = scmp.eq.s32.totalorder %s828_s18, 0 }
  0x4e   : > { %p1182_p3 = scmp.eq.s32.totalorder %s887_s19, 1  ;;  %p591_p7 = scmp.lt.s32.totalorder %s828_s18, 2 }
  0x4f   : > { %s996_s20 = scalar_select %p29_p6, %s824_s17, %s31_s26  }
  0x50   : > { %p990_p5 = por %p1182_p3, %p38_p13  ;;  %p40_p9 = por %p39_p10, %p38_p13 }
  0x51   : > { %s999_s24 = sand.u32 1, %s824_s17   ;;  %s537_s27 = sshll.u32 %s828_s18, 7 }
  0x52   : > { %s1183_s14 = scalar_select %p990_p5, 1, 0 }
  0x53   : > { %s1166_s28 = sshll.u32 %s999_s24, 3  ;;  %s1184_s0 = sld [smem:[#allocation15_spill]] }
  0x54   : > { %s190_s6 = scalar_lea.vmem [#allocation2], %s1166_s28  ;;  %p1012_p11 = pnand %p591_p7, %p40_p9 }
  0x55   : > { %s197_s25 = sshll.u32 %s190_s6, 4  ;;  %s1019_s26 = scalar_lea.hbm %s1163_s3, %s537_s27  ;;  %s1010_s25 = int_to_ptr.vmem [resolvable:$true] %s197_s25 }
  0x56   : > { %s187_s13 = scalar_lea.sflag [#allocation3], %s999_s24  ;;  %p696_p0 = pneg %p1012_p11 }
  0x59   : > { %s1006_s5 = scalar_lea.hbm %s1184_s0, %s537_s27  ;;  %s699_s28 = scalar_lea.hbm %s1184_s0, 256 }
  0x5a   : > { %s694_s29 = scalar_lea.hbm %s1006_s5, 128  ;;  %p700_p13 = scmp.lt.u32.totalorder %s1006_s5, %s1184_s0 }
  0x5b   : > { %p695_p12 = scmp.ne.s32.totalorder %s1006_s5, %s694_s29  ;;  %p701_p6 = scmp.lt.u32.totalorder %s699_s28, %s694_s29 }
  0x5c   : > { %p703_p3 = scmp.lt.u32.totalorder %s694_s29, %s1006_s5 }
  0x5d   : > { %p697_p1 = pnand %p696_p0, %p695_p12  ;;  %p702_p10 = por %p701_p6, %p700_p13 }
  0x5f   : > { %p698_p2 = pneg %p697_p1  ;;  %p704_p7 = por %p703_p3, %p702_p10 }
  0x61   : > { %p705_p9 = pnand %p704_p7, %p698_p2 }
  0x63   : > { %708 = shalt.err (!%p705_p9)
}
  0x64   : > { %s709_s27 = scalar_lea.vmem %s1010_s25, 128  ;;  %s834_s8 = smov [#allocation2]  }
  0x65   : > { %p710_p12 = scmp.ne.s32.totalorder %s1010_s25, %s709_s27  ;;  %s714_s9 = sshll.u32 %s834_s8, 4  ;;  %s715_s9 = int_to_ptr.vmem [resolvable:$false] %s714_s9 }
  0x66   : > { %s716_s11 = scalar_lea.vmem %s715_s9, 256  ;;  %p717_p4 = scmp.lt.s32.totalorder %s1010_s25, %s715_s9 }
  0x67   : > { %p712_p1 = pnand %p710_p12, %p696_p0  ;;  %p718_p13 = scmp.lt.s32.totalorder %s716_s11, %s709_s27 }
  0x69   : > { %p713_p5 = pneg %p712_p1  ;;  %p719_p6 = por %p718_p13, %p717_p4 }
  0x6b   : > { %p720_p10 = pnand %p719_p6, %p713_p5 }
  0x6d   : > { %723 = shalt.err (!%p720_p10)
}
  0x6e   : > { %s1186_s12 = smov 4   ;;  %s1187_s28 = smov 64  }
  0x6f   : > { %581 = dma.hbm_to_vmem [thread:$0]  (!%p1012_p11), %s1006_s5, 128, %s1010_s25, %s187_s13, %s1187_s28, %s1187_s28, %s1186_s12  }
  0x70   : > { %s1188_s29 = sshll.u32 %s999_s24, 3  ;;  %s208_s27 = scalar_lea.sflag [#allocation9], %s999_s24 }
  0x71   : > { %s211_s30 = scalar_lea.vmem [#allocation8], %s1188_s29  ;;  %s724_s8 = scalar_lea.hbm %s1019_s26, 128 }
  0x72   : > { %s218_s6 = sshll.u32 %s211_s30, 4  ;;  %p725_p4 = scmp.ne.s32.totalorder %s1019_s26, %s724_s8  ;;  %s1054_s6 = int_to_ptr.vmem [resolvable:$true] %s218_s6 }
  0x73   : > { %s729_s0 = scalar_lea.hbm %s1163_s3, 256  ;;  %p730_p3 = scmp.lt.u32.totalorder %s1019_s26, %s1163_s3 }
  0x74   : > { %p727_p5 = pnand %p725_p4, %p696_p0  ;;  %p731_p7 = scmp.lt.u32.totalorder %s729_s0, %s724_s8 }
  0x75   : > { %p733_p12 = scmp.lt.u32.totalorder %s724_s8, %s1019_s26 }
  0x76   : > { %p728_p2 = pneg %p727_p5  ;;  %p732_p9 = por %p731_p7, %p730_p3 }
  0x78   : > { %p734_p1 = por %p733_p12, %p732_p9 }
  0x7a   : > { %p735_p13 = pnand %p734_p1, %p728_p2 }
  0x7c   : > { %738 = shalt.err (!%p735_p13)
}
  0x7d   : > { %s739_s5 = scalar_lea.vmem %s1054_s6, 128  ;;  %s835_s25 = smov [#allocation8]  }
  0x7e   : > { %p740_p6 = scmp.ne.s32.totalorder %s1054_s6, %s739_s5  ;;  %s744_s13 = sshll.u32 %s835_s25, 4  ;;  %s745_s13 = int_to_ptr.vmem [resolvable:$false] %s744_s13 }
  0x7f   : > { %s746_s1 = scalar_lea.vmem %s745_s13, 256  ;;  %p747_p5 = scmp.lt.s32.totalorder %s1054_s6, %s745_s13 }
  0x80   : > { %p742_p10 = pnand %p740_p6, %p696_p0  ;;  %p748_p3 = scmp.lt.s32.totalorder %s746_s1, %s739_s5 }
  0x82   : > { %p743_p4 = pneg %p742_p10  ;;  %p749_p7 = por %p748_p3, %p747_p5 }
  0x84   : > { %p750_p9 = pnand %p749_p7, %p743_p4 }
  0x86   : > { %753 = shalt.err (!%p750_p9)
}
  0x87   : > { %584 = dma.hbm_to_vmem [thread:$0]  (!%p1012_p11), %s1019_s26, 128, %s1054_s6, %s208_s27, %s1187_s28, %s1187_s28, %s1186_s12  }
  0x88   : > { %230 = sbr.rel (%p906_p8) target bundleno = 394 (0x18a), region = 36  ;;  %s1088_s0 = sand.u32 (!%p906_p8), 1, %s820_s16  }
  0x89   : > { %s1091_s2 = sshll.u32 (!%p906_p8), %s1088_s0, 3  ;;  %s233_s7 = scalar_lea.sflag (!%p906_p8), [#allocation3], %s1088_s0 }
  0x8a   : > { %s236_s29 = scalar_lea.vmem (!%p906_p8), [#allocation2], %s1091_s2  ;;  %p1189_p0 = scmp.ne.s32.totalorder (!%p906_p8), %s1176_s21, 0 }
  0x8f   : > { %799 = dma.done.wait (%p1189_p0), %s233_s7, 128  }
  0x90   : > { %801 = vsyncadd (%p1189_p0), %s233_s7, 4294967168  ;;  %p1190_p11 = scmp.eq.s32.totalorder %s887_s19, 0 }
  0x92   : > { %803 = dma.done.wait (%p1190_p11), [#allocation6], 272   ;;  %p1191_p8 = pmov %p1190_p11 }
  0x93   : > { %s250_s23 = scalar_lea.sflag [#allocation9], %s1088_s0  ;;  %s253_s24 = scalar_lea.vmem [#allocation8], %s1091_s2 }
  0x94   : > { %805 = vsyncadd (%p1191_p8), [#allocation6], 4294967024 }
  0x95   : > { %807 = dma.done.wait (%p1189_p0), %s250_s23, 128  }
  0x96   : > { %809 = vsyncadd (%p1189_p0), %s250_s23, 4294967168  ;;  %v836_v0 = vmov 0.0   ;;  %vm837_vm0 = vmmov 0   ;;  %v635_v1 = vld [vmem:[#allocation5] sm:$0xff]   ;;  %v636_v2 = vld [vmem:[#allocation5 + $0x8] sm:$0xff]   ;;  %vm317_vm1 = vcmask 261120  }
  0x97   : > { %549 = vmatprep.subr.bf16.mxu0 %v836_v0  ;;  %553 = vmatprep.mubr.msk.bf16.mxu0 %vm837_vm0, %v836_v0  ;;  %v637_v3 = vld [vmem:[%s236_s29] sm:$0xff]   ;;  %s541_s21 = sshll.u32 %s887_s19, 7  ;;  %s282_s26 = scalar_lea.vmem [#allocation10], %s1091_s2  ;;  %vm376_vm2 = vcmask 257024  }
  0x98   : > { %550 = vmatpush3.bf16.msra.mxu0 %v635_v1  ;;  %v543_v4 = vld [vmem:[%s253_s24] sm:$0xff]   ;;  %v525_v5 = vld [vmem:[#allocation7] ss:$0 sm:$0xff]  ;;  %s393_s12 = sshll.u32 %s282_s26, 4  ;;  %s1114_s6 = scalar_lea.hbm %s1164_s4, %s541_s21  ;;  %s1116_s12 = int_to_ptr.vmem [resolvable:$true] %s393_s12 }
  0x99   : > { %551 = vmatprep.subr.bf16.mxu0 %v836_v0  ;;  %v544_v6 = vunpack.c.l.bf16 %v543_v4  ;;  %v545_v10 = vunpack.c.h.bf16 %v543_v4  ;;  %s380_s27 = scalar_lea.sflag [#allocation4], %s1088_s0  ;;  %s754_s19 = scalar_lea.vmem %s1116_s12, 128 }
  0x9a   : > { %p755_p2 = scmp.ne.s32.totalorder %s1116_s12, %s754_s19  ;;  %p1192_p12 = scmp.ne.s32.totalorder %s1183_s14, 0 }
  0x9b   : > { %s838_s8 = smov [#allocation10]  }
  0x9c   : > { %552 = vmatpush3.bf16.msra.mxu0 %v636_v2  ;;  %p756_p1 = pnand %p755_p2, %p1192_p12  ;;  %s758_s9 = sshll.u32 %s838_s8, 4  ;;  %s759_s9 = int_to_ptr.vmem [resolvable:$false] %s758_s9 }
  0x9d   : > { %s760_s11 = scalar_lea.vmem %s759_s9, 256  ;;  %p761_p6 = scmp.lt.s32.totalorder %s1116_s12, %s759_s9 }
  0x9e   : > { %p757_p13 = pneg %p756_p1  ;;  %p762_p10 = scmp.lt.s32.totalorder %s760_s11, %s754_s19 }
  0x9f   : > { %554 = vmatmul.mubr.msk.bf16.vlgmr.msra.gmra.mrb[0].mxu0 %vm317_vm1, %v637_v3 }
  0xa0   : > { %p763_p4 = por %p762_p10, %p761_p6 }
  0xa2   : > { %p764_p5 = pnand %p763_p4, %p757_p13 }
 0x172   : > { %v355_v7 = vpop.f32.mrb[0].mxu0 }
 0x173   : > { %v356_v8 = vadd.f32 %v525_v5, %v355_v7  ;;  %v555_v9 = vpop.f32.mrb[1].mxu0 }
 0x174   : > { %v358_v11 = vpop.f32.mrb[2].mxu0 }
 0x175   : > { %v366_v12 = vadd.f32 %v544_v6, %v356_v8  ;;  %v359_v13 = vadd.f32 %v525_v5, %v358_v11  ;;  %v556_v14 = vpop.f32.mrb[3].mxu0 }
 0x177   : > { %v539_v15 = vpack.c.bf16 %v366_v12, %v366_v12  ;;  %v367_v16 = vadd.f32 %v545_v10, %v359_v13 }
 0x179   : > { %377 = vst.msk [vmem:[%s282_s26] sm:$0xf] %vm376_vm2, %v539_v15  ;;  %v540_v17 = vpack.c.bf16 %v367_v16, %v367_v16 }
 0x17b   : > { %378 = vst.msk [vmem:[%s282_s26 + $0x4] sm:$0xf] %vm376_vm2, %v540_v17 }
 0x17c   : > { %767 = shalt.err (!%p764_p5)
}
 0x17d   : > { %s768_s5 = scalar_lea.hbm %s1114_s6, 128  ;;  %s772_s1 = scalar_lea.hbm %s1164_s4, 256 }
 0x17e   : > { %p769_p3 = scmp.ne.s32.totalorder %s1114_s6, %s768_s5  ;;  %p773_p0 = scmp.lt.u32.totalorder %s1114_s6, %s1164_s4 }
 0x17f   : > { %p774_p11 = scmp.lt.u32.totalorder %s772_s1, %s768_s5  ;;  %p776_p2 = scmp.lt.u32.totalorder %s768_s5, %s1114_s6 }
 0x180   : > { %p770_p7 = pnand %p769_p3, %p1192_p12 }
 0x181   : > { %p775_p8 = por %p774_p11, %p773_p0 }
 0x182   : > { %p771_p9 = pneg %p770_p7 }
 0x183   : > { %p777_p1 = por %p776_p2, %p775_p8 }
 0x185   : > { %p778_p13 = pnand %p777_p1, %p771_p9 }
 0x187   : > { %781 = shalt.err (!%p778_p13)
}
 0x188   : > { %s839_s29 = smov 64   ;;  %s840_s23 = smov 4  }
 0x189   : > { %569 = dma.vmem_to_hbm [thread:$0]  (%p1192_p12), %s1116_s12, 128, %s1114_s6, %s380_s27, %s839_s29, %s839_s29, %s840_s23  }
 0x18a PF: > { %s408_s24 = sand.u32 1, %s816_s15   ;;  %p1193_p6 = scmp.ne.s32.totalorder %s1177_s22, 0 }
 0x18b   : > { %p1194_p10 = scmp.ge.s32.totalorder %s828_s18, 2  ;;  %s409_s21 = scalar_lea.sflag [#allocation4], %s408_s24 }
 0x18d   : > { %p586_p4 = pnand %p1194_p10, %p1193_p6 }
 0x18f   : > { %811 = dma.done.wait (!%p586_p4), %s409_s21, 128  }
 0x190   : > { %813 = vsyncadd (!%p586_p4), %s409_s21, 4294967168  ;;  %p21_p5 = scmp.ge.s32.totalorder %s980_s10, 4   ;;  %s1195_s15 = smov %s820_s16 }
 0x191   : > { %s1196_s16 = smov %s824_s17  ;;  %s1197_s17 = smov %s996_s20 }
 0x192   : > { %s1198_s18 = smov %s980_s10  ;;  %23 = sbr.rel (!%p21_p5) target bundleno = 12 (0xc), region = 102 }
 0x199   :  { %414 = vsyncpa [#allocation3], 1 }
 0x19a   :  { %416 = vsyncpa [#allocation3 + $0x1], 1 }
 0x19b   :  { %417 = vsyncpa [#allocation6], 1 }
 0x19c   :  { %418 = vsyncpa [#allocation9], 1 }
 0x19d   :  { %420 = vsyncpa [#allocation9 + $0x1], 1 }
 0x19e   :  { %421 = vsyncpa [#allocation4], 1 }
 0x19f   :  { %423 = vsyncpa [#allocation4 + $0x1], 1 }

// kernel: vit_pose_forward.13
= control target key start
LH: loop header
LB: loop body
LE: loop exit
PB: predicated region body
PF: predicated region fallthrough
CT: control target
= control target key end

     0   :  { %6 = vsyncpa [#allocation3], 0  ;;  %s1444_s0 = inlined_call_operand.hbm [shape: bf16[2,16,96], index: 0, kind: input, shape index: {}]   ;;  %s1445_s1 = inlined_call_operand.hbm [shape: bf16[2,16,32], index: 1, kind: output, shape index: {}]  }
   0x1   :  { %8 = vsyncpa [#allocation3 + $0x1], 0 }
   0x2   :  { %9 = vsyncpa [#allocation4], 0 }
   0x3   :  { %11 = vsyncpa [#allocation4 + $0x1], 0  ;;  %s1176_s6 = smov 0   ;;  %s1178_s7 = smov 0  }
   0x4   :  { %s1180_s8 = smov 0   ;;  %s1182_s9 = smov 0  }
   0x5   :  { %s1184_s10 = smov 0   ;;  %s1186_s11 = smov 0  }
   0x6 LB: > { %s806_s12 = sadd.s32 4294967295, %s1142_s11   ;;  %s807_s13 = sadd.s32 4294967294, %s1142_s11   ;;  %s1142_s11 = sphi %s1186_s11, %s17_s11   ;;  %s1138_s10 = sphi %s1184_s10, %s1460_s10   ;;  %s1134_s9 = sphi %s1182_s9, %s1459_s9   ;;  %s1130_s8 = sphi %s1180_s8, %s1458_s8   ;;  %s1126_s7 = sphi %s1178_s7, %s1457_s7   ;;  %s1122_s6 = sphi %s1176_s6, %s1456_s6  }
   0x7   : > { %s29_s14 = sadd.s32 1, %s1138_s10  ;;  %s38_s15 = sadd.s32 1, %s1130_s8 }
   0x8   : > { %p31_p0 = scmp.ge.s32.totalorder %s29_s14, 2  ;;  %p45_p1 = scmp.ne.s32.totalorder %s1130_s8, %s1126_s7 }
   0x9   : > { %p46_p2 = scmp.eq.s32.totalorder %s1142_s11, 0  ;;  %p51_p3 = scmp.ne.s32.totalorder %s1126_s7, %s1122_s6 }
   0xa   : > { %s1462_s14 = smov (%p31_p0, %s29_s14), 0  ;;  %p52_p5 = scmp.eq.s32.totalorder %s806_s12, 0 }
   0xb   : > { %p1217_p4 = por %p46_p2, %p45_p1  ;;  %s33_s17 = ssub.s32 %s1138_s10, %s1462_s14 }
   0xc   : > { %p77_p6 = scmp.eq.s32.totalorder %s806_s12, 1  ;;  %p36_p7 = scmp.eq.s32.totalorder %s33_s17, 0 }
   0xd   : > { %p1223_p8 = por %p52_p5, %p51_p3  ;;  %p83_p10 = scmp.eq.s32.totalorder %s807_s13, 1 }
   0xe   : > { %p1227_p9 = por %p77_p6, %p45_p1  ;;  %p912_p13 = scmp.lt.s32.totalorder %s1142_s11, 2 }
   0xf   : > { %s1232_s20 = scalar_select %p36_p7, %s1130_s8, %s38_s15  }
  0x10   : > { %s1449_s19 = scalar_select %p1227_p9, 1, 0 }
  0x11   : > { %p1234_p11 = por %p83_p10, %p51_p3  ;;  %s103_s22 = sand.u32 1, %s1130_s8  }
  0x12   : > { %s810_s23 = sshll.u32 %s103_s22, 3  ;;  %s832_s24 = sshll.u32 %s1138_s10, 7 }
  0x13   : > { %s1450_s21 = scalar_select %p1234_p11, 1, 0 }
  0x14   : > { %s1245_s27 = scalar_lea.hbm %s1444_s0, %s832_s24  ;;  %s107_s28 = scalar_lea.vmem [#allocation2], %s810_s23 }
  0x15   : > { %s115_s29 = sshll.u32 %s107_s28, 4  ;;  %p1251_p0 = pnand %p912_p13, %p1217_p4  ;;  %s1247_s29 = int_to_ptr.vmem [resolvable:$true] %s115_s29 }
  0x16   : > { %s1256_s2 = scalar_lea.sflag [#allocation3], %s103_s22  ;;  %s1030_s3 = scalar_lea.hbm %s1245_s27, 128 }
  0x17   : > { %p1031_p2 = scmp.ne.s32.totalorder %s1245_s27, %s1030_s3  ;;  %p1032_p3 = pneg %p1251_p0 }
  0x18   : > { %s1035_s12 = scalar_lea.hbm %s1444_s0, 256  ;;  %p1036_p4 = scmp.lt.u32.totalorder %s1245_s27, %s1444_s0 }
  0x19   : > { %p1033_p5 = pnand %p1032_p3, %p1031_p2  ;;  %p1037_p7 = scmp.lt.u32.totalorder %s1035_s12, %s1030_s3 }
  0x1a   : > { %p1039_p13 = scmp.lt.u32.totalorder %s1030_s3, %s1245_s27 }
  0x1b   : > { %p1034_p6 = pneg %p1033_p5  ;;  %p1038_p10 = por %p1037_p7, %p1036_p4 }
  0x1d   : > { %p1040_p12 = por %p1039_p13, %p1038_p10 }
  0x1f   : > { %p1041_p1 = pnand %p1040_p12, %p1034_p6 }
  0x21   : > { %1044 = shalt.err (!%p1041_p1)
}
  0x22   : > { %s1045_s16 = scalar_lea.vmem %s1247_s29, 128  ;;  %s1144_s17 = smov [#allocation2]  }
  0x23   : > { %p1046_p2 = scmp.ne.s32.totalorder %s1247_s29, %s1045_s16  ;;  %s1050_s22 = sshll.u32 %s1144_s17, 4  ;;  %s1051_s22 = int_to_ptr.vmem [resolvable:$false] %s1050_s22 }
  0x24   : > { %s1052_s23 = scalar_lea.vmem %s1051_s22, 256  ;;  %p1053_p9 = scmp.lt.s32.totalorder %s1247_s29, %s1051_s22 }
  0x25   : > { %p1048_p5 = pnand %p1046_p2, %p1032_p3  ;;  %p1054_p4 = scmp.lt.s32.totalorder %s1052_s23, %s1045_s16 }
  0x27   : > { %p1049_p11 = pneg %p1048_p5  ;;  %p1055_p7 = por %p1054_p4, %p1053_p9 }
  0x29   : > { %p1056_p10 = pnand %p1055_p7, %p1049_p11 }
  0x2b   : > { %1059 = shalt.err (!%p1056_p10)
}
  0x2c   : > { %s1145_s24 = smov 64   ;;  %s1146_s25 = smov 4  }
  0x2d   : > { %907 = dma.hbm_to_vmem [thread:$0]  (!%p1251_p0), %s1245_s27, 128, %s1247_s29, %s1256_s2, %s1145_s24, %s1145_s24, %s1146_s25  }
  0x2e   : > { %p123_p12 = scmp.lt.s32.totalorder %s1142_s11, 3  ;;  %p1452_p1 = scmp.ge.s32.totalorder %s1142_s11, 1 }
  0x30   : > { %p124_p3 = pnand %p1452_p1, %p123_p12 }
  0x31   : > { %s1288_s26 = sand.u32 (!%p124_p3), 1, %s1126_s7  }
  0x32   : > { %127 = sbr.rel (%p124_p3) target bundleno = 1629 (0x65d), region = 24  ;;  %s814_s28 = sshll.u32 (!%p124_p3), %s1288_s26, 3 }
  0x33   : > { %s130_s3 = scalar_lea.sflag (!%p124_p3), [#allocation3], %s1288_s26  ;;  %s133_s4 = scalar_lea.vmem (!%p124_p3), [#allocation2], %s814_s28 }
  0x39   : > { %1113 = dma.done.wait (%p1223_p8), %s130_s3, 128  }
  0x3a   : > { %1115 = vsyncadd (%p1223_p8), %s130_s3, 4294967168  ;;  %v1147_v0 = vmov 0.0   ;;  %vm1148_vm0 = vmmov 0   ;;  %v1304_v1 = vld [vmem:[%s133_s4] sm:$0xff]   ;;  %s1149_s27 = smov 120   ;;  %vm166_vm1 = vcmask 64512   ;;  %v155_v4 = vlaneseq }
  0x3b   : > { %852 = vmatprep.subr.bf16.mxu0 %v1147_v0  ;;  %854 = vmatprep.mubr.msk.bf16.mxu0 %vm1148_vm0, %v1147_v0  ;;  %v1150_v7 = vmov -1e+30   ;;  %vm218_vm3 = vcmask 130048   ;;  %s1151_s18 = smov 112   ;;  %s1152_s29 = smov 72   ;;  %vm692_vm4 = vcmask 195584  }
  0x3c   : > { %858 = vmatprep.subr.bf16.mxu1 %v1147_v0  ;;  %860 = vmatprep.mubr.msk.bf16.mxu1 %vm1148_vm0, %v1147_v0  ;;  %v156_v5 = vand.u32 127, %v155_v4  ;;  %s1153_s30 = smov 96   ;;  %s1154_s2 = smov 104   ;;  %vm703_vm5 = vcmask 257024  }
  0x3d   : > { %164 = vrot.lane.b32.xlu0 %v1304_v1, %s1149_s27  ;;  %s1155_s5 = smov 80   ;;  %s1156_s12 = smov 48  }
  0x3e   : > { %vm157_vm2 = vcmp.lt.s32.totalorder %v156_v5, 5  ;;  %s1157_s13 = smov 56   ;;  %s1158_s15 = smov 88  }
  0x3f   : > { %v1313_v8 = vsel %vm157_vm2, 0.0, %v1150_v7  ;;  %s1159_s16 = smov 40   ;;  %s1160_s17 = smov 64  }
  0x40   : > { %s1161_s22 = smov 8   ;;  %s1162_s23 = smov 16  }
  0x41   : > { %s1163_s24 = smov 24   ;;  %s835_s25 = sshll.u32 %s1134_s9, 7 }
  0x42   : > { %s151_s3 = scalar_lea.vmem [#allocation5], %s814_s28  ;;  %s707_s28 = scalar_lea.sflag [#allocation4], %s1288_s26 }
  0x43   : > { %s721_s4 = sshll.u32 %s151_s3, 4  ;;  %p1453_p9 = scmp.ne.s32.totalorder %s1449_s19, 0  ;;  %s1393_s4 = int_to_ptr.vmem [resolvable:$true] %s721_s4 }
  0xaf   : > { %v165_v2 = vpop.permute.xlu0 %164 }
  0xb0   : > { %v171_v3 = vsel %vm166_vm1, %v165_v2, 0 }
  0xb1   : > { %853 = vmatpush3.bf16.xpose.msra.mxu0 %v171_v3 }
  0xb2   : > { %870 = vmatprep.subr.bf16.mxu0 %v1147_v0 }
  0xb8   : > { %855 = vmatmul.mubr.msk.bf16.vlgmr.msra.gmra.mrb[0].mxu0 %vm166_vm1, %v1304_v1 }
  0xb9   : > { %872 = vmatprep.mubr.msk.bf16.mxu0 %vm1148_vm0, %v1147_v0 }
 0x18b   : > { %v207_v6 = vpop.f32.mrb[0].mxu0 }
 0x18c   : > { %v214_v9 = vmul.f32 0.35355338, %v207_v6  ;;  %v856_v10 = vpop.f32.mrb[1].mxu0 }
 0x18d   : > { %v210_v11 = vpop.f32.mrb[2].mxu0 }
 0x18e   : > { %v215_v12 = vmul.f32 0.35355338, %v210_v11  ;;  %v857_v13 = vpop.f32.mrb[3].mxu0  ;;  %v216_v14 = vadd.f32 %v214_v9, %v1313_v8 }
 0x190   : > { %v219_v15 = vsel %vm218_vm3, %v216_v14, -inf  ;;  %v217_v16 = vadd.f32 %v215_v12, %v1313_v8 }
 0x191   : > { %220 = vmax.xlane.f32.xlu0 %v219_v15 }
 0x192   : > { %v222_v17 = vsel %vm218_vm3, %v217_v16, -inf }
 0x193   : > { %223 = vmax.xlane.f32.xlu1 %v222_v17 }
 0x1a4   : > { %242 = vrot.lane.b32.xlu1 %v1304_v1, %s1151_s18  ;;  %s1391_s18 = scalar_lea.hbm %s1445_s1, %s835_s25 }
 0x1a7   : > { %416 = vrot.lane.b32.xlu0 %v1304_v1, %s1152_s29  ;;  %s1060_s29 = scalar_lea.vmem %s1393_s4, 128 }
 0x1a8   : > { %p1061_p8 = scmp.ne.s32.totalorder %s1393_s4, %s1060_s29 }
 0x1aa   : > { %p1062_p11 = pnand %p1061_p8, %p1453_p9 }
 0x1ac   : > { %p1063_p0 = pneg %p1062_p11 }
 0x21e   : > { %v221_v18 = vpop.xlane.xlu0 %220 }
 0x21f   : > { %v225_v19 = vsub.f32 %v216_v14, %v221_v18 }
 0x220   : > { %v224_v20 = vpop.xlane.xlu1 %223 }
 0x221   : > { %v227_v21 = vmul.f32 1.442695, %v225_v19  ;;  %v226_v22 = vsub.f32 %v217_v16, %v224_v20 }
 0x222   : > { %v417_v39 = vpop.permute.xlu0 %416 }
 0x223   : > { %998 = vpow2.f32 %v227_v21  ;;  %v229_v23 = vmul.f32 1.442695, %v226_v22  ;;  %v422_v41 = vsel %vm166_vm1, %v417_v39, 0 }
 0x224   : > { %v243_v24 = vpop.permute.xlu1 %242 }
 0x225   : > { %1000 = vpow2.f32 %v229_v23  ;;  %859 = vmatpush3.bf16.msra.mxu1 %v243_v24 }
 0x226   : > { %864 = vmatprep.subr.bf16.mxu1 %v1147_v0 }
 0x22d   : > { %v999_v25 = vpop.eup %998 }
 0x22e   : > { %v231_v26 = vsel %vm218_vm3, %v999_v25, 0.0 }
 0x22f   : > { %v1001_v27 = vpop.eup %1000  ;;  %232 = vadd.xlane.f32.xlu1 %v231_v26 }
 0x230   : > { %v234_v28 = vsel %vm218_vm3, %v1001_v27, 0.0 }
 0x233   : > { %235 = vadd.xlane.f32.xlu1 %v234_v28 }
 0x244   : > { %291 = vrot.lane.b32.xlu1 %v1304_v1, %s1153_s30  ;;  %s1164_s30 = smov [#allocation5]  }
 0x248   : > { %289 = vrot.lane.b32.xlu1 %v1304_v1, %s1154_s2  ;;  %s1064_s2 = sshll.u32 %s1164_s30, 4  ;;  %s1065_s2 = int_to_ptr.vmem [resolvable:$false] %s1064_s2 }
 0x249   : > { %p1067_p6 = scmp.lt.s32.totalorder %s1393_s4, %s1065_s2 }
 0x24c   : > { %414 = vrot.lane.b32.xlu1 %v1304_v1, %s1155_s5  ;;  %s1066_s5 = scalar_lea.vmem %s1065_s2, 256 }
 0x24d   : > { %p1068_p13 = scmp.lt.s32.totalorder %s1066_s5, %s1060_s29 }
 0x24f   : > { %p1069_p2 = por %p1068_p13, %p1067_p6 }
 0x250   : > { %541 = vrot.lane.b32.xlu1 %v1304_v1, %s1156_s12 }
 0x251   : > { %p1070_p5 = pnand %p1069_p2, %p1063_p0 }
 0x254   : > { %539 = vrot.lane.b32.xlu1 %v1304_v1, %s1157_s13 }
 0x2bc   : > { %v233_v29 = vpop.xlane.xlu1 %232 }
 0x2bd   : > { %1002 = vrcp.f32 %v233_v29 }
 0x2c0   : > { %v236_v30 = vpop.xlane.xlu1 %235 }
 0x2c1   : > { %1004 = vrcp.f32 %v236_v30 }
 0x2c4   : > { %v292_v33 = vpop.permute.xlu1 %291 }
 0x2c5   : > { %v297_v36 = vsel %vm166_vm1, %v292_v33, 0 }
 0x2c7   : > { %v1003_v31 = vpop.eup %1002 }
 0x2c8   : > { %v239_v34 = vmul.f32 %v1003_v31, %v999_v25  ;;  %v290_v38 = vpop.permute.xlu1 %289 }
 0x2cb   : > { %v1005_v32 = vpop.eup %1004 }
 0x2cc   : > { %v240_v35 = vmul.f32 %v1005_v32, %v1001_v27  ;;  %v415_v40 = vpop.permute.xlu1 %414 }
 0x2ce   : > { %v241_v37 = vpack.c.bf16 %v240_v35, %v239_v34 }
 0x2d0   : > { %861 = vmatmul.mubr.msk.bf16.vlgmr.msra.gmra.mrb[0].mxu1 %vm218_vm3, %v241_v37  ;;  %v542_v42 = vpop.permute.xlu1 %541 }
 0x2d1   : > { %865 = vmatpush3.bf16.xpose.msra.mxu1 %v297_v36  ;;  %866 = vmatprep.mubr.msk.bf16.mxu1 %vm1148_vm0, %v1147_v0  ;;  %v547_v43 = vsel %vm166_vm1, %v542_v42, 0 }
 0x2d2   : > { %876 = vmatprep.subr.bf16.mxu1 %v1147_v0 }
 0x2d4   : > { %v540_v44 = vpop.permute.xlu1 %539 }
 0x2d8   : > { %867 = vmatmul.mubr.msk.bf16.vlgmr.msra.gmra.mrb[4].mxu1 %vm166_vm1, %v290_v38 }
 0x2d9   : > { %877 = vmatpush3.bf16.xpose.msra.mxu1 %v422_v41  ;;  %878 = vmatprep.mubr.msk.bf16.mxu1 %vm1148_vm0, %v1147_v0 }
 0x2da   : > { %888 = vmatprep.subr.bf16.mxu1 %v1147_v0 }
 0x2e0   : > { %879 = vmatmul.mubr.msk.bf16.vlgmr.msra.gmra.mrb[8].mxu1 %vm166_vm1, %v415_v40 }
 0x2e1   : > { %889 = vmatpush3.bf16.xpose.msra.mxu1 %v547_v43  ;;  %890 = vmatprep.mubr.msk.bf16.mxu1 %vm1148_vm0, %v1147_v0 }
 0x2e8   : > { %891 = vmatmul.mubr.msk.bf16.vlgmr.msra.gmra.mrb[12].mxu1 %vm166_vm1, %v540_v44 }
 0x3a3   : > { %v1344_v45 = vpop.f32.mrb[0].mxu1 }
 0x3a4   : > { %v862_v46 = vpop.f32.mrb[1].mxu1 }
 0x3a5   : > { %v1346_v47 = vpop.f32.mrb[2].mxu1 }
 0x3a6   : > { %v863_v48 = vpop.f32.mrb[3].mxu1 }
 0x3ab   : > { %v333_v49 = vpop.f32.mrb[4].mxu1 }
 0x3ac   : > { %v340_v50 = vmul.f32 0.35355338, %v333_v49  ;;  %v868_v51 = vpop.f32.mrb[5].mxu1 }
 0x3ad   : > { %v336_v52 = vpop.f32.mrb[6].mxu1 }
 0x3ae   : > { %v341_v53 = vmul.f32 0.35355338, %v336_v52  ;;  %v869_v54 = vpop.f32.mrb[7].mxu1  ;;  %v342_v55 = vadd.f32 %v340_v50, %v1313_v8 }
 0x3b0   : > { %v344_v56 = vsel %vm218_vm3, %v342_v55, -inf  ;;  %v343_v57 = vadd.f32 %v341_v53, %v1313_v8 }
 0x3b1   : > { %345 = vmax.xlane.f32.xlu1 %v344_v56 }
 0x3b2   : > { %v347_v58 = vsel %vm218_vm3, %v343_v57, -inf }
 0x3b3   : > { %348 = vmax.xlane.f32.xlu0 %v347_v58  ;;  %v458_v59 = vpop.f32.mrb[8].mxu1 }
 0x3b4   : > { %v465_v60 = vmul.f32 0.35355338, %v458_v59  ;;  %v880_v61 = vpop.f32.mrb[9].mxu1 }
 0x3b5   : > { %v461_v62 = vpop.f32.mrb[10].mxu1 }
 0x3b6   : > { %v466_v63 = vmul.f32 0.35355338, %v461_v62  ;;  %v881_v2 = vpop.f32.mrb[11].mxu1  ;;  %v467_v3 = vadd.f32 %v465_v60, %v1313_v8 }
 0x3b8   : > { %v469_v4 = vsel %vm218_vm3, %v467_v3, -inf  ;;  %v468_v5 = vadd.f32 %v466_v63, %v1313_v8 }
 0x3b9   : > { %470 = vmax.xlane.f32.xlu1 %v469_v4 }
 0x3ba   : > { %v472_v6 = vsel %vm218_vm3, %v468_v5, -inf }
 0x3bb   : > { %473 = vmax.xlane.f32.xlu0 %v472_v6  ;;  %v583_v7 = vpop.f32.mrb[12].mxu1 }
 0x3bc   : > { %v590_v9 = vmul.f32 0.35355338, %v583_v7  ;;  %v892_v10 = vpop.f32.mrb[13].mxu1 }
 0x3bd   : > { %v586_v11 = vpop.f32.mrb[14].mxu1 }
 0x3be   : > { %v591_v12 = vmul.f32 0.35355338, %v586_v11  ;;  %v893_v13 = vpop.f32.mrb[15].mxu1  ;;  %v592_v14 = vadd.f32 %v590_v9, %v1313_v8 }
 0x3c0   : > { %v594_v15 = vsel %vm218_vm3, %v592_v14, -inf  ;;  %v593_v16 = vadd.f32 %v591_v12, %v1313_v8 }
 0x3c1   : > { %595 = vmax.xlane.f32.xlu1 %v594_v15 }
 0x3c2   : > { %v597_v17 = vsel %vm218_vm3, %v593_v16, -inf }
 0x3c3   : > { %598 = vmax.xlane.f32.xlu0 %v597_v17 }
 0x3d2   : > { %367 = vrot.lane.b32.xlu1 %v1304_v1, %s1158_s15 }
 0x43e   : > { %v346_v18 = vpop.xlane.xlu1 %345 }
 0x43f   : > { %v350_v19 = vsub.f32 %v342_v55, %v346_v18 }
 0x440   : > { %v349_v20 = vpop.xlane.xlu0 %348 }
 0x441   : > { %v352_v21 = vmul.f32 1.442695, %v350_v19  ;;  %v351_v22 = vsub.f32 %v343_v57, %v349_v20 }
 0x443   : > { %1006 = vpow2.f32 %v352_v21  ;;  %v354_v23 = vmul.f32 1.442695, %v351_v22 }
 0x445   : > { %1008 = vpow2.f32 %v354_v23 }
 0x446   : > { %v471_v24 = vpop.xlane.xlu1 %470 }
 0x447   : > { %v475_v25 = vsub.f32 %v467_v3, %v471_v24 }
 0x448   : > { %v474_v26 = vpop.xlane.xlu0 %473 }
 0x449   : > { %v477_v27 = vmul.f32 1.442695, %v475_v25  ;;  %v476_v8 = vsub.f32 %v468_v5, %v474_v26 }
 0x44b   : > { %1010 = vpow2.f32 %v477_v27  ;;  %v479_v28 = vmul.f32 1.442695, %v476_v8 }
 0x44d   : > { %v1007_v29 = vpop.eup %1006  ;;  %1012 = vpow2.f32 %v479_v28 }
 0x44e   : > { %v596_v30 = vpop.xlane.xlu1 %595  ;;  %v356_v31 = vsel %vm218_vm3, %v1007_v29, 0.0 }
 0x44f   : > { %v1009_v32 = vpop.eup %1008  ;;  %v600_v33 = vsub.f32 %v592_v14, %v596_v30  ;;  %357 = vadd.xlane.f32.xlu1 %v356_v31 }
 0x450   : > { %v599_v34 = vpop.xlane.xlu0 %598  ;;  %v359_v35 = vsel %vm218_vm3, %v1009_v32, 0.0 }
 0x451   : > { %v602_v36 = vmul.f32 1.442695, %v600_v33  ;;  %v601_v37 = vsub.f32 %v593_v16, %v599_v34  ;;  %360 = vadd.xlane.f32.xlu0 %v359_v35 }
 0x452   : > { %v368_v38 = vpop.permute.xlu1 %367 }
 0x453   : > { %1014 = vpow2.f32 %v602_v36  ;;  %v604_v39 = vmul.f32 1.442695, %v601_v37  ;;  %871 = vmatpush3.bf16.msra.mxu0 %v368_v38 }
 0x454   : > { %882 = vmatprep.subr.bf16.mxu0 %v1147_v0 }
 0x455   : > { %v1011_v40 = vpop.eup %1010  ;;  %1016 = vpow2.f32 %v604_v39 }
 0x456   : > { %v481_v41 = vsel %vm218_vm3, %v1011_v40, 0.0 }
 0x457   : > { %v1013_v42 = vpop.eup %1012  ;;  %482 = vadd.xlane.f32.xlu1 %v481_v41 }
 0x458   : > { %v484_v43 = vsel %vm218_vm3, %v1013_v42, 0.0 }
 0x459   : > { %485 = vadd.xlane.f32.xlu0 %v484_v43 }
 0x45d   : > { %v1015_v44 = vpop.eup %1014 }
 0x45e   : > { %v606_v46 = vsel %vm218_vm3, %v1015_v44, 0.0 }
 0x45f   : > { %v1017_v48 = vpop.eup %1016  ;;  %607 = vadd.xlane.f32.xlu1 %v606_v46 }
 0x460   : > { %v609_v49 = vsel %vm218_vm3, %v1017_v48, 0.0 }
 0x461   : > { %610 = vadd.xlane.f32.xlu0 %v609_v49 }
 0x470   : > { %617 = vrot.lane.b32.xlu1 %v1304_v1, %s1159_s16 }
 0x477   : > { %492 = vrot.lane.b32.xlu0 %v1304_v1, %s1160_s17 }
 0x4dc   : > { %v358_v50 = vpop.xlane.xlu1 %357 }
 0x4dd   : > { %1018 = vrcp.f32 %v358_v50 }
 0x4de   : > { %v361_v51 = vpop.xlane.xlu0 %360 }
 0x4df   : > { %1020 = vrcp.f32 %v361_v51 }
 0x4e4   : > { %v483_v52 = vpop.xlane.xlu1 %482 }
 0x4e5   : > { %1022 = vrcp.f32 %v483_v52 }
 0x4e6   : > { %v486_v53 = vpop.xlane.xlu0 %485 }
 0x4e7   : > { %v1019_v54 = vpop.eup %1018  ;;  %1024 = vrcp.f32 %v486_v53 }
 0x4e8   : > { %v364_v56 = vmul.f32 %v1019_v54, %v1007_v29 }
 0x4e9   : > { %v1021_v55 = vpop.eup %1020 }
 0x4ea   : > { %v365_v57 = vmul.f32 %v1021_v55, %v1009_v32 }
 0x4ec   : > { %v608_v58 = vpop.xlane.xlu1 %607  ;;  %v366_v59 = vpack.c.bf16 %v365_v57, %v364_v56 }
 0x4ed   : > { %1026 = vrcp.f32 %v608_v58 }
 0x4ee   : > { %v611_v60 = vpop.xlane.xlu0 %610  ;;  %873 = vmatmul.mubr.msk.bf16.vlgmr.msra.gmra.mrb[4].mxu0 %vm218_vm3, %v366_v59 }
 0x4ef   : > { %v1023_v61 = vpop.eup %1022  ;;  %1028 = vrcp.f32 %v611_v60  ;;  %884 = vmatprep.mubr.msk.bf16.mxu0 %vm1148_vm0, %v1147_v0 }
 0x4f0   : > { %v489_v62 = vmul.f32 %v1023_v61, %v1011_v40  ;;  %v618_v4 = vpop.permute.xlu1 %617 }
 0x4f1   : > { %v1025_v1 = vpop.eup %1024 }
 0x4f2   : > { %v490_v63 = vmul.f32 %v1025_v1, %v1013_v42  ;;  %v493_v2 = vpop.permute.xlu0 %492 }
 0x4f3   : > { %883 = vmatpush3.bf16.msra.mxu0 %v493_v2 }
 0x4f4   : > { %v491_v3 = vpack.c.bf16 %v490_v63, %v489_v62  ;;  %894 = vmatprep.subr.bf16.mxu0 %v1147_v0 }
 0x4f6   : > { %885 = vmatmul.mubr.msk.bf16.vlgmr.msra.gmra.mrb[8].mxu0 %vm218_vm3, %v491_v3 }
 0x4f7   : > { %v1027_v5 = vpop.eup %1026  ;;  %895 = vmatpush3.bf16.msra.mxu0 %v618_v4  ;;  %896 = vmatprep.mubr.msk.bf16.mxu0 %vm1148_vm0, %v1147_v0 }
 0x4f8   : > { %v614_v7 = vmul.f32 %v1027_v5, %v1015_v44 }
 0x4f9   : > { %v1029_v6 = vpop.eup %1028 }
 0x4fa   : > { %v615_v9 = vmul.f32 %v1029_v6, %v1017_v48 }
 0x4fc   : > { %v616_v10 = vpack.c.bf16 %v615_v9, %v614_v7 }
 0x4fe   : > { %897 = vmatmul.mubr.msk.bf16.vlgmr.msra.gmra.mrb[12].mxu0 %vm218_vm3, %v616_v10 }
 0x5c1   : > { %v407_v11 = vpop.f32.mrb[4].mxu0 }
 0x5c2   : > { %v874_v12 = vpop.f32.mrb[5].mxu0 }
 0x5c3   : > { %v410_v13 = vpop.f32.mrb[6].mxu0 }
 0x5c4   : > { %v982_v14 = vpack.i.bf16 %v410_v13, %v407_v11  ;;  %v875_v15 = vpop.f32.mrb[7].mxu0 }
 0x5c6   : > { %983 = vrot.lane.b32.xlu1 %v982_v14, %s1161_s22 }
 0x5c9   : > { %v532_v16 = vpop.f32.mrb[8].mxu0 }
 0x5ca   : > { %v886_v17 = vpop.f32.mrb[9].mxu0 }
 0x5cb   : > { %v535_v18 = vpop.f32.mrb[10].mxu0 }
 0x5cc   : > { %v987_v19 = vpack.i.bf16 %v535_v18, %v532_v16  ;;  %v887_v20 = vpop.f32.mrb[11].mxu0 }
 0x5ce   : > { %988 = vrot.lane.b32.xlu0 %v987_v19, %s1162_s23 }
 0x5d1   : > { %v657_v0 = vpop.f32.mrb[12].mxu0 }
 0x5d2   : > { %v898_v21 = vpop.f32.mrb[13].mxu0 }
 0x5d3   : > { %v660_v22 = vpop.f32.mrb[14].mxu0 }
 0x5d4   : > { %v992_v23 = vpack.i.bf16 %v660_v22, %v657_v0  ;;  %v899_v24 = vpop.f32.mrb[15].mxu0 }
 0x5d6   : > { %993 = vrot.lane.b32.xlu1 %v992_v23, %s1163_s24 }
 0x638   : > { %v984_v25 = vpop.permute.xlu1 %983 }
 0x639   : > { %v986_v27 = vunpack.i.h.bf16 %v984_v25  ;;  %v985_v8 = vunpack.i.l.bf16 %v984_v25 }
 0x63b   : > { %v689_v31 = vsel %vm166_vm1, %v1346_v47, %v986_v27  ;;  %v688_v32 = vsel %vm166_vm1, %v1344_v45, %v985_v8 }
 0x640   : > { %v989_v26 = vpop.permute.xlu0 %988 }
 0x641   : > { %v991_v28 = vunpack.i.h.bf16 %v989_v26  ;;  %v990_v29 = vunpack.i.l.bf16 %v989_v26 }
 0x643   : > { %v691_v35 = vsel %vm218_vm3, %v689_v31, %v991_v28  ;;  %v690_v36 = vsel %vm218_vm3, %v688_v32, %v990_v29 }
 0x648   : > { %v994_v30 = vpop.permute.xlu1 %993 }
 0x649   : > { %v996_v33 = vunpack.i.h.bf16 %v994_v30  ;;  %v995_v34 = vunpack.i.l.bf16 %v994_v30 }
 0x64b   : > { %v694_v37 = vsel %vm692_vm4, %v691_v35, %v996_v33  ;;  %v693_v38 = vsel %vm692_vm4, %v690_v36, %v995_v34 }
 0x64c   : > { %v834_v45 = vpack.c.bf16 %v694_v37, %v694_v37  ;;  %v833_v47 = vpack.c.bf16 %v693_v38, %v693_v38 }
 0x64e   : > { %705 = vst.msk [vmem:[%s151_s3 + $0x4] sm:$0xf] %vm703_vm5, %v834_v45  ;;  %704 = vst.msk [vmem:[%s151_s3] sm:$0xf] %vm703_vm5, %v833_v47 }
 0x64f   : > { %1073 = shalt.err (!%p1070_p5)
}
 0x650   : > { %s1074_s12 = scalar_lea.hbm %s1391_s18, 128  ;;  %s1078_s16 = scalar_lea.hbm %s1445_s1, 256 }
 0x651   : > { %p1075_p4 = scmp.ne.s32.totalorder %s1391_s18, %s1074_s12  ;;  %p1079_p12 = scmp.lt.u32.totalorder %s1391_s18, %s1445_s1 }
 0x652   : > { %p1080_p1 = scmp.lt.u32.totalorder %s1078_s16, %s1074_s12  ;;  %p1082_p8 = scmp.lt.u32.totalorder %s1074_s12, %s1391_s18 }
 0x653   : > { %p1076_p7 = pnand %p1075_p4, %p1453_p9 }
 0x654   : > { %p1081_p3 = por %p1080_p1, %p1079_p12 }
 0x655   : > { %p1077_p10 = pneg %p1076_p7 }
 0x656   : > { %p1083_p11 = por %p1082_p8, %p1081_p3 }
 0x658   : > { %p1084_p0 = pnand %p1083_p11, %p1077_p10 }
 0x65a   : > { %1087 = shalt.err (!%p1084_p0)
}
 0x65b   : > { %s1165_s24 = smov 4  }
 0x65c   : > { %902 = dma.vmem_to_hbm [thread:$0]  (%p1453_p9), %s1393_s4, 128, %s1391_s18, %s707_s28, %s1160_s17, %s1160_s17, %s1165_s24  }
 0x65d PF: > { %s736_s25 = sand.u32 1, %s1122_s6   ;;  %p1454_p6 = scmp.ne.s32.totalorder %s1450_s21, 0 }
 0x65e   : > { %p1455_p13 = scmp.ge.s32.totalorder %s1142_s11, 2  ;;  %s737_s3 = scalar_lea.sflag [#allocation4], %s736_s25 }
 0x660   : > { %p909_p2 = pnand %p1455_p13, %p1454_p6 }
 0x662   : > { %1117 = dma.done.wait (!%p909_p2), %s737_s3, 128  }
 0x663   : > { %1119 = vsyncadd (!%p909_p2), %s737_s3, 4294967168  ;;  %s17_s11 = sadd.s32 1, %s1142_s11   ;;  %s1456_s6 = smov %s1126_s7 }
 0x664   : > { %p14_p5 = scmp.ge.s32.totalorder %s17_s11, 4   ;;  %s1457_s7 = smov %s1130_s8 }
 0x665   : > { %s1458_s8 = smov %s1232_s20  ;;  %s1459_s9 = smov %s1138_s10 }
 0x666   : > { %s1460_s10 = smov %s1462_s14  ;;  %16 = sbr.rel (!%p14_p5) target bundleno = 6 (0x6), region = 69 }
 0x66d   :  { %742 = vsyncpa [#allocation3], 1 }
 0x66e   :  { %744 = vsyncpa [#allocation3 + $0x1], 1 }
 0x66f   :  { %745 = vsyncpa [#allocation4], 1 }
 0x670   :  { %747 = vsyncpa [#allocation4 + $0x1], 1 }

// kernel: vit_pose_forward.15
= control target key start
LH: loop header
LB: loop body
LE: loop exit
PB: predicated region body
PF: predicated region fallthrough
CT: control target
= control target key end

     0   :  { %10 = vsyncpa [#allocation3], 0  ;;  %s1267_s0 = inlined_call_operand.hbm [shape: bf16[32,32], index: 0, kind: input, shape index: {}]   ;;  %s1268_s1 = inlined_call_operand.hbm [shape: f32[1,32], index: 1, kind: input, shape index: {}]   ;;  %s1269_s2 = inlined_call_operand.hbm [shape: f32[1,32], index: 2, kind: input, shape index: {}]   ;;  %s1270_s3 = inlined_call_operand.hbm [shape: bf16[32,64], index: 3, kind: input, shape index: {}]   ;;  %s1271_s4 = inlined_call_operand.hbm [shape: f32[1,64], index: 4, kind: input, shape index: {}]   ;;  %s1272_s5 = inlined_call_operand.hbm [shape: bf16[32,64], index: 5, kind: output, shape index: {}]  }
   0x1   :  { %12 = vsyncpa [#allocation3 + $0x1], 0 }
   0x2   :  { %13 = vsyncpa [#allocation6], 0 }
   0x3   :  { %14 = vsyncpa [#allocation9], 0 }
   0x4   :  { %15 = vsyncpa [#allocation4], 0 }
   0x5   :  { %17 = vsyncpa [#allocation4 + $0x1], 0  ;;  %s982_s18 = smov 0   ;;  %s984_s19 = smov 0  }
   0x6   :  { %s986_s20 = smov 0   ;;  %s988_s21 = smov 0  }
   0x7 LB: > { %s1003_s22 = sadd.s32 4294967295, %s938_s21   ;;  %s570_s23 = sadd.s32 4294967294, %s938_s21   ;;  %s938_s21 = sphi %s988_s21, %s1295_s21   ;;  %s934_s20 = sphi %s986_s20, %s1294_s20   ;;  %s930_s19 = sphi %s984_s19, %s1293_s19   ;;  %s926_s18 = sphi %s982_s18, %s1292_s18  }
   0x8   : > { %p43_p0 = scmp.ne.s32.totalorder %s930_s19, %s926_s18  ;;  %p1273_p1 = scmp.eq.s32.totalorder %s1003_s22, 0 }
   0x9   : > { %p157_p3 = scmp.eq.s32.totalorder %s570_s23, 1  ;;  %p571_p5 = scmp.ge.s32.totalorder %s938_s21, 1 }
   0xa   : > { %p1012_p4 = por %p1273_p1, %p43_p0  ;;  %p164_p7 = scmp.lt.s32.totalorder %s938_s21, 3 }
   0xb   : > { %p1017_p6 = por %p157_p3, %p43_p0  ;;  %s940_s27 = smov [#allocation5]  }
   0xc   : > { %s1276_s24 = scalar_select %p1012_p4, 1, 0 }
   0xd   : > { %s1277_s25 = scalar_select %p1017_p6, 1, 0 }
   0xe   : > { %p1022_p8 = pnand %p571_p5, %p164_p7  ;;  %s177_s28 = sshll.u32 %s940_s27, 4  ;;  %s178_s28 = int_to_ptr.vmem [resolvable:$true] %s177_s28 }
   0xf   : > { %s941_s29 = smov [#allocation8]   ;;  %s942_s7 = smov [#allocation7]  }
  0x10   : > { %s1278_s26 = scalar_select %p1022_p8, 1, 0 }
  0x11   : > { %p639_p10 = pneg %p1022_p8  ;;  %s198_s30 = sshll.u32 %s941_s29, 4  ;;  %s1035_s30 = int_to_ptr.vmem [resolvable:$true] %s198_s30 }
  0x12   : > { %s1037_s8 = sshll.u32 %s942_s7, 4  ;;  %s722_s11 = scalar_lea.hbm %s1268_s1, 16  ;;  %s189_s8 = int_to_ptr.vmem [resolvable:$true] %s1037_s8 }
  0x13   : > { %p1031_p11 = pnand %p639_p10, %p1273_p1  ;;  %p723_p12 = scmp.ne.s32.totalorder %s1268_s1, %s722_s11 }
  0x14   : > { %p729_p5 = scmp.lt.u32.totalorder %s722_s11, %s1268_s1 }
  0x15   : > { %p1047_p13 = pneg %p1031_p11 }
  0x17   : > { %p725_p0 = pnand %p1047_p13, %p723_p12 }
  0x19   : > { %p726_p3 = pneg %p725_p0 }
  0x1b   : > { %p731_p7 = pnand %p729_p5, %p726_p3 }
  0x1d   : > { %734 = shalt.err (!%p731_p7)
}
  0x1e   : > { %s735_s17 = scalar_lea.vmem %s178_s28, 16  ;;  %s742_s23 = scalar_lea.vmem %s178_s28, 32 }
  0x1f   : > { %p736_p10 = scmp.ne.s32.totalorder %s178_s28, %s735_s17  ;;  %p743_p2 = scmp.lt.s32.totalorder %s178_s28, %s178_s28 }
  0x20   : > { %p744_p6 = scmp.lt.s32.totalorder %s742_s23, %s735_s17 }
  0x21   : > { %p738_p9 = pnand %p736_p10, %p1047_p13 }
  0x22   : > { %p745_p4 = por %p744_p6, %p743_p2 }
  0x23   : > { %p739_p1 = pneg %p738_p9 }
  0x25   : > { %p746_p8 = pnand %p745_p4, %p739_p1 }
  0x27   : > { %749 = shalt.err (!%p746_p8)
}
  0x28   : > { %642 = dma.hbm_to_vmem [thread:$0]  (!%p1031_p11), %s1268_s1, 16, %s178_s28, [#allocation6]  }
  0x29   : > { %s750_s10 = scalar_lea.hbm %s1270_s3, 256 }
  0x2a   : > { %p751_p9 = scmp.ne.s32.totalorder %s1270_s3, %s750_s10  ;;  %p757_p1 = scmp.lt.u32.totalorder %s750_s10, %s1270_s3 }
  0x2c   : > { %p753_p12 = pnand %p751_p9, %p1047_p13 }
  0x2e   : > { %p754_p2 = pneg %p753_p12 }
  0x30   : > { %p759_p4 = pnand %p757_p1, %p754_p2 }
  0x32   : > { %762 = shalt.err (!%p759_p4)
}
  0x33   : > { %s763_s28 = scalar_lea.vmem %s1035_s30, 256  ;;  %p771_p3 = scmp.lt.s32.totalorder %s1035_s30, %s1035_s30 }
  0x34   : > { %p764_p6 = scmp.ne.s32.totalorder %s1035_s30, %s763_s28  ;;  %p772_p5 = scmp.lt.s32.totalorder %s763_s28, %s763_s28 }
  0x36   : > { %p766_p8 = pnand %p764_p6, %p1047_p13  ;;  %p773_p7 = por %p772_p5, %p771_p3 }
  0x38   : > { %p767_p0 = pneg %p766_p8 }
  0x3a   : > { %p774_p10 = pnand %p773_p7, %p767_p0 }
  0x3c   : > { %777 = shalt.err (!%p774_p10)
}
  0x3d   : > { %s943_s16 = smov 64   ;;  %s944_s17 = smov 4  }
  0x3e   : > { %648 = dma.hbm_to_vmem [thread:$0]  (!%p1031_p11), %s1270_s3, 256, %s1035_s30, [#allocation9], %s943_s16, %s943_s16, %s944_s17  }
  0x3f   : > { %s778_s9 = scalar_lea.hbm %s1269_s2, 16 }
  0x40   : > { %p779_p9 = scmp.ne.s32.totalorder %s1269_s2, %s778_s9  ;;  %p785_p1 = scmp.lt.u32.totalorder %s778_s9, %s1269_s2 }
  0x42   : > { %p781_p12 = pnand %p779_p9, %p1047_p13 }
  0x44   : > { %p782_p2 = pneg %p781_p12 }
  0x46   : > { %p787_p4 = pnand %p785_p1, %p782_p2 }
  0x48   : > { %790 = shalt.err (!%p787_p4)
}
  0x49   : > { %s791_s15 = scalar_lea.vmem %s189_s8, 16  ;;  %s798_s30 = scalar_lea.vmem %s189_s8, 32 }
  0x4a   : > { %p792_p6 = scmp.ne.s32.totalorder %s189_s8, %s791_s15  ;;  %p799_p3 = scmp.lt.s32.totalorder %s189_s8, %s189_s8 }
  0x4b   : > { %p800_p5 = scmp.lt.s32.totalorder %s798_s30, %s791_s15 }
  0x4c   : > { %p794_p8 = pnand %p792_p6, %p1047_p13 }
  0x4d   : > { %p801_p7 = por %p800_p5, %p799_p3 }
  0x4e   : > { %p795_p0 = pneg %p794_p8 }
  0x50   : > { %p802_p10 = pnand %p801_p7, %p795_p0 }
  0x52   : > { %805 = shalt.err (!%p802_p10)
}
  0x53   : > { %645 = dma.hbm_to_vmem [thread:$0]  (!%p1031_p11), %s1269_s2, 16, %s189_s8, [#allocation6]  }
  0x54   : > { %s945_s27 = smov [#allocation10]   ;;  %s806_s10 = scalar_lea.hbm %s1271_s4, 16 }
  0x55   : > { %s212_s29 = sshll.u32 %s945_s27, 4  ;;  %p807_p9 = scmp.ne.s32.totalorder %s1271_s4, %s806_s10  ;;  %s213_s29 = int_to_ptr.vmem [resolvable:$true] %s212_s29 }
  0x56   : > { %p813_p1 = scmp.lt.u32.totalorder %s806_s10, %s1271_s4 }
  0x57   : > { %p809_p12 = pnand %p807_p9, %p1047_p13 }
  0x59   : > { %p810_p2 = pneg %p809_p12 }
  0x5b   : > { %p815_p4 = pnand %p813_p1, %p810_p2 }
  0x5d   : > { %818 = shalt.err (!%p815_p4)
}
  0x5e   : > { %s819_s8 = scalar_lea.vmem %s213_s29, 16  ;;  %s826_s30 = scalar_lea.vmem %s213_s29, 32 }
  0x5f   : > { %p820_p6 = scmp.ne.s32.totalorder %s213_s29, %s819_s8  ;;  %p827_p3 = scmp.lt.s32.totalorder %s213_s29, %s213_s29 }
  0x60   : > { %p828_p5 = scmp.lt.s32.totalorder %s826_s30, %s819_s8 }
  0x61   : > { %p822_p8 = pnand %p820_p6, %p1047_p13 }
  0x62   : > { %p829_p7 = por %p828_p5, %p827_p3 }
  0x63   : > { %p823_p0 = pneg %p822_p8 }
  0x65   : > { %p830_p10 = pnand %p829_p7, %p823_p0 }
  0x67   : > { %833 = shalt.err (!%p830_p10)
}
  0x68   : > { %651 = dma.hbm_to_vmem [thread:$0]  (!%p1031_p11), %s1271_s4, 16, %s213_s29, [#allocation9]  }
  0x69   : > { %s1127_s14 = sadd.s32 1, %s938_s21   ;;  %s30_s27 = sadd.s32 1, %s934_s20 }
  0x6a   : > { %s27_s6 = ssub.s32 %s938_s21, %s1127_s14  ;;  %p37_p13 = scmp.ne.s32.totalorder %s934_s20, %s930_s19 }
  0x6b   : > { %p28_p9 = scmp.eq.s32.totalorder %s27_s6, 0  ;;  %p38_p12 = scmp.eq.s32.totalorder %s938_s21, 0 }
  0x6c   : > { %p1281_p2 = scmp.eq.s32.totalorder %s1003_s22, 1  ;;  %p664_p4 = scmp.lt.s32.totalorder %s938_s21, 2 }
  0x6d   : > { %s1143_s9 = scalar_select %p28_p9, %s934_s20, %s30_s27  }
  0x6e   : > { %p1137_p1 = por %p1281_p2, %p37_p13  ;;  %p39_p6 = por %p38_p12, %p37_p13 }
  0x6f   : > { %s223_s10 = sand.u32 1, %s934_s20   ;;  %s600_s29 = sshll.u32 %s938_s21, 7 }
  0x70   : > { %s577_s11 = sshll.u32 %s223_s10, 3  ;;  %s1150_s15 = scalar_lea.hbm %s1267_s0, %s600_s29 }
  0x71   : > { %s227_s8 = scalar_lea.vmem [#allocation2], %s577_s11  ;;  %p1154_p11 = pnand %p664_p4, %p39_p6 }
  0x72   : > { %s234_s30 = sshll.u32 %s227_s8, 4  ;;  %s1158_s23 = scalar_lea.sflag [#allocation3], %s223_s10  ;;  %s1152_s30 = int_to_ptr.vmem [resolvable:$true] %s234_s30 }
  0x73   : > { %s834_s27 = scalar_lea.hbm %s1150_s15, 128  ;;  %p836_p0 = pneg %p1154_p11 }
  0x74   : > { %p835_p8 = scmp.ne.s32.totalorder %s1150_s15, %s834_s27  ;;  %s839_s29 = scalar_lea.hbm %s1267_s0, 256 }
  0x75   : > { %p840_p7 = scmp.lt.u32.totalorder %s1150_s15, %s1267_s0  ;;  %p841_p10 = scmp.lt.u32.totalorder %s839_s29, %s834_s27 }
  0x76   : > { %p837_p3 = pnand %p836_p0, %p835_p8  ;;  %p843_p9 = scmp.lt.u32.totalorder %s834_s27, %s1150_s15 }
  0x77   : > { %p842_p13 = por %p841_p10, %p840_p7 }
  0x78   : > { %p838_p5 = pneg %p837_p3 }
  0x79   : > { %p844_p12 = por %p843_p9, %p842_p13 }
  0x7b   : > { %p845_p2 = pnand %p844_p12, %p838_p5 }
  0x7d   : > { %848 = shalt.err (!%p845_p2)
}
  0x7e   : > { %s849_s10 = scalar_lea.vmem %s1152_s30, 128  ;;  %s946_s8 = smov [#allocation2]  }
  0x7f   : > { %p850_p4 = scmp.ne.s32.totalorder %s1152_s30, %s849_s10  ;;  %s854_s6 = sshll.u32 %s946_s8, 4  ;;  %s855_s6 = int_to_ptr.vmem [resolvable:$false] %s854_s6 }
  0x80   : > { %s856_s11 = scalar_lea.vmem %s855_s6, 256  ;;  %p857_p3 = scmp.lt.s32.totalorder %s1152_s30, %s855_s6 }
  0x81   : > { %p852_p6 = pnand %p850_p4, %p836_p0  ;;  %p858_p7 = scmp.lt.s32.totalorder %s856_s11, %s849_s10 }
  0x83   : > { %p853_p8 = pneg %p852_p6  ;;  %p859_p10 = por %p858_p7, %p857_p3 }
  0x85   : > { %p860_p13 = pnand %p859_p10, %p853_p8 }
  0x87   : > { %863 = shalt.err (!%p860_p13)
}
  0x88   : > { %655 = dma.hbm_to_vmem [thread:$0]  (!%p1154_p11), %s1150_s15, 128, %s1152_s30, %s1158_s23, %s943_s16, %s943_s16, %s944_s17  }
  0x89   : > { %p1284_p0 = scmp.ne.s32.totalorder %s1278_s26, 0 }
  0x8a   : > { %s1192_s27 = sand.u32 (!%p1284_p0), 1, %s930_s19   ;;  %p1285_p5 = scmp.ne.s32.totalorder (!%p1284_p0), %s1276_s24, 0 }
  0x8b   : > { %246 = sbr.rel (%p1284_p0) target bundleno = 736 (0x2e0), region = 40  ;;  %s581_s29 = sshll.u32 (!%p1284_p0), %s1192_s27, 3 }
  0x8c   : > { %s249_s12 = scalar_lea.sflag (!%p1284_p0), [#allocation3], %s1192_s27  ;;  %s252_s28 = scalar_lea.vmem (!%p1284_p0), [#allocation2], %s581_s29 }
  0x92   : > { %909 = dma.done.wait (%p1285_p5), %s249_s12, 128  }
  0x93   : > { %911 = vsyncadd (%p1285_p5), %s249_s12, 4294967168  ;;  %p1286_p11 = scmp.eq.s32.totalorder %s1003_s22, 0 }
  0x95   : > { %913 = dma.done.wait (%p1286_p11), [#allocation6], 32   ;;  %p1287_p9 = pmov %p1286_p11 }
  0x97   : > { %915 = vsyncadd (%p1287_p9), [#allocation6], 4294967264  ;;  %p1288_p12 = pmov %p1287_p9 }
  0x98   : > { %p1289_p2 = pmov %p1287_p9 }
  0x99   : > { %917 = dma.done.wait (%p1288_p12), [#allocation9], 272  }
  0x9a   : > { %919 = vsyncadd (%p1289_p2), [#allocation9], 4294967024  ;;  %v605_v0 = vld [vmem:[%s252_s28] sm:$0xff]   ;;  %vm302_vm0 = vcmask 261120   ;;  %v712_v15 = vld [vmem:[#allocation8] sm:$0xff]   ;;  %v947_v16 = vmov 0.0  }
  0x9b   : > { %v606_v1 = vunpack.c.l.bf16 %v605_v0  ;;  %v607_v2 = vunpack.c.h.bf16 %v605_v0  ;;  %611 = vmatprep.subr.bf16.mxu0 %v947_v16  ;;  %v713_v17 = vld [vmem:[#allocation8 + $0x8] sm:$0xff]   ;;  %vm948_vm1 = vmmov 0   ;;  %v587_v26 = vld [vmem:[#allocation5] ss:$0 sm:$0xff]  ;;  %v588_v30 = vld [vmem:[#allocation7] ss:$0 sm:$0xff] }
  0x9c   : > { %612 = vmatpush3.bf16.msra.mxu0 %v712_v15  ;;  %615 = vmatprep.mubr.msk.bf16.mxu0 %vm948_vm1, %v947_v16  ;;  %v589_v35 = vld [vmem:[#allocation10] ss:$0 sm:$0xff]  ;;  %s603_s24 = sshll.u32 %s1003_s22, 7  ;;  %s294_s26 = scalar_lea.vmem [#allocation11], %s581_s29  ;;  %vm442_vm2 = vcmask 519168  }
  0x9d   : > { %v303_v3 = vsel %vm302_vm0, %v606_v1, 0.0  ;;  %v306_v4 = vsel %vm302_vm0, %v607_v2, 0.0  ;;  %613 = vmatprep.subr.bf16.mxu0 %v947_v16  ;;  %s459_s16 = sshll.u32 %s294_s26, 4  ;;  %s1221_s30 = scalar_lea.hbm %s1272_s5, %s603_s24  ;;  %s1223_s16 = int_to_ptr.vmem [resolvable:$true] %s459_s16 }
  0x9e   : > { %304 = vadd.xlane.f32.xlu0 %v303_v3  ;;  %s446_s22 = scalar_lea.sflag [#allocation4], %s1192_s27  ;;  %s864_s23 = scalar_lea.vmem %s1223_s16, 128 }
  0x9f   : > { %p865_p4 = scmp.ne.s32.totalorder %s1223_s16, %s864_s23  ;;  %s949_s13 = smov [#allocation11]  }
  0xa0   : > { %614 = vmatpush3.bf16.msra.mxu0 %v713_v17  ;;  %s868_s10 = sshll.u32 %s949_s13, 4  ;;  %s869_s10 = int_to_ptr.vmem [resolvable:$false] %s868_s10 }
  0xa1   : > { %p866_p6 = pnand %p865_p4, %p1137_p1  ;;  %s870_s8 = scalar_lea.vmem %s869_s10, 256 }
  0xa2   : > { %307 = vadd.xlane.f32.xlu0 %v306_v4  ;;  %p871_p3 = scmp.lt.s32.totalorder %s1223_s16, %s869_s10  ;;  %p872_p7 = scmp.lt.s32.totalorder %s870_s8, %s864_s23 }
  0xa3   : > { %p867_p8 = pneg %p866_p6 }
  0xa4   : > { %p873_p10 = por %p872_p7, %p871_p3 }
  0xa6   : > { %p874_p13 = pnand %p873_p10, %p867_p8 }
 0x12b   : > { %v305_v5 = vpop.xlane.xlu0 %304 }
 0x12c   : > { %v310_v6 = vmul.f32 0.03125, %v305_v5 }
 0x12e   : > { %v312_v7 = vsub.f32 %v606_v1, %v310_v6 }
 0x12f   : > { %v308_v8 = vpop.xlane.xlu0 %307 }
 0x130   : > { %v311_v9 = vmul.f32 0.03125, %v308_v8  ;;  %v314_v10 = vmul.f32 %v312_v7, %v312_v7 }
 0x132   : > { %v313_v11 = vsub.f32 %v607_v2, %v311_v9  ;;  %v316_v12 = vsel %vm302_vm0, %v314_v10, 0.0 }
 0x133   : > { %317 = vadd.xlane.f32.xlu1 %v316_v12 }
 0x134   : > { %v315_v13 = vmul.f32 %v313_v11, %v313_v11 }
 0x136   : > { %v319_v14 = vsel %vm302_vm0, %v315_v13, 0.0 }
 0x137   : > { %320 = vadd.xlane.f32.xlu1 %v319_v14 }
 0x1c0   : > { %v318_v18 = vpop.xlane.xlu1 %317 }
 0x1c1   : > { %v322_v19 = vmul.f32 0.03125, %v318_v18 }
 0x1c3   : > { %v324_v20 = vadd.f32 1e-12, %v322_v19 }
 0x1c4   : > { %v321_v21 = vpop.xlane.xlu1 %320 }
 0x1c5   : > { %714 = vrsqrt.f32 %v324_v20  ;;  %v323_v22 = vmul.f32 0.03125, %v321_v21 }
 0x1c7   : > { %v325_v23 = vadd.f32 1e-12, %v323_v22 }
 0x1c9   : > { %716 = vrsqrt.f32 %v325_v23 }
 0x1cf   : > { %v715_v24 = vpop.eup %714 }
 0x1d0   : > { %v328_v25 = vmul.f32 %v715_v24, %v312_v7 }
 0x1d2   : > { %v337_v29 = vmul.f32 %v587_v26, %v328_v25 }
 0x1d3   : > { %v717_v27 = vpop.eup %716 }
 0x1d4   : > { %v329_v28 = vmul.f32 %v717_v27, %v313_v11  ;;  %v346_v32 = vadd.f32 %v588_v30, %v337_v29 }
 0x1d6   : > { %v338_v31 = vmul.f32 %v587_v26, %v329_v28 }
 0x1d8   : > { %v347_v33 = vadd.f32 %v588_v30, %v338_v31 }
 0x1da   : > { %v348_v34 = vpack.c.bf16 %v347_v33, %v346_v32 }
 0x1dc   : > { %616 = vmatmul.mubr.msk.bf16.vlgmr.msra.gmra.mrb[0].mxu0 %vm302_vm0, %v348_v34 }
 0x2af   : > { %v409_v36 = vpop.f32.mrb[0].mxu0 }
 0x2b0   : > { %v410_v37 = vadd.f32 %v589_v35, %v409_v36  ;;  %v617_v38 = vpop.f32.mrb[1].mxu0 }
 0x2b1   : > { %v412_v39 = vpop.f32.mrb[2].mxu0 }
 0x2b2   : > { %v416_v40 = vmul.f32 %v410_v37, %v410_v37  ;;  %v413_v41 = vadd.f32 %v589_v35, %v412_v39  ;;  %v618_v42 = vpop.f32.mrb[3].mxu0 }
 0x2b4   : > { %v418_v43 = vmul.f32 %v416_v40, %v410_v37  ;;  %v417_v44 = vmul.f32 %v413_v41, %v413_v41 }
 0x2b6   : > { %v420_v45 = vmul.f32 0.044715, %v418_v43  ;;  %v419_v46 = vmul.f32 %v417_v44, %v413_v41 }
 0x2b8   : > { %v422_v47 = vadd.f32 %v420_v45, %v410_v37  ;;  %v421_v48 = vmul.f32 0.044715, %v419_v46 }
 0x2ba   : > { %v424_v49 = vmul.f32 0.7978846, %v422_v47  ;;  %v423_v50 = vadd.f32 %v421_v48, %v413_v41 }
 0x2bc   : > { %718 = vtanh.f32 %v424_v49  ;;  %v425_v51 = vmul.f32 0.7978846, %v423_v50 }
 0x2be   : > { %720 = vtanh.f32 %v425_v51 }
 0x2c6   : > { %v719_v52 = vpop.eup %718 }
 0x2c7   : > { %v428_v53 = vadd.f32 1.0, %v719_v52 }
 0x2c8   : > { %v721_v54 = vpop.eup %720 }
 0x2c9   : > { %v430_v55 = vmul.f32 0.5, %v428_v53  ;;  %v429_v56 = vadd.f32 1.0, %v721_v54 }
 0x2cb   : > { %v432_v57 = vmul.f32 %v430_v55, %v410_v37  ;;  %v431_v58 = vmul.f32 0.5, %v429_v56 }
 0x2cd   : > { %v601_v59 = vpack.c.bf16 %v432_v57, %v432_v57  ;;  %v433_v60 = vmul.f32 %v431_v58, %v413_v41 }
 0x2cf   : > { %v602_v61 = vpack.c.bf16 %v433_v60, %v433_v60  ;;  %443 = vst.msk [vmem:[%s294_s26] sm:$0xf] %vm442_vm2, %v601_v59 }
 0x2d1   : > { %444 = vst.msk [vmem:[%s294_s26 + $0x4] sm:$0xf] %vm442_vm2, %v602_v61 }
 0x2d2   : > { %877 = shalt.err (!%p874_p13)
}
 0x2d3   : > { %s878_s6 = scalar_lea.hbm %s1221_s30, 128  ;;  %s882_s12 = scalar_lea.hbm %s1272_s5, 256 }
 0x2d4   : > { %p879_p0 = scmp.ne.s32.totalorder %s1221_s30, %s878_s6  ;;  %p883_p9 = scmp.lt.u32.totalorder %s1221_s30, %s1272_s5 }
 0x2d5   : > { %p884_p12 = scmp.lt.u32.totalorder %s882_s12, %s878_s6  ;;  %p886_p4 = scmp.lt.u32.totalorder %s878_s6, %s1221_s30 }
 0x2d6   : > { %p880_p5 = pnand %p879_p0, %p1137_p1 }
 0x2d7   : > { %p885_p2 = por %p884_p12, %p883_p9 }
 0x2d8   : > { %p881_p11 = pneg %p880_p5 }
 0x2d9   : > { %p887_p6 = por %p886_p4, %p885_p2 }
 0x2db   : > { %p888_p8 = pnand %p887_p6, %p881_p11 }
 0x2dd   : > { %891 = shalt.err (!%p888_p8)
}
 0x2de   : > { %s950_s26 = smov 64   ;;  %s951_s17 = smov 4  }
 0x2df   : > { %637 = dma.vmem_to_hbm [thread:$0]  (%p1137_p1), %s1223_s16, 128, %s1221_s30, %s446_s22, %s950_s26, %s950_s26, %s951_s17  }
 0x2e0 PF: > { %s474_s15 = sand.u32 1, %s926_s18   ;;  %p1290_p3 = scmp.ne.s32.totalorder %s1277_s25, 0 }
 0x2e1   : > { %p1291_p7 = scmp.ge.s32.totalorder %s938_s21, 2  ;;  %s475_s23 = scalar_lea.sflag [#allocation4], %s474_s15 }
 0x2e3   : > { %p657_p10 = pnand %p1291_p7, %p1290_p3 }
 0x2e5   : > { %921 = dma.done.wait (!%p657_p10), %s475_s23, 128  }
 0x2e6   : > { %923 = vsyncadd (!%p657_p10), %s475_s23, 4294967168  ;;  %p20_p13 = scmp.ge.s32.totalorder %s1127_s14, 4   ;;  %s1292_s18 = smov %s930_s19 }
 0x2e7   : > { %s1293_s19 = smov %s934_s20  ;;  %s1294_s20 = smov %s1143_s9 }
 0x2e8   : > { %s1295_s21 = smov %s1127_s14  ;;  %22 = sbr.rel (!%p20_p13) target bundleno = 7 (0x7), region = 101 }
 0x2ef   :  { %480 = vsyncpa [#allocation3], 1 }
 0x2f0   :  { %482 = vsyncpa [#allocation3 + $0x1], 1 }
 0x2f1   :  { %483 = vsyncpa [#allocation6], 1 }
 0x2f2   :  { %484 = vsyncpa [#allocation9], 1 }
 0x2f3   :  { %485 = vsyncpa [#allocation4], 1 }
 0x2f4   :  { %487 = vsyncpa [#allocation4 + $0x1], 1 }

// kernel: vit_pose_forward.16
= control target key start
LH: loop header
LB: loop body
LE: loop exit
PB: predicated region body
PF: predicated region fallthrough
CT: control target
= control target key end

     0   :  { %s1186_s0 = inlined_call_operand.hbm [shape: bf16[32,64], index: 0, kind: input, shape index: {}]   ;;  %s1187_s1 = inlined_call_operand.hbm [shape: bf16[64,32], index: 1, kind: input, shape index: {}]   ;;  %s1188_s2 = inlined_call_operand.hbm [shape: f32[1,32], index: 2, kind: input, shape index: {}]   ;;  %s1189_s3 = inlined_call_operand.hbm [shape: bf16[32,32], index: 3, kind: input, shape index: {}, may-alias: {3,4}]   ;;  %s1190_s4 = inlined_call_operand.hbm [shape: bf16[32,32], index: 4, kind: output, shape index: {}, may-alias: {3,4}]  }
   0x1   :  { %1199 = sst [smem:[#allocation15_spill]] %s1186_s0 }
   0x2   :  { %1200 = sst [smem:[#allocation16_spill]] %s1187_s1 }
   0x3   :  { %1201 = sst [smem:[#allocation17_spill]] %s1188_s2 }
   0x4   :  { %9 = vsyncpa [#allocation3], 0 }
   0x5   :  { %11 = vsyncpa [#allocation3 + $0x1], 0 }
   0x6   :  { %12 = vsyncpa [#allocation6], 0 }
   0x7   :  { %13 = vsyncpa [#allocation9], 0 }
   0x8   :  { %15 = vsyncpa [#allocation9 + $0x1], 0 }
   0x9   :  { %16 = vsyncpa [#allocation4], 0 }
   0xa   :  { %18 = vsyncpa [#allocation4 + $0x1], 0  ;;  %s892_s15 = smov 0   ;;  %s894_s16 = smov 0  }
   0xb   :  { %s896_s17 = smov 0   ;;  %s898_s18 = smov 0  }
   0xc LB: > { %s913_s19 = sadd.s32 4294967295, %s854_s18   ;;  %s524_s20 = sadd.s32 4294967294, %s854_s18   ;;  %s854_s18 = sphi %s898_s18, %s1224_s18   ;;  %s850_s17 = sphi %s896_s17, %s1223_s17   ;;  %s846_s16 = sphi %s894_s16, %s1222_s16   ;;  %s842_s15 = sphi %s892_s15, %s1221_s15  }
   0xd   : > { %p44_p0 = scmp.ne.s32.totalorder %s846_s16, %s842_s15  ;;  %p1191_p1 = scmp.eq.s32.totalorder %s913_s19, 0 }
   0xe   : > { %p142_p3 = scmp.eq.s32.totalorder %s524_s20, 1  ;;  %p525_p5 = scmp.ge.s32.totalorder %s854_s18, 1 }
   0xf   : > { %p922_p4 = por %p1191_p1, %p44_p0  ;;  %p149_p7 = scmp.lt.s32.totalorder %s854_s18, 3 }
  0x10   : > { %p927_p6 = por %p142_p3, %p44_p0  ;;  %s856_s24 = smov [#allocation5]  }
  0x11   : > { %s1202_s21 = scalar_select %p922_p4, 1, 0 }
  0x12   : > { %s1203_s22 = scalar_select %p927_p6, 1, 0 }
  0x13   : > { %p932_p8 = pnand %p525_p5, %p149_p7  ;;  %s161_s25 = sshll.u32 %s856_s24, 4  ;;  %s936_s25 = int_to_ptr.vmem [resolvable:$true] %s161_s25 }
  0x14   : > { %s857_s27 = smov [#allocation7]   ;;  %s1206_s1 = sld [smem:[#allocation16_spill]] }
  0x15   : > { %p595_p9 = pneg %p932_p8  ;;  %s175_s28 = sshll.u32 %s857_s27, 4  ;;  %s947_s28 = int_to_ptr.vmem [resolvable:$true] %s175_s28 }
  0x17   : > { %p943_p11 = pnand %p595_p9, %p1191_p1 }
  0x19   : > { %p666_p13 = pneg %p943_p11 }
  0x1a   : > { %s664_s5 = scalar_lea.hbm %s1206_s1, 512 }
  0x1b   : > { %p665_p12 = scmp.ne.s32.totalorder %s1206_s1, %s664_s5  ;;  %p671_p5 = scmp.lt.u32.totalorder %s664_s5, %s1206_s1 }
  0x1d   : > { %p667_p0 = pnand %p666_p13, %p665_p12 }
  0x1f   : > { %p668_p3 = pneg %p667_p0 }
  0x21   : > { %p673_p7 = pnand %p671_p5, %p668_p3 }
  0x23   : > { %676 = shalt.err (!%p673_p7)
}
  0x24   : > { %s677_s10 = scalar_lea.vmem %s936_s25, 512  ;;  %p685_p2 = scmp.lt.s32.totalorder %s936_s25, %s936_s25 }
  0x25   : > { %p678_p9 = scmp.ne.s32.totalorder %s936_s25, %s677_s10  ;;  %p686_p12 = scmp.lt.s32.totalorder %s677_s10, %s677_s10 }
  0x27   : > { %p680_p10 = pnand %p678_p9, %p666_p13  ;;  %p687_p0 = por %p686_p12, %p685_p2 }
  0x29   : > { %p681_p1 = pneg %p680_p10 }
  0x2b   : > { %p688_p6 = pnand %p687_p0, %p681_p1 }
  0x2d   : > { %691 = shalt.err (!%p688_p6)
}
  0x2e   : > { %s1193_s11 = smov 64   ;;  %s1195_s12 = smov 4  }
  0x2f   : > { %598 = dma.hbm_to_vmem [thread:$0]  (!%p943_p11), %s1206_s1, 512, %s936_s25, [#allocation6], %s1193_s11, %s1193_s11, %s1195_s12  }
  0x30   : > { %s1207_s2 = sld [smem:[#allocation17_spill]] }
  0x36   : > { %s692_s27 = scalar_lea.hbm %s1207_s2, 16 }
  0x37   : > { %p693_p1 = scmp.ne.s32.totalorder %s1207_s2, %s692_s27  ;;  %p699_p10 = scmp.lt.u32.totalorder %s692_s27, %s1207_s2 }
  0x39   : > { %p695_p2 = pnand %p693_p1, %p666_p13 }
  0x3b   : > { %p696_p6 = pneg %p695_p2 }
  0x3d   : > { %p701_p3 = pnand %p699_p10, %p696_p6 }
  0x3f   : > { %704 = shalt.err (!%p701_p3)
}
  0x40   : > { %s705_s25 = scalar_lea.vmem %s947_s28, 16  ;;  %s712_s7 = scalar_lea.vmem %s947_s28, 32 }
  0x41   : > { %p706_p5 = scmp.ne.s32.totalorder %s947_s28, %s705_s25  ;;  %p713_p12 = scmp.lt.s32.totalorder %s947_s28, %s947_s28 }
  0x42   : > { %p714_p0 = scmp.lt.s32.totalorder %s712_s7, %s705_s25 }
  0x43   : > { %p708_p7 = pnand %p706_p5, %p666_p13 }
  0x44   : > { %p715_p1 = por %p714_p0, %p713_p12 }
  0x45   : > { %p709_p9 = pneg %p708_p7 }
  0x47   : > { %p716_p2 = pnand %p715_p1, %p709_p9 }
  0x49   : > { %719 = shalt.err (!%p716_p2)
}
  0x4a   : > { %601 = dma.hbm_to_vmem [thread:$0]  (!%p943_p11), %s1207_s2, 16, %s947_s28, [#allocation6]  }
  0x4b   : > { %s1006_s10 = sadd.s32 1, %s854_s18   ;;  %s31_s26 = sadd.s32 1, %s850_s17 }
  0x4c   : > { %s28_s13 = ssub.s32 %s854_s18, %s1006_s10  ;;  %p38_p13 = scmp.ne.s32.totalorder %s850_s17, %s846_s16 }
  0x4d   : > { %p29_p6 = scmp.eq.s32.totalorder %s28_s13, 0  ;;  %p39_p10 = scmp.eq.s32.totalorder %s854_s18, 0 }
  0x4e   : > { %p1208_p3 = scmp.eq.s32.totalorder %s913_s19, 1  ;;  %p615_p7 = scmp.lt.s32.totalorder %s854_s18, 2 }
  0x4f   : > { %s1022_s20 = scalar_select %p29_p6, %s850_s17, %s31_s26  }
  0x50   : > { %p1016_p5 = por %p1208_p3, %p38_p13  ;;  %p40_p9 = por %p39_p10, %p38_p13 }
  0x51   : > { %s1025_s24 = sand.u32 1, %s850_s17   ;;  %s555_s27 = sshll.u32 %s854_s18, 7 }
  0x52   : > { %s1209_s14 = scalar_select %p1016_p5, 1, 0 }
  0x53   : > { %s1192_s28 = sshll.u32 %s1025_s24, 3  ;;  %s1210_s0 = sld [smem:[#allocation15_spill]] }
  0x54   : > { %s190_s6 = scalar_lea.vmem [#allocation2], %s1192_s28  ;;  %p1038_p11 = pnand %p615_p7, %p40_p9 }
  0x55   : > { %s197_s25 = sshll.u32 %s190_s6, 4  ;;  %s1045_s26 = scalar_lea.hbm %s1189_s3, %s555_s27  ;;  %s1036_s25 = int_to_ptr.vmem [resolvable:$true] %s197_s25 }
  0x56   : > { %s187_s13 = scalar_lea.sflag [#allocation3], %s1025_s24  ;;  %p722_p0 = pneg %p1038_p11 }
  0x59   : > { %s1032_s5 = scalar_lea.hbm %s1210_s0, %s555_s27  ;;  %s725_s28 = scalar_lea.hbm %s1210_s0, 256 }
  0x5a   : > { %s720_s29 = scalar_lea.hbm %s1032_s5, 128  ;;  %p726_p13 = scmp.lt.u32.totalorder %s1032_s5, %s1210_s0 }
  0x5b   : > { %p721_p12 = scmp.ne.s32.totalorder %s1032_s5, %s720_s29  ;;  %p727_p6 = scmp.lt.u32.totalorder %s725_s28, %s720_s29 }
  0x5c   : > { %p729_p3 = scmp.lt.u32.totalorder %s720_s29, %s1032_s5 }
  0x5d   : > { %p723_p1 = pnand %p722_p0, %p721_p12  ;;  %p728_p10 = por %p727_p6, %p726_p13 }
  0x5f   : > { %p724_p2 = pneg %p723_p1  ;;  %p730_p7 = por %p729_p3, %p728_p10 }
  0x61   : > { %p731_p9 = pnand %p730_p7, %p724_p2 }
  0x63   : > { %734 = shalt.err (!%p731_p9)
}
  0x64   : > { %s735_s27 = scalar_lea.vmem %s1036_s25, 128  ;;  %s860_s8 = smov [#allocation2]  }
  0x65   : > { %p736_p12 = scmp.ne.s32.totalorder %s1036_s25, %s735_s27  ;;  %s740_s9 = sshll.u32 %s860_s8, 4  ;;  %s741_s9 = int_to_ptr.vmem [resolvable:$false] %s740_s9 }
  0x66   : > { %s742_s11 = scalar_lea.vmem %s741_s9, 256  ;;  %p743_p4 = scmp.lt.s32.totalorder %s1036_s25, %s741_s9 }
  0x67   : > { %p738_p1 = pnand %p736_p12, %p722_p0  ;;  %p744_p13 = scmp.lt.s32.totalorder %s742_s11, %s735_s27 }
  0x69   : > { %p739_p5 = pneg %p738_p1  ;;  %p745_p6 = por %p744_p13, %p743_p4 }
  0x6b   : > { %p746_p10 = pnand %p745_p6, %p739_p5 }
  0x6d   : > { %749 = shalt.err (!%p746_p10)
}
  0x6e   : > { %s1212_s12 = smov 4   ;;  %s1213_s28 = smov 64  }
  0x6f   : > { %605 = dma.hbm_to_vmem [thread:$0]  (!%p1038_p11), %s1032_s5, 128, %s1036_s25, %s187_s13, %s1213_s28, %s1213_s28, %s1212_s12  }
  0x70   : > { %s1214_s29 = sshll.u32 %s1025_s24, 3  ;;  %s208_s27 = scalar_lea.sflag [#allocation9], %s1025_s24 }
  0x71   : > { %s211_s30 = scalar_lea.vmem [#allocation8], %s1214_s29  ;;  %s750_s8 = scalar_lea.hbm %s1045_s26, 128 }
  0x72   : > { %s218_s6 = sshll.u32 %s211_s30, 4  ;;  %p751_p4 = scmp.ne.s32.totalorder %s1045_s26, %s750_s8  ;;  %s1080_s6 = int_to_ptr.vmem [resolvable:$true] %s218_s6 }
  0x73   : > { %s755_s0 = scalar_lea.hbm %s1189_s3, 256  ;;  %p756_p3 = scmp.lt.u32.totalorder %s1045_s26, %s1189_s3 }
  0x74   : > { %p753_p5 = pnand %p751_p4, %p722_p0  ;;  %p757_p7 = scmp.lt.u32.totalorder %s755_s0, %s750_s8 }
  0x75   : > { %p759_p12 = scmp.lt.u32.totalorder %s750_s8, %s1045_s26 }
  0x76   : > { %p754_p2 = pneg %p753_p5  ;;  %p758_p9 = por %p757_p7, %p756_p3 }
  0x78   : > { %p760_p1 = por %p759_p12, %p758_p9 }
  0x7a   : > { %p761_p13 = pnand %p760_p1, %p754_p2 }
  0x7c   : > { %764 = shalt.err (!%p761_p13)
}
  0x7d   : > { %s765_s5 = scalar_lea.vmem %s1080_s6, 128  ;;  %s861_s25 = smov [#allocation8]  }
  0x7e   : > { %p766_p6 = scmp.ne.s32.totalorder %s1080_s6, %s765_s5  ;;  %s770_s13 = sshll.u32 %s861_s25, 4  ;;  %s771_s13 = int_to_ptr.vmem [resolvable:$false] %s770_s13 }
  0x7f   : > { %s772_s1 = scalar_lea.vmem %s771_s13, 256  ;;  %p773_p5 = scmp.lt.s32.totalorder %s1080_s6, %s771_s13 }
  0x80   : > { %p768_p10 = pnand %p766_p6, %p722_p0  ;;  %p774_p3 = scmp.lt.s32.totalorder %s772_s1, %s765_s5 }
  0x82   : > { %p769_p4 = pneg %p768_p10  ;;  %p775_p7 = por %p774_p3, %p773_p5 }
  0x84   : > { %p776_p9 = pnand %p775_p7, %p769_p4 }
  0x86   : > { %779 = shalt.err (!%p776_p9)
}
  0x87   : > { %608 = dma.hbm_to_vmem [thread:$0]  (!%p1038_p11), %s1045_s26, 128, %s1080_s6, %s208_s27, %s1213_s28, %s1213_s28, %s1212_s12  }
  0x88   : > { %230 = sbr.rel (%p932_p8) target bundleno = 402 (0x192), region = 36  ;;  %s1114_s0 = sand.u32 (!%p932_p8), 1, %s846_s16  }
  0x89   : > { %s1117_s2 = sshll.u32 (!%p932_p8), %s1114_s0, 3  ;;  %s233_s7 = scalar_lea.sflag (!%p932_p8), [#allocation3], %s1114_s0 }
  0x8a   : > { %s236_s29 = scalar_lea.vmem (!%p932_p8), [#allocation2], %s1117_s2  ;;  %p1215_p0 = scmp.ne.s32.totalorder (!%p932_p8), %s1202_s21, 0 }
  0x8f   : > { %825 = dma.done.wait (%p1215_p0), %s233_s7, 128  }
  0x90   : > { %827 = vsyncadd (%p1215_p0), %s233_s7, 4294967168  ;;  %p1216_p11 = scmp.eq.s32.totalorder %s913_s19, 0 }
  0x92   : > { %829 = dma.done.wait (%p1216_p11), [#allocation6], 528   ;;  %p1217_p8 = pmov %p1216_p11 }
  0x93   : > { %s250_s23 = scalar_lea.sflag [#allocation9], %s1114_s0  ;;  %s253_s24 = scalar_lea.vmem [#allocation8], %s1117_s2 }
  0x94   : > { %831 = vsyncadd (%p1217_p8), [#allocation6], 4294966768 }
  0x95   : > { %833 = dma.done.wait (%p1215_p0), %s250_s23, 128  }
  0x96   : > { %835 = vsyncadd (%p1215_p0), %s250_s23, 4294967168  ;;  %v862_v0 = vmov 0.0   ;;  %vm863_vm0 = vmmov 0   ;;  %v659_v1 = vld [vmem:[#allocation5] sm:$0xff]   ;;  %v660_v2 = vld [vmem:[#allocation5 + $0x8] sm:$0xff]   ;;  %vm333_vm1 = vcmask 523264  }
  0x97   : > { %569 = vmatprep.subr.bf16.mxu0 %v862_v0  ;;  %577 = vmatprep.mubr.msk.bf16.mxu0 %vm863_vm0, %v862_v0  ;;  %v661_v3 = vld [vmem:[#allocation5 + $0x10] sm:$0xff]   ;;  %v662_v4 = vld [vmem:[#allocation5 + $0x18] sm:$0xff]   ;;  %v541_v7 = vld [vmem:[#allocation7] ss:$0 sm:$0xff]  ;;  %s559_s21 = sshll.u32 %s913_s19, 7  ;;  %s282_s26 = scalar_lea.vmem [#allocation10], %s1117_s2 }
  0x98   : > { %570 = vmatpush3.bf16.msra.mxu0 %v659_v1  ;;  %v663_v5 = vld [vmem:[%s236_s29] sm:$0xff]   ;;  %v561_v6 = vld [vmem:[%s253_s24] sm:$0xff]   ;;  %s409_s12 = sshll.u32 %s282_s26, 4  ;;  %vm392_vm2 = vcmask 257024   ;;  %s1140_s6 = scalar_lea.hbm %s1190_s4, %s559_s21  ;;  %s1142_s12 = int_to_ptr.vmem [resolvable:$true] %s409_s12 }
  0x99   : > { %571 = vmatprep.subr.bf16.mxu0 %v862_v0  ;;  %v562_v8 = vunpack.c.l.bf16 %v561_v6  ;;  %v563_v12 = vunpack.c.h.bf16 %v561_v6  ;;  %s396_s27 = scalar_lea.sflag [#allocation4], %s1114_s0  ;;  %s780_s19 = scalar_lea.vmem %s1142_s12, 128 }
  0x9a   : > { %p781_p2 = scmp.ne.s32.totalorder %s1142_s12, %s780_s19  ;;  %p1218_p12 = scmp.ne.s32.totalorder %s1209_s14, 0 }
  0x9b   : > { %s864_s8 = smov [#allocation10]  }
  0x9c   : > { %572 = vmatpush3.bf16.msra.mxu0 %v660_v2  ;;  %p782_p1 = pnand %p781_p2, %p1218_p12  ;;  %s784_s9 = sshll.u32 %s864_s8, 4  ;;  %s785_s9 = int_to_ptr.vmem [resolvable:$false] %s784_s9 }
  0x9d   : > { %573 = vmatprep.subr.bf16.mxu0 %v862_v0  ;;  %s786_s11 = scalar_lea.vmem %s785_s9, 256  ;;  %p787_p6 = scmp.lt.s32.totalorder %s1142_s12, %s785_s9 }
  0x9e   : > { %p783_p13 = pneg %p782_p1  ;;  %p788_p10 = scmp.lt.s32.totalorder %s786_s11, %s780_s19 }
  0xa0   : > { %574 = vmatpush3.bf16.msra.mxu0 %v661_v3  ;;  %p789_p4 = por %p788_p10, %p787_p6 }
  0xa1   : > { %575 = vmatprep.subr.bf16.mxu0 %v862_v0 }
  0xa2   : > { %p790_p5 = pnand %p789_p4, %p783_p13 }
  0xa4   : > { %576 = vmatpush3.bf16.msra.mxu0 %v662_v4 }
  0xa7   : > { %578 = vmatmul.mubr.msk.bf16.vlgmr.msra.gmra.mrb[0].mxu0 %vm333_vm1, %v663_v5 }
 0x17a   : > { %v371_v9 = vpop.f32.mrb[0].mxu0 }
 0x17b   : > { %v372_v10 = vadd.f32 %v541_v7, %v371_v9  ;;  %v579_v11 = vpop.f32.mrb[1].mxu0 }
 0x17c   : > { %v374_v13 = vpop.f32.mrb[2].mxu0 }
 0x17d   : > { %v382_v14 = vadd.f32 %v562_v8, %v372_v10  ;;  %v375_v15 = vadd.f32 %v541_v7, %v374_v13  ;;  %v580_v16 = vpop.f32.mrb[3].mxu0 }
 0x17f   : > { %v557_v17 = vpack.c.bf16 %v382_v14, %v382_v14  ;;  %v383_v18 = vadd.f32 %v563_v12, %v375_v15 }
 0x181   : > { %393 = vst.msk [vmem:[%s282_s26] sm:$0xf] %vm392_vm2, %v557_v17  ;;  %v558_v19 = vpack.c.bf16 %v383_v18, %v383_v18 }
 0x183   : > { %394 = vst.msk [vmem:[%s282_s26 + $0x4] sm:$0xf] %vm392_vm2, %v558_v19 }
 0x184   : > { %793 = shalt.err (!%p790_p5)
}
 0x185   : > { %s794_s5 = scalar_lea.hbm %s1140_s6, 128  ;;  %s798_s1 = scalar_lea.hbm %s1190_s4, 256 }
 0x186   : > { %p795_p3 = scmp.ne.s32.totalorder %s1140_s6, %s794_s5  ;;  %p799_p0 = scmp.lt.u32.totalorder %s1140_s6, %s1190_s4 }
 0x187   : > { %p800_p11 = scmp.lt.u32.totalorder %s798_s1, %s794_s5  ;;  %p802_p2 = scmp.lt.u32.totalorder %s794_s5, %s1140_s6 }
 0x188   : > { %p796_p7 = pnand %p795_p3, %p1218_p12 }
 0x189   : > { %p801_p8 = por %p800_p11, %p799_p0 }
 0x18a   : > { %p797_p9 = pneg %p796_p7 }
 0x18b   : > { %p803_p1 = por %p802_p2, %p801_p8 }
 0x18d   : > { %p804_p13 = pnand %p803_p1, %p797_p9 }
 0x18f   : > { %807 = shalt.err (!%p804_p13)
}
 0x190   : > { %s865_s29 = smov 64   ;;  %s866_s23 = smov 4  }
 0x191   : > { %593 = dma.vmem_to_hbm [thread:$0]  (%p1218_p12), %s1142_s12, 128, %s1140_s6, %s396_s27, %s865_s29, %s865_s29, %s866_s23  }
 0x192 PF: > { %s424_s24 = sand.u32 1, %s842_s15   ;;  %p1219_p6 = scmp.ne.s32.totalorder %s1203_s22, 0 }
 0x193   : > { %p1220_p10 = scmp.ge.s32.totalorder %s854_s18, 2  ;;  %s425_s21 = scalar_lea.sflag [#allocation4], %s424_s24 }
 0x195   : > { %p610_p4 = pnand %p1220_p10, %p1219_p6 }
 0x197   : > { %837 = dma.done.wait (!%p610_p4), %s425_s21, 128  }
 0x198   : > { %839 = vsyncadd (!%p610_p4), %s425_s21, 4294967168  ;;  %p21_p5 = scmp.ge.s32.totalorder %s1006_s10, 4   ;;  %s1221_s15 = smov %s846_s16 }
 0x199   : > { %s1222_s16 = smov %s850_s17  ;;  %s1223_s17 = smov %s1022_s20 }
 0x19a   : > { %s1224_s18 = smov %s1006_s10  ;;  %23 = sbr.rel (!%p21_p5) target bundleno = 12 (0xc), region = 102 }
 0x1a1   :  { %430 = vsyncpa [#allocation3], 1 }
 0x1a2   :  { %432 = vsyncpa [#allocation3 + $0x1], 1 }
 0x1a3   :  { %433 = vsyncpa [#allocation6], 1 }
 0x1a4   :  { %434 = vsyncpa [#allocation9], 1 }
 0x1a5   :  { %436 = vsyncpa [#allocation9 + $0x1], 1 }
 0x1a6   :  { %437 = vsyncpa [#allocation4], 1 }
 0x1a7   :  { %439 = vsyncpa [#allocation4 + $0x1], 1 }

</bundles_post_ra>
